<compile_context>
chip_gen: v7x
topology: tpu7x:2x2x1
jax: 0.10.0
libtpu: 0.0.40
codegen_flags: <defaults>
</compile_context>

<pallas_src>
import numpy as np
import jax
import jax.numpy as jnp
from jax.experimental import pallas as pl
from jax.experimental.pallas import tpu as pltpu

NUM_JOINTS = 16
NUM_BONES = 15
FEAT = NUM_BONES * NUM_BONES       # 225
FEAT_PAD = 256                     # padded psi features; col 225 holds the 1.0
                                   # used to fold b1 into the layer-1 matmul
KCS_CHANNEL = 256                  # module default kcs_channel
CHANNEL_MID = 100                  # module default channel_mid
MID_PAD = 128                      # padded channel_mid
NUM_PATHS = 5
MAX_BLOCK_BATCH = 512              # largest batch tile per grid step

# H36M-16 skeleton: bone b connects BONE_CHILD[b] to BONE_PARENT[b]
BONE_CHILD = np.array([1, 2, 3, 4, 5, 6, 7, 8, 9, 10, 11, 12, 13, 14, 15])
BONE_PARENT = np.array([0, 1, 2, 0, 4, 5, 0, 7, 8, 8, 10, 11, 8, 13, 14])

MASK_IDX = {
    "lh": [7, 9, 10, 11],
    "rh": [7, 12, 13, 14],
    "ll": [0, 1, 2, 3, 6],
    "rl": [0, 3, 4, 5, 6],
    "hb": [0, 3, 6, 7, 8, 9, 12],
}
PATH_ORDER = ["lh", "rh", "ll", "rl", "hb"]   # kcs_path_1 .. kcs_path_5


# ----------------------------------------------------------------------------
# JAX glue (tiny geometric preprocessing)
# ----------------------------------------------------------------------------
def get_bone_vec(x):
    """(N,16,2) -> (N,15,2): bone b = x[child_b] - x[parent_b]."""
    return x[:, BONE_CHILD, :] - x[:, BONE_PARENT, :]


def get_bone_unit_vec(x):
    bv = get_bone_vec(x)
    length = jnp.linalg.norm(bv, axis=-1, keepdims=True)
    return bv / length   # matches torch semantics (no eps)


def _pose_from_bones_matrix():
    """Cinv[b, j] = 1 if bone b lies on the path from root joint 0 to joint j."""
    cinv = np.zeros((NUM_BONES, NUM_JOINTS), np.float32)
    for j in range(1, NUM_JOINTS):
        b = j - 1
        parent = BONE_PARENT[b]
        cinv[:, j] = cinv[:, parent]
        cinv[b, j] += 1.0
    return cinv


_CINV = jnp.asarray(_pose_from_bones_matrix())


def pose_from_bones(bv):
    """(N,15,2) -> (N,16,2) with root joint at the origin."""
    return jnp.einsum("nbc,bj->njc", bv, _CINV)


_PATH_MASKS = np.zeros((NUM_PATHS, NUM_BONES), np.float32)
for _i, _name in enumerate(PATH_ORDER):
    _PATH_MASKS[_i, MASK_IDX[_name]] = 1.0
_PATH_MASKS = jnp.asarray(_PATH_MASKS)


def psi_vectors(x_recon):
    """Batch-major stacked flattened Gram matrices, shape (N, 5, 225)."""
    bv = get_bone_vec(x_recon)                                     # (N,15,2)
    bvm = bv[:, None, :, :] * _PATH_MASKS[None, :, :, None]        # (N,5,15,2)
    psi = jnp.einsum("npic,npkc->npik", bvm, bvm)                  # (N,5,15,15)
    return psi.reshape(psi.shape[0], NUM_PATHS, FEAT)              # (N,5,225)


# ----------------------------------------------------------------------------
# Pallas kernel: 5 KCSpath MLPs + final LeakyReLU + Linear(5 -> 1)
# ----------------------------------------------------------------------------
def _lrelu(x):
    # nn.LeakyReLU default negative_slope = 0.01
    return jnp.maximum(x, 0.01 * x)


def kcs_disc_kernel(psi_ref, w1_ref, w2_ref, b2_ref, w3_ref, b3_ref,
                    wl_ref, bl_ref, wp_ref, bp_ref, wf_ref, bf_ref, out_ref):
    bt = out_ref.shape[1]                       # output block is (1, bt): lane-dense
    bf16 = jnp.bfloat16
    acc = jnp.zeros((bt,), jnp.float32)
    for p in range(NUM_PATHS):                  # static unrolled path loop
        # psi tile is batch-major (bt, 5*256) bf16; static lane-aligned slice
        x = psi_ref[:, p * FEAT_PAD:(p + 1) * FEAT_PAD]            # (bt, 256)
        # layer 1: bias folded into the matmul (psi col 225 == 1.0, w1 row 225 == b1)
        h1 = _lrelu(jnp.dot(x, w1_ref[p],
                            preferred_element_type=jnp.float32).astype(bf16))
        h2 = _lrelu((jnp.dot(h1, w2_ref[p],
                             preferred_element_type=jnp.float32)
                     + b2_ref[p]).astype(bf16))
        h3 = (jnp.dot(h2, w3_ref[p], preferred_element_type=jnp.float32)
              + b3_ref[p] + h1)                                    # f32 residual
        y = _lrelu(jnp.dot(h3.astype(bf16), wl_ref[p],
                           preferred_element_type=jnp.float32) + bl_ref[p])
        # tiny (bt,128)@(128,1) projection on VPU/XLU instead of an N=1 MXU matmul.
        # (If XLU ever binds at larger tiles, pack the 5 wp rows into one (128,8)
        #  RHS and do a single MXU matmul after the loop — not needed at bb<=512.)
        k = jnp.sum(y * wp_ref[p][None, :], axis=-1) + bp_ref[p]   # (bt,) f32
        # final Linear(5,1) folded into the path loop:
        #   validity = bf + sum_p leaky_relu(k_p) * wf[p]
        acc = acc + _lrelu(k) * wf_ref[p]
    out_ref[...] = (acc + bf_ref[0]).reshape(1, bt)


def _round_up(a, m):
    return (a + m - 1) // m * m


def _choose_tiling(n):
    """Return (n_pad, block_batch).

    * n <= 256: single grid step, block == whole (8-padded) batch.
    * larger n: block_batch is a multiple of 128 (lane-aligned (1, bb) output
      blocks), as large as possible up to 512 so the ~0.35us/step overhead is
      amortized and the 256-wide MXU is fed; prefer an even grid length so
      v7x's two TensorCores split the work evenly, then minimal padding.
    """
    n8 = _round_up(n, 8)
    if n8 <= 256:
        return n8, n8
    best_key, best = None, None
    for bb in (MAX_BLOCK_BATCH, 384, 256, 128):
        g = -(-n8 // bb)
        if g < 2:
            continue
        # prefer: even grid, then least padded work, then larger tile
        key = (g % 2 == 0, -g * bb, bb)
        if best_key is None or key > best_key:
            best_key, best = key, (g * bb, bb)
    return best


def _resident_spec(shape):
    """Whole-array block with a constant index map: fetched once and resident
    in VMEM across the batch grid (total weight footprint ~2.3 MiB bf16)."""
    rank = len(shape)
    return pl.BlockSpec(shape, lambda b, _r=rank: (0,) * _r)


def prepare_kernel_params(params):
    """Pad ragged dims to MXU-friendly sizes, fold b1 into w1, cast matmul
    weights to bf16 and flatten the tiny scalars for SMEM.
    (In production this is done once, not per call.)"""
    bf16 = jnp.bfloat16
    f32 = jnp.float32
    # w1 padded 225->256 along the contraction dim; row 225 carries b1 (the
    # wrapper writes 1.0 into psi column 225), remaining rows are zero.
    w1 = jnp.concatenate(
        [params["w1"], params["b1"][:, None, :],
         jnp.zeros((NUM_PATHS, FEAT_PAD - FEAT - 1, KCS_CHANNEL), f32)],
        axis=1).astype(bf16)
    return dict(
        w1=w1,
        w2=params["w2"].astype(bf16), b2=params["b2"].astype(f32),
        w3=params["w3"].astype(bf16), b3=params["b3"].astype(f32),
        wl=jnp.pad(params["wl"], ((0, 0), (0, 0), (0, MID_PAD - CHANNEL_MID))).astype(bf16),
        bl=jnp.pad(params["bl"], ((0, 0), (0, MID_PAD - CHANNEL_MID))).astype(f32),
        wp=jnp.pad(params["wp"][:, :, 0], ((0, 0), (0, MID_PAD - CHANNEL_MID))).astype(f32),
        bp=params["bp"][:, 0].astype(f32),      # (5,)  -> SMEM scalar reads
        wf=params["wf"][:, 0].astype(f32),      # (5,)  -> SMEM
        bf=params["bf"][0].astype(f32),         # (1,)  -> SMEM
    )


@jax.jit
def pos2d_discriminator(inputs_2d, params):
    n = inputs_2d.shape[0]
    kp = prepare_kernel_params(params)

    # ------- forward preamble (glue) -------
    x = inputs_2d - inputs_2d[:, :1, :]
    bv_unit = get_bone_unit_vec(x)
    x_recon = pose_from_bones(bv_unit)
    psi = psi_vectors(x_recon)                                        # (n,5,225) f32
    # pad 225 -> 256: column 225 = 1.0 (layer-1 bias fold), rest zeros
    psi = jnp.concatenate(
        [psi, jnp.ones((n, NUM_PATHS, 1), psi.dtype),
         jnp.zeros((n, NUM_PATHS, FEAT_PAD - FEAT - 1), psi.dtype)], axis=-1)
    psi = psi.reshape(n, NUM_PATHS * FEAT_PAD).astype(jnp.bfloat16)   # (n,1280) bf16

    # ------- batch padding / tiling -------
    n_pad, bb = _choose_tiling(n)
    if n_pad != n:
        psi = jnp.pad(psi, ((0, n_pad - n), (0, 0)))

    vmem_names = ["w1", "w2", "b2", "w3", "b3", "wl", "bl", "wp"]
    smem_names = ["bp", "wf", "bf"]
    args = [psi] + [kp[name] for name in vmem_names] + [kp[name] for name in smem_names]

    in_specs = ([pl.BlockSpec((bb, NUM_PATHS * FEAT_PAD), lambda b: (b, 0))]
                + [_resident_spec(kp[name].shape) for name in vmem_names]
                + [pl.BlockSpec(memory_space=pltpu.MemorySpace.SMEM)
                   for _ in smem_names])

    out = pl.pallas_call(
        kcs_disc_kernel,
        out_shape=jax.ShapeDtypeStruct((1, n_pad), jnp.float32),   # lane-dense output
        grid=(n_pad // bb,),
        in_specs=in_specs,
        out_specs=pl.BlockSpec((1, bb), lambda b: (0, b)),
        compiler_params=pltpu.CompilerParams(
            dimension_semantics=("parallel",),
            vmem_limit_bytes=48 * 1024 * 1024,
            # let XLA fuse the psi pad/reshape/bf16-cast into the kernel input
            allow_input_fusion=[i == 0 for i in range(len(args))],
        ),
    )(*args)
    # padded batch rows carry garbage; slice before returning (n is static)
    return out[0, :n].reshape(n, 1)


# ----------------------------------------------------------------------------
# Deterministic parameter init (synthetic weights, shapes from __init__)
# ----------------------------------------------------------------------------
def init_params(key):
    ks = jax.random.split(key, 12)
    C, M = KCS_CHANNEL, CHANNEL_MID

    def w(k, shape, scale=0.05):
        return (scale * jax.random.normal(k, shape)).astype(jnp.float32)

    return dict(
        w1=w(ks[0], (NUM_PATHS, FEAT, C)), b1=w(ks[1], (NUM_PATHS, C)),
        w2=w(ks[2], (NUM_PATHS, C, C)),    b2=w(ks[3], (NUM_PATHS, C)),
        w3=w(ks[4], (NUM_PATHS, C, C)),    b3=w(ks[5], (NUM_PATHS, C)),
        wl=w(ks[6], (NUM_PATHS, C, M)),    bl=w(ks[7], (NUM_PATHS, M)),
        wp=w(ks[8], (NUM_PATHS, M, 1)),    bp=w(ks[9], (NUM_PATHS, 1)),
        wf=w(ks[10], (NUM_PATHS, 1), 0.1), bf=w(ks[11], (1, 1), 0.1),
    )


# ----------------------------------------------------------------------------
# Pure-JAX reference (mirrors the kernel's bf16-at-MXU-input precision, the
# layer-1 bias fold and the bf16 LeakyReLU on h1/h2; otherwise identical to
# the torch math)
# ----------------------------------------------------------------------------
@jax.jit
def reference(inputs_2d, params):
    bf16 = jnp.bfloat16
    x = inputs_2d - inputs_2d[:, :1, :]
    bv_unit = get_bone_unit_vec(x)
    x_recon = pose_from_bones(bv_unit)
    psi = psi_vectors(x_recon)                         # (N,5,225)
    n = psi.shape[0]
    ks = []
    for p in range(NUM_PATHS):
        # layer-1 bias folded into the matmul via an appended ones column,
        # exactly as the kernel does.
        xp = jnp.concatenate([psi[:, p, :], jnp.ones((n, 1), psi.dtype)],
                             axis=1).astype(bf16)
        w1a = jnp.concatenate([params["w1"][p], params["b1"][p][None, :]],
                              axis=0).astype(bf16)
        h1 = _lrelu(jnp.dot(xp, w1a,
                            preferred_element_type=jnp.float32).astype(bf16))
        h2 = _lrelu((jnp.dot(h1, params["w2"][p].astype(bf16),
                             preferred_element_type=jnp.float32)
                     + params["b2"][p]).astype(bf16))
        h3 = (jnp.dot(h2, params["w3"][p].astype(bf16),
                      preferred_element_type=jnp.float32) + params["b3"][p] + h1)
        y = _lrelu(jnp.dot(h3.astype(bf16), params["wl"][p].astype(bf16),
                           preferred_element_type=jnp.float32) + params["bl"][p])
        wp_row = params["wp"][p][:, 0]                 # (100,)
        k = jnp.sum(y * wp_row[None, :], axis=-1, keepdims=True) + params["bp"][p]
        ks.append(k)
    near_last = _lrelu(jnp.concatenate(ks, axis=1))    # (N,5)
    validity = (jnp.sum(near_last * params["wf"][:, 0][None, :],
                        axis=-1, keepdims=True) + params["bf"][0])
    return validity


if __name__ == "__main__":
    key = jax.random.PRNGKey(0)
    k_in1, k_in2, k_par = jax.random.split(key, 3)
    params = init_params(k_par)

    # small batch: single grid step, full-array (ragged 16-row) blocks
    N1 = 13
    x1 = jax.random.normal(k_in1, (N1, NUM_JOINTS, 2), dtype=jnp.float32)
    out1 = jax.block_until_ready(pos2d_discriminator(x1, params))
    ref1 = jax.block_until_ready(reference(x1, params))
    assert out1.shape == (N1, 1)
    assert np.allclose(np.asarray(out1), np.asarray(ref1), atol=1e-3, rtol=1e-3), \
        float(np.max(np.abs(np.asarray(out1) - np.asarray(ref1))))

    # batch exercising the multi-step grid (bb=256, grid=2), batch padding and
    # lane-dense (1, 256) output stores
    N2 = 300
    x2 = jax.random.normal(k_in2, (N2, NUM_JOINTS, 2), dtype=jnp.float32)
    out2 = jax.block_until_ready(pos2d_discriminator(x2, params))
    ref2 = jax.block_until_ready(reference(x2, params))
    assert out2.shape == (N2, 1)
    assert np.allclose(np.asarray(out2), np.asarray(ref2), atol=1e-3, rtol=1e-3), \
        float(np.max(np.abs(np.asarray(out2) - np.asarray(ref2))))

    print("KERNEL_OK")
</pallas_src>

<mosaic_0001>
module attributes {stable_mosaic.version = 11 : i64} {
  func.func @kcs_disc_kernel(%arg0: i32, %arg1: memref<16x1280xbf16, #tpu.memory_space<vmem>>, %arg2: memref<5x256x256xbf16, #tpu.memory_space<vmem>>, %arg3: memref<5x256x256xbf16, #tpu.memory_space<vmem>>, %arg4: memref<5x256xf32, #tpu.memory_space<vmem>>, %arg5: memref<5x256x256xbf16, #tpu.memory_space<vmem>>, %arg6: memref<5x256xf32, #tpu.memory_space<vmem>>, %arg7: memref<5x256x128xbf16, #tpu.memory_space<vmem>>, %arg8: memref<5x128xf32, #tpu.memory_space<vmem>>, %arg9: memref<5x128xf32, #tpu.memory_space<vmem>>, %arg10: memref<5xf32, #tpu.memory_space<smem>>, %arg11: memref<5xf32, #tpu.memory_space<smem>>, %arg12: memref<1xf32, #tpu.memory_space<smem>>, %arg13: memref<1x16xf32, #tpu.memory_space<vmem>>) attributes {dimension_semantics = [#tpu.dimension_semantics<parallel>], iteration_bounds = array<i64: 1>, scalar_prefetch = 0 : i64, scratch_operands = 0 : i64, tpu.core_type = #tpu.core_type<tc>, window_params = [{transform_indices = @transform_0, window_bounds = array<i64: 16, 1280>}, {pipeline_mode = #tpu.pipeline_mode<synchronous>, transform_indices = @transform_1, window_bounds = array<i64: 5, 256, 256>}, {pipeline_mode = #tpu.pipeline_mode<synchronous>, transform_indices = @transform_2, window_bounds = array<i64: 5, 256, 256>}, {pipeline_mode = #tpu.pipeline_mode<synchronous>, transform_indices = @transform_3, window_bounds = array<i64: 5, 256>}, {pipeline_mode = #tpu.pipeline_mode<synchronous>, transform_indices = @transform_4, window_bounds = array<i64: 5, 256, 256>}, {pipeline_mode = #tpu.pipeline_mode<synchronous>, transform_indices = @transform_5, window_bounds = array<i64: 5, 256>}, {pipeline_mode = #tpu.pipeline_mode<synchronous>, transform_indices = @transform_6, window_bounds = array<i64: 5, 256, 128>}, {pipeline_mode = #tpu.pipeline_mode<synchronous>, transform_indices = @transform_7, window_bounds = array<i64: 5, 128>}, {pipeline_mode = #tpu.pipeline_mode<synchronous>, transform_indices = @transform_8, window_bounds = array<i64: 5, 128>}, {transform_indices = @transform_9, window_bounds = array<i64: 5>}, {transform_indices = @transform_10, window_bounds = array<i64: 5>}, {transform_indices = @transform_11, window_bounds = array<i64: 1>}, {transform_indices = @transform_12, window_bounds = array<i64: 1, 16>}]} {
    %cst = arith.constant 0.000000e+00 : f32
    %0 = vector.broadcast %cst : f32 to vector<16xf32>
    %c0 = arith.constant 0 : index
    %c0_0 = arith.constant 0 : index
    %1 = vector.load %arg1[%c0, %c0_0] : memref<16x1280xbf16, #tpu.memory_space<vmem>>, vector<16x256xbf16>
    %c0_1 = arith.constant 0 : index
    %c0_2 = arith.constant 0 : index
    %c0_3 = arith.constant 0 : index
    %2 = vector.load %arg2[%c0_1, %c0_2, %c0_3] : memref<5x256x256xbf16, #tpu.memory_space<vmem>>, vector<1x256x256xbf16>
    %3 = vector.shape_cast %2 : vector<1x256x256xbf16> to vector<256x256xbf16>
    %cst_4 = arith.constant dense<0.000000e+00> : vector<16x256xf32>
    %4 = tpu.matmul %1, %3, %cst_4 {dimension_numbers = #tpu.dot_dimension_numbers<[1], [0], [0], [1], [0, 0, 1, 1], [], []>} : vector<16x256xbf16>, vector<256x256xbf16>, vector<16x256xf32> -> vector<16x256xf32>
    %5 = arith.truncf %4 : vector<16x256xf32> to vector<16x256xbf16>
    %cst_5 = arith.constant 1.000980e-02 : bf16
    %6 = vector.broadcast %cst_5 : bf16 to vector<16x256xbf16>
    %7 = arith.mulf %6, %5 : vector<16x256xbf16>
    %8 = arith.maximumf %5, %7 : vector<16x256xbf16>
    %c0_6 = arith.constant 0 : index
    %c0_7 = arith.constant 0 : index
    %c0_8 = arith.constant 0 : index
    %9 = vector.load %arg3[%c0_6, %c0_7, %c0_8] : memref<5x256x256xbf16, #tpu.memory_space<vmem>>, vector<1x256x256xbf16>
    %10 = vector.shape_cast %9 : vector<1x256x256xbf16> to vector<256x256xbf16>
    %cst_9 = arith.constant dense<0.000000e+00> : vector<16x256xf32>
    %11 = tpu.matmul %8, %10, %cst_9 {dimension_numbers = #tpu.dot_dimension_numbers<[1], [0], [0], [1], [0, 0, 1, 1], [], []>} : vector<16x256xbf16>, vector<256x256xbf16>, vector<16x256xf32> -> vector<16x256xf32>
    %c0_10 = arith.constant 0 : index
    %c0_11 = arith.constant 0 : index
    %12 = vector.load %arg4[%c0_10, %c0_11] : memref<5x256xf32, #tpu.memory_space<vmem>>, vector<1x256xf32>
    %13 = vector.shape_cast %12 : vector<1x256xf32> to vector<256xf32>
    %14 = vector.shape_cast %13 : vector<256xf32> to vector<1x256xf32>
    %15 = vector.broadcast %14 : vector<1x256xf32> to vector<16x256xf32>
    %16 = arith.addf %11, %15 : vector<16x256xf32>
    %17 = arith.truncf %16 : vector<16x256xf32> to vector<16x256xbf16>
    %cst_12 = arith.constant 1.000980e-02 : bf16
    %18 = vector.broadcast %cst_12 : bf16 to vector<16x256xbf16>
    %19 = arith.mulf %18, %17 : vector<16x256xbf16>
    %20 = arith.maximumf %17, %19 : vector<16x256xbf16>
    %c0_13 = arith.constant 0 : index
    %c0_14 = arith.constant 0 : index
    %c0_15 = arith.constant 0 : index
    %21 = vector.load %arg5[%c0_13, %c0_14, %c0_15] : memref<5x256x256xbf16, #tpu.memory_space<vmem>>, vector<1x256x256xbf16>
    %22 = vector.shape_cast %21 : vector<1x256x256xbf16> to vector<256x256xbf16>
    %cst_16 = arith.constant dense<0.000000e+00> : vector<16x256xf32>
    %23 = tpu.matmul %20, %22, %cst_16 {dimension_numbers = #tpu.dot_dimension_numbers<[1], [0], [0], [1], [0, 0, 1, 1], [], []>} : vector<16x256xbf16>, vector<256x256xbf16>, vector<16x256xf32> -> vector<16x256xf32>
    %c0_17 = arith.constant 0 : index
    %c0_18 = arith.constant 0 : index
    %24 = vector.load %arg6[%c0_17, %c0_18] : memref<5x256xf32, #tpu.memory_space<vmem>>, vector<1x256xf32>
    %25 = vector.shape_cast %24 : vector<1x256xf32> to vector<256xf32>
    %26 = vector.shape_cast %25 : vector<256xf32> to vector<1x256xf32>
    %27 = vector.broadcast %26 : vector<1x256xf32> to vector<16x256xf32>
    %28 = arith.addf %23, %27 : vector<16x256xf32>
    %29 = arith.extf %8 : vector<16x256xbf16> to vector<16x256xf32>
    %30 = arith.addf %28, %29 : vector<16x256xf32>
    %31 = arith.truncf %30 : vector<16x256xf32> to vector<16x256xbf16>
    %c0_19 = arith.constant 0 : index
    %c0_20 = arith.constant 0 : index
    %c0_21 = arith.constant 0 : index
    %32 = vector.load %arg7[%c0_19, %c0_20, %c0_21] : memref<5x256x128xbf16, #tpu.memory_space<vmem>>, vector<1x256x128xbf16>
    %33 = vector.shape_cast %32 : vector<1x256x128xbf16> to vector<256x128xbf16>
    %cst_22 = arith.constant dense<0.000000e+00> : vector<16x128xf32>
    %34 = tpu.matmul %31, %33, %cst_22 {dimension_numbers = #tpu.dot_dimension_numbers<[1], [0], [0], [1], [0, 0, 1, 1], [], []>} : vector<16x256xbf16>, vector<256x128xbf16>, vector<16x128xf32> -> vector<16x128xf32>
    %c0_23 = arith.constant 0 : index
    %c0_24 = arith.constant 0 : index
    %35 = vector.load %arg8[%c0_23, %c0_24] : memref<5x128xf32, #tpu.memory_space<vmem>>, vector<1x128xf32>
    %36 = vector.shape_cast %35 : vector<1x128xf32> to vector<128xf32>
    %37 = vector.shape_cast %36 : vector<128xf32> to vector<1x128xf32>
    %38 = vector.broadcast %37 : vector<1x128xf32> to vector<16x128xf32>
    %39 = arith.addf %34, %38 : vector<16x128xf32>
    %cst_25 = arith.constant 0.00999999977 : f32
    %40 = vector.broadcast %cst_25 : f32 to vector<16x128xf32>
    %41 = arith.mulf %40, %39 : vector<16x128xf32>
    %42 = arith.maximumf %39, %41 : vector<16x128xf32>
    %c0_26 = arith.constant 0 : index
    %c0_27 = arith.constant 0 : index
    %43 = vector.load %arg9[%c0_26, %c0_27] : memref<5x128xf32, #tpu.memory_space<vmem>>, vector<1x128xf32>
    %44 = vector.shape_cast %43 : vector<1x128xf32> to vector<128xf32>
    %45 = vector.shape_cast %44 : vector<128xf32> to vector<1x128xf32>
    %46 = vector.broadcast %45 : vector<1x128xf32> to vector<16x128xf32>
    %47 = arith.mulf %42, %46 : vector<16x128xf32>
    %cst_28 = arith.constant dense<0.000000e+00> : vector<16xf32>
    %48 = vector.multi_reduction <add>, %47, %cst_28 [1] : vector<16x128xf32> to vector<16xf32>
    %c0_29 = arith.constant 0 : index
    %49 = memref.load %arg10[%c0_29] : memref<5xf32, #tpu.memory_space<smem>>
    %50 = vector.broadcast %49 : f32 to vector<16xf32>
    %51 = arith.addf %48, %50 : vector<16xf32>
    %cst_30 = arith.constant 0.00999999977 : f32
    %52 = vector.broadcast %cst_30 : f32 to vector<16xf32>
    %53 = arith.mulf %52, %51 : vector<16xf32>
    %54 = arith.maximumf %51, %53 : vector<16xf32>
    %c0_31 = arith.constant 0 : index
    %55 = memref.load %arg11[%c0_31] : memref<5xf32, #tpu.memory_space<smem>>
    %56 = vector.broadcast %55 : f32 to vector<16xf32>
    %57 = arith.mulf %54, %56 : vector<16xf32>
    %58 = arith.addf %0, %57 : vector<16xf32>
    %c0_32 = arith.constant 0 : index
    %c256 = arith.constant 256 : index
    %59 = vector.load %arg1[%c0_32, %c256] : memref<16x1280xbf16, #tpu.memory_space<vmem>>, vector<16x256xbf16>
    %c1 = arith.constant 1 : index
    %c0_33 = arith.constant 0 : index
    %c0_34 = arith.constant 0 : index
    %60 = vector.load %arg2[%c1, %c0_33, %c0_34] : memref<5x256x256xbf16, #tpu.memory_space<vmem>>, vector<1x256x256xbf16>
    %61 = vector.shape_cast %60 : vector<1x256x256xbf16> to vector<256x256xbf16>
    %cst_35 = arith.constant dense<0.000000e+00> : vector<16x256xf32>
    %62 = tpu.matmul %59, %61, %cst_35 {dimension_numbers = #tpu.dot_dimension_numbers<[1], [0], [0], [1], [0, 0, 1, 1], [], []>} : vector<16x256xbf16>, vector<256x256xbf16>, vector<16x256xf32> -> vector<16x256xf32>
    %63 = arith.truncf %62 : vector<16x256xf32> to vector<16x256xbf16>
    %cst_36 = arith.constant 1.000980e-02 : bf16
    %64 = vector.broadcast %cst_36 : bf16 to vector<16x256xbf16>
    %65 = arith.mulf %64, %63 : vector<16x256xbf16>
    %66 = arith.maximumf %63, %65 : vector<16x256xbf16>
    %c1_37 = arith.constant 1 : index
    %c0_38 = arith.constant 0 : index
    %c0_39 = arith.constant 0 : index
    %67 = vector.load %arg3[%c1_37, %c0_38, %c0_39] : memref<5x256x256xbf16, #tpu.memory_space<vmem>>, vector<1x256x256xbf16>
    %68 = vector.shape_cast %67 : vector<1x256x256xbf16> to vector<256x256xbf16>
    %cst_40 = arith.constant dense<0.000000e+00> : vector<16x256xf32>
    %69 = tpu.matmul %66, %68, %cst_40 {dimension_numbers = #tpu.dot_dimension_numbers<[1], [0], [0], [1], [0, 0, 1, 1], [], []>} : vector<16x256xbf16>, vector<256x256xbf16>, vector<16x256xf32> -> vector<16x256xf32>
    %c1_41 = arith.constant 1 : index
    %c0_42 = arith.constant 0 : index
    %70 = vector.load %arg4[%c1_41, %c0_42] : memref<5x256xf32, #tpu.memory_space<vmem>>, vector<1x256xf32>
    %71 = vector.shape_cast %70 : vector<1x256xf32> to vector<256xf32>
    %72 = vector.shape_cast %71 : vector<256xf32> to vector<1x256xf32>
    %73 = vector.broadcast %72 : vector<1x256xf32> to vector<16x256xf32>
    %74 = arith.addf %69, %73 : vector<16x256xf32>
    %75 = arith.truncf %74 : vector<16x256xf32> to vector<16x256xbf16>
    %cst_43 = arith.constant 1.000980e-02 : bf16
    %76 = vector.broadcast %cst_43 : bf16 to vector<16x256xbf16>
    %77 = arith.mulf %76, %75 : vector<16x256xbf16>
    %78 = arith.maximumf %75, %77 : vector<16x256xbf16>
    %c1_44 = arith.constant 1 : index
    %c0_45 = arith.constant 0 : index
    %c0_46 = arith.constant 0 : index
    %79 = vector.load %arg5[%c1_44, %c0_45, %c0_46] : memref<5x256x256xbf16, #tpu.memory_space<vmem>>, vector<1x256x256xbf16>
    %80 = vector.shape_cast %79 : vector<1x256x256xbf16> to vector<256x256xbf16>
    %cst_47 = arith.constant dense<0.000000e+00> : vector<16x256xf32>
    %81 = tpu.matmul %78, %80, %cst_47 {dimension_numbers = #tpu.dot_dimension_numbers<[1], [0], [0], [1], [0, 0, 1, 1], [], []>} : vector<16x256xbf16>, vector<256x256xbf16>, vector<16x256xf32> -> vector<16x256xf32>
    %c1_48 = arith.constant 1 : index
    %c0_49 = arith.constant 0 : index
    %82 = vector.load %arg6[%c1_48, %c0_49] : memref<5x256xf32, #tpu.memory_space<vmem>>, vector<1x256xf32>
    %83 = vector.shape_cast %82 : vector<1x256xf32> to vector<256xf32>
    %84 = vector.shape_cast %83 : vector<256xf32> to vector<1x256xf32>
    %85 = vector.broadcast %84 : vector<1x256xf32> to vector<16x256xf32>
    %86 = arith.addf %81, %85 : vector<16x256xf32>
    %87 = arith.extf %66 : vector<16x256xbf16> to vector<16x256xf32>
    %88 = arith.addf %86, %87 : vector<16x256xf32>
    %89 = arith.truncf %88 : vector<16x256xf32> to vector<16x256xbf16>
    %c1_50 = arith.constant 1 : index
    %c0_51 = arith.constant 0 : index
    %c0_52 = arith.constant 0 : index
    %90 = vector.load %arg7[%c1_50, %c0_51, %c0_52] : memref<5x256x128xbf16, #tpu.memory_space<vmem>>, vector<1x256x128xbf16>
    %91 = vector.shape_cast %90 : vector<1x256x128xbf16> to vector<256x128xbf16>
    %cst_53 = arith.constant dense<0.000000e+00> : vector<16x128xf32>
    %92 = tpu.matmul %89, %91, %cst_53 {dimension_numbers = #tpu.dot_dimension_numbers<[1], [0], [0], [1], [0, 0, 1, 1], [], []>} : vector<16x256xbf16>, vector<256x128xbf16>, vector<16x128xf32> -> vector<16x128xf32>
    %c1_54 = arith.constant 1 : index
    %c0_55 = arith.constant 0 : index
    %93 = vector.load %arg8[%c1_54, %c0_55] : memref<5x128xf32, #tpu.memory_space<vmem>>, vector<1x128xf32>
    %94 = vector.shape_cast %93 : vector<1x128xf32> to vector<128xf32>
    %95 = vector.shape_cast %94 : vector<128xf32> to vector<1x128xf32>
    %96 = vector.broadcast %95 : vector<1x128xf32> to vector<16x128xf32>
    %97 = arith.addf %92, %96 : vector<16x128xf32>
    %cst_56 = arith.constant 0.00999999977 : f32
    %98 = vector.broadcast %cst_56 : f32 to vector<16x128xf32>
    %99 = arith.mulf %98, %97 : vector<16x128xf32>
    %100 = arith.maximumf %97, %99 : vector<16x128xf32>
    %c1_57 = arith.constant 1 : index
    %c0_58 = arith.constant 0 : index
    %101 = vector.load %arg9[%c1_57, %c0_58] : memref<5x128xf32, #tpu.memory_space<vmem>>, vector<1x128xf32>
    %102 = vector.shape_cast %101 : vector<1x128xf32> to vector<128xf32>
    %103 = vector.shape_cast %102 : vector<128xf32> to vector<1x128xf32>
    %104 = vector.broadcast %103 : vector<1x128xf32> to vector<16x128xf32>
    %105 = arith.mulf %100, %104 : vector<16x128xf32>
    %cst_59 = arith.constant dense<0.000000e+00> : vector<16xf32>
    %106 = vector.multi_reduction <add>, %105, %cst_59 [1] : vector<16x128xf32> to vector<16xf32>
    %c1_60 = arith.constant 1 : index
    %107 = memref.load %arg10[%c1_60] : memref<5xf32, #tpu.memory_space<smem>>
    %108 = vector.broadcast %107 : f32 to vector<16xf32>
    %109 = arith.addf %106, %108 : vector<16xf32>
    %cst_61 = arith.constant 0.00999999977 : f32
    %110 = vector.broadcast %cst_61 : f32 to vector<16xf32>
    %111 = arith.mulf %110, %109 : vector<16xf32>
    %112 = arith.maximumf %109, %111 : vector<16xf32>
    %c1_62 = arith.constant 1 : index
    %113 = memref.load %arg11[%c1_62] : memref<5xf32, #tpu.memory_space<smem>>
    %114 = vector.broadcast %113 : f32 to vector<16xf32>
    %115 = arith.mulf %112, %114 : vector<16xf32>
    %116 = arith.addf %58, %115 : vector<16xf32>
    %c0_63 = arith.constant 0 : index
    %c512 = arith.constant 512 : index
    %117 = vector.load %arg1[%c0_63, %c512] : memref<16x1280xbf16, #tpu.memory_space<vmem>>, vector<16x256xbf16>
    %c2 = arith.constant 2 : index
    %c0_64 = arith.constant 0 : index
    %c0_65 = arith.constant 0 : index
    %118 = vector.load %arg2[%c2, %c0_64, %c0_65] : memref<5x256x256xbf16, #tpu.memory_space<vmem>>, vector<1x256x256xbf16>
    %119 = vector.shape_cast %118 : vector<1x256x256xbf16> to vector<256x256xbf16>
    %cst_66 = arith.constant dense<0.000000e+00> : vector<16x256xf32>
    %120 = tpu.matmul %117, %119, %cst_66 {dimension_numbers = #tpu.dot_dimension_numbers<[1], [0], [0], [1], [0, 0, 1, 1], [], []>} : vector<16x256xbf16>, vector<256x256xbf16>, vector<16x256xf32> -> vector<16x256xf32>
    %121 = arith.truncf %120 : vector<16x256xf32> to vector<16x256xbf16>
    %cst_67 = arith.constant 1.000980e-02 : bf16
    %122 = vector.broadcast %cst_67 : bf16 to vector<16x256xbf16>
    %123 = arith.mulf %122, %121 : vector<16x256xbf16>
    %124 = arith.maximumf %121, %123 : vector<16x256xbf16>
    %c2_68 = arith.constant 2 : index
    %c0_69 = arith.constant 0 : index
    %c0_70 = arith.constant 0 : index
    %125 = vector.load %arg3[%c2_68, %c0_69, %c0_70] : memref<5x256x256xbf16, #tpu.memory_space<vmem>>, vector<1x256x256xbf16>
    %126 = vector.shape_cast %125 : vector<1x256x256xbf16> to vector<256x256xbf16>
    %cst_71 = arith.constant dense<0.000000e+00> : vector<16x256xf32>
    %127 = tpu.matmul %124, %126, %cst_71 {dimension_numbers = #tpu.dot_dimension_numbers<[1], [0], [0], [1], [0, 0, 1, 1], [], []>} : vector<16x256xbf16>, vector<256x256xbf16>, vector<16x256xf32> -> vector<16x256xf32>
    %c2_72 = arith.constant 2 : index
    %c0_73 = arith.constant 0 : index
    %128 = vector.load %arg4[%c2_72, %c0_73] : memref<5x256xf32, #tpu.memory_space<vmem>>, vector<1x256xf32>
    %129 = vector.shape_cast %128 : vector<1x256xf32> to vector<256xf32>
    %130 = vector.shape_cast %129 : vector<256xf32> to vector<1x256xf32>
    %131 = vector.broadcast %130 : vector<1x256xf32> to vector<16x256xf32>
    %132 = arith.addf %127, %131 : vector<16x256xf32>
    %133 = arith.truncf %132 : vector<16x256xf32> to vector<16x256xbf16>
    %cst_74 = arith.constant 1.000980e-02 : bf16
    %134 = vector.broadcast %cst_74 : bf16 to vector<16x256xbf16>
    %135 = arith.mulf %134, %133 : vector<16x256xbf16>
    %136 = arith.maximumf %133, %135 : vector<16x256xbf16>
    %c2_75 = arith.constant 2 : index
    %c0_76 = arith.constant 0 : index
    %c0_77 = arith.constant 0 : index
    %137 = vector.load %arg5[%c2_75, %c0_76, %c0_77] : memref<5x256x256xbf16, #tpu.memory_space<vmem>>, vector<1x256x256xbf16>
    %138 = vector.shape_cast %137 : vector<1x256x256xbf16> to vector<256x256xbf16>
    %cst_78 = arith.constant dense<0.000000e+00> : vector<16x256xf32>
    %139 = tpu.matmul %136, %138, %cst_78 {dimension_numbers = #tpu.dot_dimension_numbers<[1], [0], [0], [1], [0, 0, 1, 1], [], []>} : vector<16x256xbf16>, vector<256x256xbf16>, vector<16x256xf32> -> vector<16x256xf32>
    %c2_79 = arith.constant 2 : index
    %c0_80 = arith.constant 0 : index
    %140 = vector.load %arg6[%c2_79, %c0_80] : memref<5x256xf32, #tpu.memory_space<vmem>>, vector<1x256xf32>
    %141 = vector.shape_cast %140 : vector<1x256xf32> to vector<256xf32>
    %142 = vector.shape_cast %141 : vector<256xf32> to vector<1x256xf32>
    %143 = vector.broadcast %142 : vector<1x256xf32> to vector<16x256xf32>
    %144 = arith.addf %139, %143 : vector<16x256xf32>
    %145 = arith.extf %124 : vector<16x256xbf16> to vector<16x256xf32>
    %146 = arith.addf %144, %145 : vector<16x256xf32>
    %147 = arith.truncf %146 : vector<16x256xf32> to vector<16x256xbf16>
    %c2_81 = arith.constant 2 : index
    %c0_82 = arith.constant 0 : index
    %c0_83 = arith.constant 0 : index
    %148 = vector.load %arg7[%c2_81, %c0_82, %c0_83] : memref<5x256x128xbf16, #tpu.memory_space<vmem>>, vector<1x256x128xbf16>
    %149 = vector.shape_cast %148 : vector<1x256x128xbf16> to vector<256x128xbf16>
    %cst_84 = arith.constant dense<0.000000e+00> : vector<16x128xf32>
    %150 = tpu.matmul %147, %149, %cst_84 {dimension_numbers = #tpu.dot_dimension_numbers<[1], [0], [0], [1], [0, 0, 1, 1], [], []>} : vector<16x256xbf16>, vector<256x128xbf16>, vector<16x128xf32> -> vector<16x128xf32>
    %c2_85 = arith.constant 2 : index
    %c0_86 = arith.constant 0 : index
    %151 = vector.load %arg8[%c2_85, %c0_86] : memref<5x128xf32, #tpu.memory_space<vmem>>, vector<1x128xf32>
    %152 = vector.shape_cast %151 : vector<1x128xf32> to vector<128xf32>
    %153 = vector.shape_cast %152 : vector<128xf32> to vector<1x128xf32>
    %154 = vector.broadcast %153 : vector<1x128xf32> to vector<16x128xf32>
    %155 = arith.addf %150, %154 : vector<16x128xf32>
    %cst_87 = arith.constant 0.00999999977 : f32
    %156 = vector.broadcast %cst_87 : f32 to vector<16x128xf32>
    %157 = arith.mulf %156, %155 : vector<16x128xf32>
    %158 = arith.maximumf %155, %157 : vector<16x128xf32>
    %c2_88 = arith.constant 2 : index
    %c0_89 = arith.constant 0 : index
    %159 = vector.load %arg9[%c2_88, %c0_89] : memref<5x128xf32, #tpu.memory_space<vmem>>, vector<1x128xf32>
    %160 = vector.shape_cast %159 : vector<1x128xf32> to vector<128xf32>
    %161 = vector.shape_cast %160 : vector<128xf32> to vector<1x128xf32>
    %162 = vector.broadcast %161 : vector<1x128xf32> to vector<16x128xf32>
    %163 = arith.mulf %158, %162 : vector<16x128xf32>
    %cst_90 = arith.constant dense<0.000000e+00> : vector<16xf32>
    %164 = vector.multi_reduction <add>, %163, %cst_90 [1] : vector<16x128xf32> to vector<16xf32>
    %c2_91 = arith.constant 2 : index
    %165 = memref.load %arg10[%c2_91] : memref<5xf32, #tpu.memory_space<smem>>
    %166 = vector.broadcast %165 : f32 to vector<16xf32>
    %167 = arith.addf %164, %166 : vector<16xf32>
    %cst_92 = arith.constant 0.00999999977 : f32
    %168 = vector.broadcast %cst_92 : f32 to vector<16xf32>
    %169 = arith.mulf %168, %167 : vector<16xf32>
    %170 = arith.maximumf %167, %169 : vector<16xf32>
    %c2_93 = arith.constant 2 : index
    %171 = memref.load %arg11[%c2_93] : memref<5xf32, #tpu.memory_space<smem>>
    %172 = vector.broadcast %171 : f32 to vector<16xf32>
    %173 = arith.mulf %170, %172 : vector<16xf32>
    %174 = arith.addf %116, %173 : vector<16xf32>
    %c0_94 = arith.constant 0 : index
    %c768 = arith.constant 768 : index
    %175 = vector.load %arg1[%c0_94, %c768] : memref<16x1280xbf16, #tpu.memory_space<vmem>>, vector<16x256xbf16>
    %c3 = arith.constant 3 : index
    %c0_95 = arith.constant 0 : index
    %c0_96 = arith.constant 0 : index
    %176 = vector.load %arg2[%c3, %c0_95, %c0_96] : memref<5x256x256xbf16, #tpu.memory_space<vmem>>, vector<1x256x256xbf16>
    %177 = vector.shape_cast %176 : vector<1x256x256xbf16> to vector<256x256xbf16>
    %cst_97 = arith.constant dense<0.000000e+00> : vector<16x256xf32>
    %178 = tpu.matmul %175, %177, %cst_97 {dimension_numbers = #tpu.dot_dimension_numbers<[1], [0], [0], [1], [0, 0, 1, 1], [], []>} : vector<16x256xbf16>, vector<256x256xbf16>, vector<16x256xf32> -> vector<16x256xf32>
    %179 = arith.truncf %178 : vector<16x256xf32> to vector<16x256xbf16>
    %cst_98 = arith.constant 1.000980e-02 : bf16
    %180 = vector.broadcast %cst_98 : bf16 to vector<16x256xbf16>
    %181 = arith.mulf %180, %179 : vector<16x256xbf16>
    %182 = arith.maximumf %179, %181 : vector<16x256xbf16>
    %c3_99 = arith.constant 3 : index
    %c0_100 = arith.constant 0 : index
    %c0_101 = arith.constant 0 : index
    %183 = vector.load %arg3[%c3_99, %c0_100, %c0_101] : memref<5x256x256xbf16, #tpu.memory_space<vmem>>, vector<1x256x256xbf16>
    %184 = vector.shape_cast %183 : vector<1x256x256xbf16> to vector<256x256xbf16>
    %cst_102 = arith.constant dense<0.000000e+00> : vector<16x256xf32>
    %185 = tpu.matmul %182, %184, %cst_102 {dimension_numbers = #tpu.dot_dimension_numbers<[1], [0], [0], [1], [0, 0, 1, 1], [], []>} : vector<16x256xbf16>, vector<256x256xbf16>, vector<16x256xf32> -> vector<16x256xf32>
    %c3_103 = arith.constant 3 : index
    %c0_104 = arith.constant 0 : index
    %186 = vector.load %arg4[%c3_103, %c0_104] : memref<5x256xf32, #tpu.memory_space<vmem>>, vector<1x256xf32>
    %187 = vector.shape_cast %186 : vector<1x256xf32> to vector<256xf32>
    %188 = vector.shape_cast %187 : vector<256xf32> to vector<1x256xf32>
    %189 = vector.broadcast %188 : vector<1x256xf32> to vector<16x256xf32>
    %190 = arith.addf %185, %189 : vector<16x256xf32>
    %191 = arith.truncf %190 : vector<16x256xf32> to vector<16x256xbf16>
    %cst_105 = arith.constant 1.000980e-02 : bf16
    %192 = vector.broadcast %cst_105 : bf16 to vector<16x256xbf16>
    %193 = arith.mulf %192, %191 : vector<16x256xbf16>
    %194 = arith.maximumf %191, %193 : vector<16x256xbf16>
    %c3_106 = arith.constant 3 : index
    %c0_107 = arith.constant 0 : index
    %c0_108 = arith.constant 0 : index
    %195 = vector.load %arg5[%c3_106, %c0_107, %c0_108] : memref<5x256x256xbf16, #tpu.memory_space<vmem>>, vector<1x256x256xbf16>
    %196 = vector.shape_cast %195 : vector<1x256x256xbf16> to vector<256x256xbf16>
    %cst_109 = arith.constant dense<0.000000e+00> : vector<16x256xf32>
    %197 = tpu.matmul %194, %196, %cst_109 {dimension_numbers = #tpu.dot_dimension_numbers<[1], [0], [0], [1], [0, 0, 1, 1], [], []>} : vector<16x256xbf16>, vector<256x256xbf16>, vector<16x256xf32> -> vector<16x256xf32>
    %c3_110 = arith.constant 3 : index
    %c0_111 = arith.constant 0 : index
    %198 = vector.load %arg6[%c3_110, %c0_111] : memref<5x256xf32, #tpu.memory_space<vmem>>, vector<1x256xf32>
    %199 = vector.shape_cast %198 : vector<1x256xf32> to vector<256xf32>
    %200 = vector.shape_cast %199 : vector<256xf32> to vector<1x256xf32>
    %201 = vector.broadcast %200 : vector<1x256xf32> to vector<16x256xf32>
    %202 = arith.addf %197, %201 : vector<16x256xf32>
    %203 = arith.extf %182 : vector<16x256xbf16> to vector<16x256xf32>
    %204 = arith.addf %202, %203 : vector<16x256xf32>
    %205 = arith.truncf %204 : vector<16x256xf32> to vector<16x256xbf16>
    %c3_112 = arith.constant 3 : index
    %c0_113 = arith.constant 0 : index
    %c0_114 = arith.constant 0 : index
    %206 = vector.load %arg7[%c3_112, %c0_113, %c0_114] : memref<5x256x128xbf16, #tpu.memory_space<vmem>>, vector<1x256x128xbf16>
    %207 = vector.shape_cast %206 : vector<1x256x128xbf16> to vector<256x128xbf16>
    %cst_115 = arith.constant dense<0.000000e+00> : vector<16x128xf32>
    %208 = tpu.matmul %205, %207, %cst_115 {dimension_numbers = #tpu.dot_dimension_numbers<[1], [0], [0], [1], [0, 0, 1, 1], [], []>} : vector<16x256xbf16>, vector<256x128xbf16>, vector<16x128xf32> -> vector<16x128xf32>
    %c3_116 = arith.constant 3 : index
    %c0_117 = arith.constant 0 : index
    %209 = vector.load %arg8[%c3_116, %c0_117] : memref<5x128xf32, #tpu.memory_space<vmem>>, vector<1x128xf32>
    %210 = vector.shape_cast %209 : vector<1x128xf32> to vector<128xf32>
    %211 = vector.shape_cast %210 : vector<128xf32> to vector<1x128xf32>
    %212 = vector.broadcast %211 : vector<1x128xf32> to vector<16x128xf32>
    %213 = arith.addf %208, %212 : vector<16x128xf32>
    %cst_118 = arith.constant 0.00999999977 : f32
    %214 = vector.broadcast %cst_118 : f32 to vector<16x128xf32>
    %215 = arith.mulf %214, %213 : vector<16x128xf32>
    %216 = arith.maximumf %213, %215 : vector<16x128xf32>
    %c3_119 = arith.constant 3 : index
    %c0_120 = arith.constant 0 : index
    %217 = vector.load %arg9[%c3_119, %c0_120] : memref<5x128xf32, #tpu.memory_space<vmem>>, vector<1x128xf32>
    %218 = vector.shape_cast %217 : vector<1x128xf32> to vector<128xf32>
    %219 = vector.shape_cast %218 : vector<128xf32> to vector<1x128xf32>
    %220 = vector.broadcast %219 : vector<1x128xf32> to vector<16x128xf32>
    %221 = arith.mulf %216, %220 : vector<16x128xf32>
    %cst_121 = arith.constant dense<0.000000e+00> : vector<16xf32>
    %222 = vector.multi_reduction <add>, %221, %cst_121 [1] : vector<16x128xf32> to vector<16xf32>
    %c3_122 = arith.constant 3 : index
    %223 = memref.load %arg10[%c3_122] : memref<5xf32, #tpu.memory_space<smem>>
    %224 = vector.broadcast %223 : f32 to vector<16xf32>
    %225 = arith.addf %222, %224 : vector<16xf32>
    %cst_123 = arith.constant 0.00999999977 : f32
    %226 = vector.broadcast %cst_123 : f32 to vector<16xf32>
    %227 = arith.mulf %226, %225 : vector<16xf32>
    %228 = arith.maximumf %225, %227 : vector<16xf32>
    %c3_124 = arith.constant 3 : index
    %229 = memref.load %arg11[%c3_124] : memref<5xf32, #tpu.memory_space<smem>>
    %230 = vector.broadcast %229 : f32 to vector<16xf32>
    %231 = arith.mulf %228, %230 : vector<16xf32>
    %232 = arith.addf %174, %231 : vector<16xf32>
    %c0_125 = arith.constant 0 : index
    %c1024 = arith.constant 1024 : index
    %233 = vector.load %arg1[%c0_125, %c1024] : memref<16x1280xbf16, #tpu.memory_space<vmem>>, vector<16x256xbf16>
    %c4 = arith.constant 4 : index
    %c0_126 = arith.constant 0 : index
    %c0_127 = arith.constant 0 : index
    %234 = vector.load %arg2[%c4, %c0_126, %c0_127] : memref<5x256x256xbf16, #tpu.memory_space<vmem>>, vector<1x256x256xbf16>
    %235 = vector.shape_cast %234 : vector<1x256x256xbf16> to vector<256x256xbf16>
    %cst_128 = arith.constant dense<0.000000e+00> : vector<16x256xf32>
    %236 = tpu.matmul %233, %235, %cst_128 {dimension_numbers = #tpu.dot_dimension_numbers<[1], [0], [0], [1], [0, 0, 1, 1], [], []>} : vector<16x256xbf16>, vector<256x256xbf16>, vector<16x256xf32> -> vector<16x256xf32>
    %237 = arith.truncf %236 : vector<16x256xf32> to vector<16x256xbf16>
    %cst_129 = arith.constant 1.000980e-02 : bf16
    %238 = vector.broadcast %cst_129 : bf16 to vector<16x256xbf16>
    %239 = arith.mulf %238, %237 : vector<16x256xbf16>
    %240 = arith.maximumf %237, %239 : vector<16x256xbf16>
    %c4_130 = arith.constant 4 : index
    %c0_131 = arith.constant 0 : index
    %c0_132 = arith.constant 0 : index
    %241 = vector.load %arg3[%c4_130, %c0_131, %c0_132] : memref<5x256x256xbf16, #tpu.memory_space<vmem>>, vector<1x256x256xbf16>
    %242 = vector.shape_cast %241 : vector<1x256x256xbf16> to vector<256x256xbf16>
    %cst_133 = arith.constant dense<0.000000e+00> : vector<16x256xf32>
    %243 = tpu.matmul %240, %242, %cst_133 {dimension_numbers = #tpu.dot_dimension_numbers<[1], [0], [0], [1], [0, 0, 1, 1], [], []>} : vector<16x256xbf16>, vector<256x256xbf16>, vector<16x256xf32> -> vector<16x256xf32>
    %c4_134 = arith.constant 4 : index
    %c0_135 = arith.constant 0 : index
    %244 = vector.load %arg4[%c4_134, %c0_135] : memref<5x256xf32, #tpu.memory_space<vmem>>, vector<1x256xf32>
    %245 = vector.shape_cast %244 : vector<1x256xf32> to vector<256xf32>
    %246 = vector.shape_cast %245 : vector<256xf32> to vector<1x256xf32>
    %247 = vector.broadcast %246 : vector<1x256xf32> to vector<16x256xf32>
    %248 = arith.addf %243, %247 : vector<16x256xf32>
    %249 = arith.truncf %248 : vector<16x256xf32> to vector<16x256xbf16>
    %cst_136 = arith.constant 1.000980e-02 : bf16
    %250 = vector.broadcast %cst_136 : bf16 to vector<16x256xbf16>
    %251 = arith.mulf %250, %249 : vector<16x256xbf16>
    %252 = arith.maximumf %249, %251 : vector<16x256xbf16>
    %c4_137 = arith.constant 4 : index
    %c0_138 = arith.constant 0 : index
    %c0_139 = arith.constant 0 : index
    %253 = vector.load %arg5[%c4_137, %c0_138, %c0_139] : memref<5x256x256xbf16, #tpu.memory_space<vmem>>, vector<1x256x256xbf16>
    %254 = vector.shape_cast %253 : vector<1x256x256xbf16> to vector<256x256xbf16>
    %cst_140 = arith.constant dense<0.000000e+00> : vector<16x256xf32>
    %255 = tpu.matmul %252, %254, %cst_140 {dimension_numbers = #tpu.dot_dimension_numbers<[1], [0], [0], [1], [0, 0, 1, 1], [], []>} : vector<16x256xbf16>, vector<256x256xbf16>, vector<16x256xf32> -> vector<16x256xf32>
    %c4_141 = arith.constant 4 : index
    %c0_142 = arith.constant 0 : index
    %256 = vector.load %arg6[%c4_141, %c0_142] : memref<5x256xf32, #tpu.memory_space<vmem>>, vector<1x256xf32>
    %257 = vector.shape_cast %256 : vector<1x256xf32> to vector<256xf32>
    %258 = vector.shape_cast %257 : vector<256xf32> to vector<1x256xf32>
    %259 = vector.broadcast %258 : vector<1x256xf32> to vector<16x256xf32>
    %260 = arith.addf %255, %259 : vector<16x256xf32>
    %261 = arith.extf %240 : vector<16x256xbf16> to vector<16x256xf32>
    %262 = arith.addf %260, %261 : vector<16x256xf32>
    %263 = arith.truncf %262 : vector<16x256xf32> to vector<16x256xbf16>
    %c4_143 = arith.constant 4 : index
    %c0_144 = arith.constant 0 : index
    %c0_145 = arith.constant 0 : index
    %264 = vector.load %arg7[%c4_143, %c0_144, %c0_145] : memref<5x256x128xbf16, #tpu.memory_space<vmem>>, vector<1x256x128xbf16>
    %265 = vector.shape_cast %264 : vector<1x256x128xbf16> to vector<256x128xbf16>
    %cst_146 = arith.constant dense<0.000000e+00> : vector<16x128xf32>
    %266 = tpu.matmul %263, %265, %cst_146 {dimension_numbers = #tpu.dot_dimension_numbers<[1], [0], [0], [1], [0, 0, 1, 1], [], []>} : vector<16x256xbf16>, vector<256x128xbf16>, vector<16x128xf32> -> vector<16x128xf32>
    %c4_147 = arith.constant 4 : index
    %c0_148 = arith.constant 0 : index
    %267 = vector.load %arg8[%c4_147, %c0_148] : memref<5x128xf32, #tpu.memory_space<vmem>>, vector<1x128xf32>
    %268 = vector.shape_cast %267 : vector<1x128xf32> to vector<128xf32>
    %269 = vector.shape_cast %268 : vector<128xf32> to vector<1x128xf32>
    %270 = vector.broadcast %269 : vector<1x128xf32> to vector<16x128xf32>
    %271 = arith.addf %266, %270 : vector<16x128xf32>
    %cst_149 = arith.constant 0.00999999977 : f32
    %272 = vector.broadcast %cst_149 : f32 to vector<16x128xf32>
    %273 = arith.mulf %272, %271 : vector<16x128xf32>
    %274 = arith.maximumf %271, %273 : vector<16x128xf32>
    %c4_150 = arith.constant 4 : index
    %c0_151 = arith.constant 0 : index
    %275 = vector.load %arg9[%c4_150, %c0_151] : memref<5x128xf32, #tpu.memory_space<vmem>>, vector<1x128xf32>
    %276 = vector.shape_cast %275 : vector<1x128xf32> to vector<128xf32>
    %277 = vector.shape_cast %276 : vector<128xf32> to vector<1x128xf32>
    %278 = vector.broadcast %277 : vector<1x128xf32> to vector<16x128xf32>
    %279 = arith.mulf %274, %278 : vector<16x128xf32>
    %cst_152 = arith.constant dense<0.000000e+00> : vector<16xf32>
    %280 = vector.multi_reduction <add>, %279, %cst_152 [1] : vector<16x128xf32> to vector<16xf32>
    %c4_153 = arith.constant 4 : index
    %281 = memref.load %arg10[%c4_153] : memref<5xf32, #tpu.memory_space<smem>>
    %282 = vector.broadcast %281 : f32 to vector<16xf32>
    %283 = arith.addf %280, %282 : vector<16xf32>
    %cst_154 = arith.constant 0.00999999977 : f32
    %284 = vector.broadcast %cst_154 : f32 to vector<16xf32>
    %285 = arith.mulf %284, %283 : vector<16xf32>
    %286 = arith.maximumf %283, %285 : vector<16xf32>
    %c4_155 = arith.constant 4 : index
    %287 = memref.load %arg11[%c4_155] : memref<5xf32, #tpu.memory_space<smem>>
    %288 = vector.broadcast %287 : f32 to vector<16xf32>
    %289 = arith.mulf %286, %288 : vector<16xf32>
    %290 = arith.addf %232, %289 : vector<16xf32>
    %c0_156 = arith.constant 0 : index
    %291 = memref.load %arg12[%c0_156] : memref<1xf32, #tpu.memory_space<smem>>
    %292 = vector.broadcast %291 : f32 to vector<16xf32>
    %293 = arith.addf %290, %292 : vector<16xf32>
    %294 = vector.shape_cast %293 : vector<16xf32> to vector<1x16xf32>
    %c0_157 = arith.constant 0 : index
    %c0_158 = arith.constant 0 : index
    %295 = vector.load %arg13[%c0_157, %c0_158] : memref<1x16xf32, #tpu.memory_space<vmem>>, vector<1x16xf32>
    tpu.vector_store %arg13[%c0_157, %c0_158], %294 {strides = array<i32>} : memref<1x16xf32, #tpu.memory_space<vmem>>, vector<1x16xf32>,
    return
  }
  func.func @transform_0(%arg0: i32) -> (i32, i32) {
    %c0_i32 = arith.constant 0 : i32
    %c0_i32_0 = arith.constant 0 : i32
    return %arg0, %c0_i32 : i32, i32
  }
  func.func @transform_1(%arg0: i32) -> (i32, i32, i32) {
    %c0_i32 = arith.constant 0 : i32
    %c0_i32_0 = arith.constant 0 : i32
    %c0_i32_1 = arith.constant 0 : i32
    %c0_i32_2 = arith.constant 0 : i32
    return %c0_i32, %c0_i32_0, %c0_i32_1 : i32, i32, i32
  }
  func.func @transform_2(%arg0: i32) -> (i32, i32, i32) {
    %c0_i32 = arith.constant 0 : i32
    %c0_i32_0 = arith.constant 0 : i32
    %c0_i32_1 = arith.constant 0 : i32
    %c0_i32_2 = arith.constant 0 : i32
    return %c0_i32, %c0_i32_0, %c0_i32_1 : i32, i32, i32
  }
  func.func @transform_3(%arg0: i32) -> (i32, i32) {
    %c0_i32 = arith.constant 0 : i32
    %c0_i32_0 = arith.constant 0 : i32
    %c0_i32_1 = arith.constant 0 : i32
    return %c0_i32, %c0_i32_0 : i32, i32
  }
  func.func @transform_4(%arg0: i32) -> (i32, i32, i32) {
    %c0_i32 = arith.constant 0 : i32
    %c0_i32_0 = arith.constant 0 : i32
    %c0_i32_1 = arith.constant 0 : i32
    %c0_i32_2 = arith.constant 0 : i32
    return %c0_i32, %c0_i32_0, %c0_i32_1 : i32, i32, i32
  }
  func.func @transform_5(%arg0: i32) -> (i32, i32) {
    %c0_i32 = arith.constant 0 : i32
    %c0_i32_0 = arith.constant 0 : i32
    %c0_i32_1 = arith.constant 0 : i32
    return %c0_i32, %c0_i32_0 : i32, i32
  }
  func.func @transform_6(%arg0: i32) -> (i32, i32, i32) {
    %c0_i32 = arith.constant 0 : i32
    %c0_i32_0 = arith.constant 0 : i32
    %c0_i32_1 = arith.constant 0 : i32
    %c0_i32_2 = arith.constant 0 : i32
    return %c0_i32, %c0_i32_0, %c0_i32_1 : i32, i32, i32
  }
  func.func @transform_7(%arg0: i32) -> (i32, i32) {
    %c0_i32 = arith.constant 0 : i32
    %c0_i32_0 = arith.constant 0 : i32
    %c0_i32_1 = arith.constant 0 : i32
    return %c0_i32, %c0_i32_0 : i32, i32
  }
  func.func @transform_8(%arg0: i32) -> (i32, i32) {
    %c0_i32 = arith.constant 0 : i32
    %c0_i32_0 = arith.constant 0 : i32
    %c0_i32_1 = arith.constant 0 : i32
    return %c0_i32, %c0_i32_0 : i32, i32
  }
  func.func @transform_9(%arg0: i32) -> i32 {
    %c0_i32 = arith.constant 0 : i32
    %c0_i32_0 = arith.constant 0 : i32
    return %c0_i32 : i32
  }
  func.func @transform_10(%arg0: i32) -> i32 {
    %c0_i32 = arith.constant 0 : i32
    %c0_i32_0 = arith.constant 0 : i32
    return %c0_i32 : i32
  }
  func.func @transform_11(%arg0: i32) -> i32 {
    %c0_i32 = arith.constant 0 : i32
    %c0_i32_0 = arith.constant 0 : i32
    return %c0_i32 : i32
  }
  func.func @transform_12(%arg0: i32) -> (i32, i32) {
    %c0_i32 = arith.constant 0 : i32
    %c0_i32_0 = arith.constant 0 : i32
    return %c0_i32, %arg0 : i32, i32
  }
}

</mosaic_0001>

<bundles_post_ra>
// kernel: pos2d_discriminator.2
= control target key start
LH: loop header
LB: loop body
LE: loop exit
PB: predicated region body
PF: predicated region fallthrough
CT: control target
= control target key end

     0   :  { %s9440_s0 = inlined_call_operand.vmem [shape: bf16[5,256,256], index: 0, kind: input, shape index: {}]   ;;  %s9441_s1 = inlined_call_operand.vmem [shape: bf16[5,256,256], index: 1, kind: input, shape index: {}]   ;;  %s9442_s2 = inlined_call_operand.vmem [shape: f32[5,256], index: 2, kind: input, shape index: {}]   ;;  %s9443_s3 = inlined_call_operand.vmem [shape: bf16[5,256,256], index: 3, kind: input, shape index: {}]   ;;  %s9444_s4 = inlined_call_operand.vmem [shape: f32[5,256], index: 4, kind: input, shape index: {}]   ;;  %s9445_s5 = inlined_call_operand.vmem [shape: bf16[5,256,128], index: 5, kind: input, shape index: {}]   ;;  %s9446_s6 = inlined_call_operand.vmem [shape: f32[5,128], index: 6, kind: input, shape index: {}]   ;;  %s9447_s7 = inlined_call_operand.vmem [shape: f32[5,128], index: 7, kind: input, shape index: {}]   ;;  %s9448_s8 = inlined_call_operand.vmem [shape: f32[5], index: 8, kind: input, shape index: {}]   ;;  %s9449_s9 = inlined_call_operand.vmem [shape: f32[5], index: 9, kind: input, shape index: {}]   ;;  %s9450_s10 = inlined_call_operand.<no memory space> [shape: f32[1], index: 10, kind: input, shape index: {}]   ;;  %s9451_s11 = inlined_call_operand.vmem [shape: bf16[13,1280], index: 11, kind: input, shape index: {}]   ;;  %s9452_s12 = inlined_call_operand.<no memory space> [shape: bf16[], index: 12, kind: input, shape index: {}]   ;;  %s9453_s13 = inlined_call_operand.vmem [shape: f32[1,16], index: 13, kind: output, shape index: {}]  }
   0x1   :  { %v18_v0 = vstv %s9452_s12 }
   0x2   :  { %v7480_v1 = vunpack.i.l.bf16 %v18_v0 }
   0x3   :  { %24 = vsyncpa [#allocation9], 0  ;;  %s50_s29 = sshll.u32 %s9448_s8, 4  ;;  %s51_s29 = int_to_ptr.vmem [resolvable:$true] %s50_s29 }
   0x4   :  { %25 = vsyncpa [#allocation11], 0  ;;  %s60_s15 = sshll.u32 %s9449_s9, 4  ;;  %s7376_s16 = scalar_lea.vmem %s51_s29, 16  ;;  %s61_s15 = int_to_ptr.vmem [resolvable:$true] %s60_s15 }
   0x5   :  { %p7377_p0 = scmp.ne.s32.totalorder %s51_s29, %s7376_s16  ;;  %p7381_p1 = scmp.lt.s32.totalorder %s51_s29, %s51_s29 }
   0x6   :  { %p7382_p2 = scmp.lt.s32.totalorder %s7376_s16, %s7376_s16 }
   0x8   :  { %p7383_p3 = por %p7382_p2, %p7381_p1 }
   0xa   :  { %p7384_p4 = pnand %p7383_p3, %p7377_p0 }
   0xc   :  { %7387 = shalt.err (!%p7384_p4)
}
   0xd   :  { %s7404_s12 = smov [#allocation8]   ;;  %s7388_s17 = scalar_lea.vmem %s61_s15, 16 }
   0xe   :  { %53 = dma.vmem_to_smem %s51_s29, 16, %s7404_s12, [#allocation9]  }
   0xf   :  { %p7389_p5 = scmp.ne.s32.totalorder %s61_s15, %s7388_s17  ;;  %p7393_p6 = scmp.lt.s32.totalorder %s61_s15, %s61_s15 }
  0x10   :  { %p7394_p7 = scmp.lt.s32.totalorder %s7388_s17, %s7388_s17 }
  0x12   :  { %p7395_p8 = por %p7394_p7, %p7393_p6 }
  0x14   :  { %p7396_p9 = pnand %p7395_p8, %p7389_p5 }
  0x16   :  { %7399 = shalt.err (!%p7396_p9)
}
  0x17   :  { %s7405_s8 = smov [#allocation10]  }
  0x18   :  { %63 = dma.vmem_to_smem %s61_s15, 16, %s7405_s8, [#allocation11]  }
  0x19   :  { %7400 = dma.done.wait [#allocation9], 16  }
  0x1a   :  { %7401 = vsyncadd [#allocation9], 4294967280 }
  0x1b   :  { %7402 = dma.done.wait [#allocation11], 16  }
  0x1c   :  { %7403 = vsyncadd [#allocation11], 4294967280 }
  0x1d   :  { %72 = sfence }
  0x1e   :  { %v6569_v2 = vld [vmem:[%s9440_s0 + $0x4] ss:$8 sps:$4 sm:$0xff]   ;;  %v6571_v3 = vld [vmem:[%s9440_s0] ss:$8 sps:$4 sm:$0xff]   ;;  %v6572_v4 = vld [vmem:[%s9440_s0 + $0x14] ss:$8 sps:$4 sm:$0xff]   ;;  %v214_v9 = vlaneseq }
  0x1f   :  { %627 = vmatprep.subr.bf16.mxu0 %v6569_v2  ;;  %v6574_v5 = vld [vmem:[%s9440_s0 + $0x10] ss:$8 sps:$4 sm:$0xff]   ;;  %v6575_v6 = vld [vmem:[%s9440_s0 + $0x24] ss:$8 sps:$4 sm:$0xff]   ;;  %v6577_v7 = vld [vmem:[%s9440_s0 + $0x20] ss:$8 sps:$4 sm:$0xff]  }
  0x20   :  { %628 = vmatpush1.bf16.msra.mxu0 %v6571_v3  ;;  %v6578_v8 = vld [vmem:[%s9440_s0 + $0x34] ss:$8 sps:$4 sm:$0xff]   ;;  %v6580_v10 = vld [vmem:[%s9440_s0 + $0x30] ss:$8 sps:$4 sm:$0xff]   ;;  %v6581_v11 = vld [vmem:[%s9440_s0 + $0x44] ss:$8 sps:$4 sm:$0xff]  }
  0x21   :  { %629 = vmatprep.subr.bf16.mxu0 %v6572_v4  ;;  %v7516_v12 = vshrl.u32 %v214_v9, 7  ;;  %v6583_v13 = vld [vmem:[%s9440_s0 + $0x40] ss:$8 sps:$4 sm:$0xff]   ;;  %v6584_v14 = vld [vmem:[%s9440_s0 + $0x54] ss:$8 sps:$4 sm:$0xff]   ;;  %v7406_v29 = vmov 0.0  }
  0x22   :  { %v6586_v16 = vld [vmem:[%s9440_s0 + $0x50] ss:$8 sps:$4 sm:$0xff]   ;;  %v6587_v17 = vld [vmem:[%s9440_s0 + $0x64] ss:$8 sps:$4 sm:$0xff]   ;;  %v6589_v18 = vld [vmem:[%s9440_s0 + $0x60] ss:$8 sps:$4 sm:$0xff]  }
  0x23   :  { %v7525_v15 = vadd.s32 8, %v7516_v12  ;;  %v73_v19 = vld [vmem:[%s9451_s11] sm:$0xff]   ;;  %v5314_v20 = vld [vmem:[%s9451_s11 + $0x28] sm:$0xff]   ;;  %v6590_v25 = vld [vmem:[%s9440_s0 + $0x74] ss:$8 sps:$4 sm:$0xff]   ;;  %s1375_s28 = sld [smem:[#allocation8]] }
  0x24   :  { %630 = vmatpush1.bf16.msra.mxu0 %v6574_v5  ;;  %83 = vst [vmem:[#allocation12] sm:$0xff] %v73_v19   ;;  %v212_v21 = vunpack.c.l.bf16 %v5314_v20  ;;  %v234_v22 = vunpack.c.h.bf16 %v5314_v20  ;;  %v6620_v23 = vld [vmem:[%s9441_s1 + $0x4] ss:$8 sps:$4 sm:$0xff]   ;;  %v6622_v24 = vld [vmem:[%s9441_s1] ss:$8 sps:$4 sm:$0xff]   ;;  %s5934_s29 = sld [smem:[#allocation8 + $0x2]] }
  0x25   :  { %631 = vmatprep.subr.bf16.mxu0 %v6575_v6  ;;  %vm217_vm0 = vcmp.lt.s32.totalorder %v7525_v15, 13  ;;  %880 = vmatprep.subr.bf16.mxu1 %v6620_v23  ;;  %v6623_v28 = vld [vmem:[%s9441_s1 + $0x14] ss:$8 sps:$4 sm:$0xff]   ;;  %v6625_v32 = vld [vmem:[%s9441_s1 + $0x10] ss:$8 sps:$4 sm:$0xff]   ;;  %s6182_s30 = sld [smem:[#allocation8 + $0x3]] }
  0x26   :  { %v218_v26 = vsel %vm217_vm0, %v212_v21, %v7480_v1  ;;  %v240_v27 = vsel %vm217_vm0, %v234_v22, %v7480_v1  ;;  %881 = vmatpush1.bf16.msra.mxu1 %v6622_v24  ;;  %v6626_v33 = vld [vmem:[%s9441_s1 + $0x24] ss:$8 sps:$4 sm:$0xff]   ;;  %v6592_v34 = vld [vmem:[%s9440_s0 + $0x70] ss:$8 sps:$4 sm:$0xff]   ;;  %v6628_v36 = vld [vmem:[%s9441_s1 + $0x20] ss:$8 sps:$4 sm:$0xff]  }
  0x27   :  { %v220_v30 = vpack.c.bf16 %v7406_v29, %v218_v26  ;;  %v242_v31 = vpack.c.bf16 %v7406_v29, %v240_v27  ;;  %882 = vmatprep.subr.bf16.mxu1 %v6623_v28  ;;  %v6593_v35 = vld [vmem:[%s9440_s0 + $0x84] ss:$8 sps:$4 sm:$0xff]   ;;  %v6629_v37 = vld [vmem:[%s9441_s1 + $0x34] ss:$8 sps:$4 sm:$0xff]   ;;  %v6595_v38 = vld [vmem:[%s9440_s0 + $0x80] ss:$8 sps:$4 sm:$0xff]  }
  0x28   :  { %632 = vmatpush1.bf16.msra.mxu0 %v6577_v7  ;;  %v6596_v39 = vld [vmem:[%s9440_s0 + $0x94] ss:$8 sps:$4 sm:$0xff]   ;;  %v6631_v40 = vld [vmem:[%s9441_s1 + $0x30] ss:$8 sps:$4 sm:$0xff]   ;;  %v6632_v42 = vld [vmem:[%s9441_s1 + $0x44] ss:$8 sps:$4 sm:$0xff]  }
  0x29   :  { %633 = vmatprep.subr.bf16.mxu0 %v6578_v8  ;;  %222 = vst [vmem:[#allocation12 + $0x28] sm:$0xf] %v220_v30  ;;  %244 = vst [vmem:[#allocation12 + $0x2c] sm:$0xf] %v242_v31  ;;  %v6598_v43 = vld [vmem:[%s9440_s0 + $0x90] ss:$8 sps:$4 sm:$0xff]  }
  0x2a   :  { %883 = vmatpush1.bf16.msra.mxu1 %v6625_v32  ;;  %v6599_v44 = vld [vmem:[%s9440_s0 + $0xa4] ss:$8 sps:$4 sm:$0xff]   ;;  %v6634_v45 = vld [vmem:[%s9441_s1 + $0x40] ss:$8 sps:$4 sm:$0xff]   ;;  %v6635_v46 = vld [vmem:[%s9441_s1 + $0x54] ss:$8 sps:$4 sm:$0xff]  }
  0x2b   :  { %884 = vmatprep.subr.bf16.mxu1 %v6626_v33  ;;  %v6601_v47 = vld [vmem:[%s9440_s0 + $0xa0] ss:$8 sps:$4 sm:$0xff]   ;;  %v6602_v48 = vld [vmem:[%s9440_s0 + $0xb4] ss:$8 sps:$4 sm:$0xff]   ;;  %v6637_v49 = vld [vmem:[%s9441_s1 + $0x50] ss:$8 sps:$4 sm:$0xff]  }
  0x2c   :  { %634 = vmatpush1.bf16.msra.mxu0 %v6580_v10  ;;  %v6604_v50 = vld [vmem:[%s9440_s0 + $0xb0] ss:$8 sps:$4 sm:$0xff]   ;;  %v6638_v51 = vld [vmem:[%s9441_s1 + $0x64] ss:$8 sps:$4 sm:$0xff]   ;;  %v6640_v53 = vld [vmem:[%s9441_s1 + $0x60] ss:$8 sps:$4 sm:$0xff]  }
  0x2d   :  { %635 = vmatprep.subr.bf16.mxu0 %v6581_v11  ;;  %v6605_v52 = vld [vmem:[%s9440_s0 + $0xc4] ss:$8 sps:$4 sm:$0xff]   ;;  %v6641_v54 = vld [vmem:[%s9441_s1 + $0x74] ss:$8 sps:$4 sm:$0xff]   ;;  %v6607_v55 = vld [vmem:[%s9440_s0 + $0xc0] ss:$8 sps:$4 sm:$0xff]  }
  0x2e   :  { %885 = vmatpush1.bf16.msra.mxu1 %v6628_v36  ;;  %v6608_v56 = vld [vmem:[%s9440_s0 + $0xd4] ss:$8 sps:$4 sm:$0xff]   ;;  %v6643_v57 = vld [vmem:[%s9441_s1 + $0x70] ss:$8 sps:$4 sm:$0xff]   ;;  %v6644_v58 = vld [vmem:[%s9441_s1 + $0x84] ss:$8 sps:$4 sm:$0xff]  }
  0x2f   :  { %886 = vmatprep.subr.bf16.mxu1 %v6629_v37  ;;  %v6610_v59 = vld [vmem:[%s9440_s0 + $0xd0] ss:$8 sps:$4 sm:$0xff]   ;;  %v6611_v60 = vld [vmem:[%s9440_s0 + $0xe4] ss:$8 sps:$4 sm:$0xff]   ;;  %v6646_v61 = vld [vmem:[%s9441_s1 + $0x80] ss:$8 sps:$4 sm:$0xff]  }
  0x30   :  { %636 = vmatpush1.bf16.msra.mxu0 %v6583_v13  ;;  %v6619_v41 = vld [vmem:[#allocation12 + $0x4] ss:$40 sps:$4 sm:$0xff]   ;;  %v6647_v62 = vld [vmem:[%s9441_s1 + $0x94] ss:$8 sps:$4 sm:$0xff]   ;;  %v6613_v63 = vld [vmem:[%s9440_s0 + $0xe0] ss:$8 sps:$4 sm:$0xff]  }
  0x31   :  { %637 = vmatprep.subr.bf16.mxu0 %v6584_v14  ;;  %659 = vmatprep.mubr.bf16.mxu0 %v6619_v41  ;;  %v6614_v0 = vld [vmem:[%s9440_s0 + $0xf4] ss:$8 sps:$4 sm:$0xff]   ;;  %v6649_v2 = vld [vmem:[%s9441_s1 + $0x90] ss:$8 sps:$4 sm:$0xff]   ;;  %v6650_v3 = vld [vmem:[%s9441_s1 + $0xa4] ss:$8 sps:$4 sm:$0xff]  }
  0x32   :  { %887 = vmatpush1.bf16.msra.mxu1 %v6631_v40  ;;  %v6616_v4 = vld [vmem:[%s9440_s0 + $0xf0] ss:$8 sps:$4 sm:$0xff]   ;;  %v6652_v5 = vld [vmem:[%s9441_s1 + $0xa0] ss:$8 sps:$4 sm:$0xff]   ;;  %v6653_v7 = vld [vmem:[%s9441_s1 + $0xb4] ss:$8 sps:$4 sm:$0xff]  }
  0x33   :  { %888 = vmatprep.subr.bf16.mxu1 %v6632_v42  ;;  %v6617_v6 = vld [vmem:[#allocation12] ss:$40 sps:$4 sm:$0xff]   ;;  %v6655_v8 = vld [vmem:[%s9441_s1 + $0xb0] ss:$8 sps:$4 sm:$0xff]   ;;  %v6656_v10 = vld [vmem:[%s9441_s1 + $0xc4] ss:$8 sps:$4 sm:$0xff]  }
  0x34   :  { %638 = vmatpush1.bf16.msra.mxu0 %v6586_v16  ;;  %v6658_v11 = vld [vmem:[%s9441_s1 + $0xc0] ss:$8 sps:$4 sm:$0xff]   ;;  %v6659_v13 = vld [vmem:[%s9441_s1 + $0xd4] ss:$8 sps:$4 sm:$0xff]   ;;  %v6661_v14 = vld [vmem:[%s9441_s1 + $0xd0] ss:$8 sps:$4 sm:$0xff]  }
  0x35   :  { %639 = vmatprep.subr.bf16.mxu0 %v6587_v17  ;;  %v6662_v16 = vld [vmem:[%s9441_s1 + $0xe4] ss:$8 sps:$4 sm:$0xff]   ;;  %v6664_v17 = vld [vmem:[%s9441_s1 + $0xe0] ss:$8 sps:$4 sm:$0xff]   ;;  %v6667_v19 = vld [vmem:[%s9441_s1 + $0xf0] ss:$8 sps:$4 sm:$0xff]  }
  0x36   :  { %889 = vmatpush1.bf16.msra.mxu1 %v6634_v45  ;;  %v6668_v20 = vld [vmem:[%s9443_s3] ss:$8 sps:$4 sm:$0xff]   ;;  %v6670_v21 = vld [vmem:[%s9443_s3 + $0x4] ss:$8 sps:$4 sm:$0xff]   ;;  %v6673_v22 = vld [vmem:[%s9443_s3 + $0x14] ss:$8 sps:$4 sm:$0xff]  }
  0x37   :  { %890 = vmatprep.subr.bf16.mxu1 %v6635_v46  ;;  %v6671_v23 = vld [vmem:[%s9443_s3 + $0x10] ss:$8 sps:$4 sm:$0xff]   ;;  %v6676_v24 = vld [vmem:[%s9443_s3 + $0x24] ss:$8 sps:$4 sm:$0xff]   ;;  %v6679_v26 = vld [vmem:[%s9443_s3 + $0x34] ss:$8 sps:$4 sm:$0xff]  }
  0x38   :  { %640 = vmatpush1.bf16.msra.mxu0 %v6589_v18  ;;  %v6665_v18 = vld [vmem:[%s9441_s1 + $0xf4] ss:$8 sps:$4 sm:$0xff]   ;;  %v6677_v27 = vld [vmem:[%s9443_s3 + $0x30] ss:$8 sps:$4 sm:$0xff]   ;;  %v6682_v28 = vld [vmem:[%s9443_s3 + $0x44] ss:$8 sps:$4 sm:$0xff]  }
  0x39   :  { %641 = vmatprep.subr.bf16.mxu0 %v6590_v25  ;;  %v6674_v25 = vld [vmem:[%s9443_s3 + $0x20] ss:$8 sps:$4 sm:$0xff]   ;;  %v6685_v31 = vld [vmem:[%s9443_s3 + $0x54] ss:$8 sps:$4 sm:$0xff]   ;;  %v6683_v32 = vld [vmem:[%s9443_s3 + $0x50] ss:$8 sps:$4 sm:$0xff]  }
  0x3a   :  { %891 = vmatpush1.bf16.msra.mxu1 %v6637_v49  ;;  %v6680_v30 = vld [vmem:[%s9443_s3 + $0x40] ss:$8 sps:$4 sm:$0xff]   ;;  %v6688_v33 = vld [vmem:[%s9443_s3 + $0x64] ss:$8 sps:$4 sm:$0xff]   ;;  %v6689_v36 = vld [vmem:[%s9443_s3 + $0x70] ss:$8 sps:$4 sm:$0xff]  }
  0x3b   :  { %892 = vmatprep.subr.bf16.mxu1 %v6638_v51  ;;  %v6694_v37 = vld [vmem:[%s9443_s3 + $0x84] ss:$8 sps:$4 sm:$0xff]   ;;  %v6695_v40 = vld [vmem:[%s9443_s3 + $0x90] ss:$8 sps:$4 sm:$0xff]   ;;  %v6698_v42 = vld [vmem:[%s9443_s3 + $0xa0] ss:$8 sps:$4 sm:$0xff]  }
  0x3c   :  { %642 = vmatpush1.bf16.msra.mxu0 %v6592_v34  ;;  %v6686_v34 = vld [vmem:[%s9443_s3 + $0x60] ss:$8 sps:$4 sm:$0xff]   ;;  %v6700_v41 = vld [vmem:[%s9443_s3 + $0xa4] ss:$8 sps:$4 sm:$0xff]   ;;  %s9415_s14 = sld [smem:[#allocation10]]  ;;  %s9417_s15 = sld [smem:[#allocation10 + $0x2]] }
  0x3d   :  { %643 = vmatprep.subr.bf16.mxu0 %v6593_v35  ;;  %v6691_v35 = vld [vmem:[%s9443_s3 + $0x74] ss:$8 sps:$4 sm:$0xff]   ;;  %v6706_v45 = vld [vmem:[%s9443_s3 + $0xc4] ss:$8 sps:$4 sm:$0xff]   ;;  %v6704_v46 = vld [vmem:[%s9443_s3 + $0xc0] ss:$8 sps:$4 sm:$0xff]  }
  0x3e   :  { %893 = vmatpush1.bf16.msra.mxu1 %v6640_v53  ;;  %s9419_s16 = sld [smem:[#allocation8 + $0x4]]  ;;  %s9421_s12 = sld [smem:[#allocation10 + $0x3]]  ;;  %vm5294_vm1 = vcmask 130112   ;;  %vm5297_vm2 = vcmask 122880  }
  0x3f   :  { %894 = vmatprep.subr.bf16.mxu1 %v6641_v54  ;;  %s9424_s17 = sld [smem:[#allocation10 + $0x4]] }
  0x40   :  { %644 = vmatpush1.bf16.msra.mxu0 %v6595_v38  ;;  %v6692_v38 = vld [vmem:[%s9443_s3 + $0x80] ss:$8 sps:$4 sm:$0xff]  }
  0x41   :  { %645 = vmatprep.subr.bf16.mxu0 %v6596_v39  ;;  %v6697_v39 = vld [vmem:[%s9443_s3 + $0x94] ss:$8 sps:$4 sm:$0xff]  }
  0x42   :  { %895 = vmatpush1.bf16.msra.mxu1 %v6643_v57  ;;  %v6709_v57 = vld [vmem:[%s9443_s3 + $0xd4] ss:$8 sps:$4 sm:$0xff]  }
  0x43   :  { %896 = vmatprep.subr.bf16.mxu1 %v6644_v58  ;;  %v6707_v58 = vld [vmem:[%s9443_s3 + $0xd0] ss:$8 sps:$4 sm:$0xff]  }
  0x44   :  { %646 = vmatpush1.bf16.msra.mxu0 %v6598_v43  ;;  %v6703_v43 = vld [vmem:[%s9443_s3 + $0xb4] ss:$8 sps:$4 sm:$0xff]  }
  0x45   :  { %647 = vmatprep.subr.bf16.mxu0 %v6599_v44  ;;  %v6701_v44 = vld [vmem:[%s9443_s3 + $0xb0] ss:$8 sps:$4 sm:$0xff]  }
  0x46   :  { %897 = vmatpush1.bf16.msra.mxu1 %v6646_v61  ;;  %v6715_v61 = vld [vmem:[%s9443_s3 + $0xf4] ss:$8 sps:$4 sm:$0xff]  }
  0x47   :  { %898 = vmatprep.subr.bf16.mxu1 %v6647_v62  ;;  %v6713_v62 = vld [vmem:[%s9443_s3 + $0xf0] ss:$8 sps:$4 sm:$0xff]  }
  0x48   :  { %648 = vmatpush1.bf16.msra.mxu0 %v6601_v47 }
  0x49   :  { %649 = vmatprep.subr.bf16.mxu0 %v6602_v48 }
  0x4a   :  { %899 = vmatpush1.bf16.msra.mxu1 %v6649_v2  ;;  %v6718_v2 = vld [vmem:[%s9445_s5 + $0x48] sm:$0xff]  }
  0x4b   :  { %900 = vmatprep.subr.bf16.mxu1 %v6650_v3  ;;  %v6719_v3 = vld [vmem:[%s9445_s5 + $0x8] sm:$0xff]  }
  0x4c   :  { %650 = vmatpush1.bf16.msra.mxu0 %v6604_v50 }
  0x4d   :  { %651 = vmatprep.subr.bf16.mxu0 %v6605_v52 }
  0x4e   :  { %901 = vmatpush1.bf16.msra.mxu1 %v6652_v5  ;;  %v6721_v5 = vld [vmem:[%s9445_s5 + $0x10] sm:$0xff]  }
  0x4f   :  { %902 = vmatprep.subr.bf16.mxu1 %v6653_v7  ;;  %v6723_v7 = vld [vmem:[%s9445_s5 + $0x18] sm:$0xff]  }
  0x50   :  { %652 = vmatpush1.bf16.msra.mxu0 %v6607_v55 }
  0x51   :  { %653 = vmatprep.subr.bf16.mxu0 %v6608_v56 }
  0x52   :  { %903 = vmatpush1.bf16.msra.mxu1 %v6655_v8  ;;  %v6724_v8 = vld [vmem:[%s9445_s5 + $0x60] sm:$0xff]  }
  0x53   :  { %904 = vmatprep.subr.bf16.mxu1 %v6656_v10  ;;  %v6725_v10 = vld [vmem:[%s9445_s5 + $0x20] sm:$0xff]  }
  0x54   :  { %654 = vmatpush1.bf16.msra.mxu0 %v6610_v59  ;;  %v6712_v59 = vld [vmem:[%s9443_s3 + $0xe4] ss:$8 sps:$4 sm:$0xff]  }
  0x55   :  { %655 = vmatprep.subr.bf16.mxu0 %v6611_v60  ;;  %v6710_v60 = vld [vmem:[%s9443_s3 + $0xe0] ss:$8 sps:$4 sm:$0xff]  }
  0x56   :  { %905 = vmatpush1.bf16.msra.mxu1 %v6658_v11  ;;  %v6726_v11 = vld [vmem:[%s9445_s5 + $0x68] sm:$0xff]  }
  0x57   :  { %906 = vmatprep.subr.bf16.mxu1 %v6659_v13  ;;  %v6727_v13 = vld [vmem:[%s9445_s5 + $0x28] sm:$0xff]  }
  0x58   :  { %656 = vmatpush1.bf16.msra.mxu0 %v6613_v63  ;;  %v6716_v63 = vld [vmem:[%s9445_s5 + $0x40] sm:$0xff]  }
  0x59   :  { %657 = vmatprep.subr.bf16.mxu0 %v6614_v0  ;;  %v6717_v0 = vld [vmem:[%s9445_s5] sm:$0xff]  }
  0x5a   :  { %907 = vmatpush1.bf16.msra.mxu1 %v6661_v14  ;;  %v7840_v14 = vsub.s32 0, %v7516_v12 }
  0x5b   :  { %908 = vmatprep.subr.bf16.mxu1 %v6662_v16  ;;  %v708_v16 = vld [vmem:[%s9442_s2] ss:$8 sm:$0x3] }
  0x5c   :  { %658 = vmatpush1.bf16.msra.mxu0 %v6616_v4  ;;  %v6720_v4 = vld [vmem:[%s9445_s5 + $0x50] sm:$0xff]  }
  0x5d   :  { %1133 = vmatprep.subr.bf16.mxu0 %v6670_v21 }
  0x5e   :  { %909 = vmatpush1.bf16.msra.mxu1 %v6664_v17  ;;  %v7846_v17 = vsub.s32 1, %v7516_v12 }
  0x5f   :  { %660 = vmatmul.mubr.bf16.vlgmr.msra.gmra.mrb[0].mxu0 %v6617_v6  ;;  %910 = vmatprep.subr.bf16.mxu1 %v6665_v18  ;;  %v6722_v6 = vld [vmem:[%s9445_s5 + $0x58] sm:$0xff]   ;;  %v713_v18 = vrot.slane %v708_v16, %v7840_v14 }
  0x60   :  { %1134 = vmatpush1.bf16.msra.mxu0 %v6668_v20  ;;  %v717_v20 = vrot.slane %v708_v16, %v7846_v17  ;;  %v6738_v16 = vld [vmem:[%s9440_s0 + $0x120] ss:$8 sps:$4 sm:$0xff]  }
  0x61   :  { %1135 = vmatprep.subr.bf16.mxu0 %v6673_v22 }
  0x62   :  { %911 = vmatpush1.bf16.msra.mxu1 %v6667_v19 }
  0x63   :  { %6456 = vmatprep.subr.bf16.mxu1 %v6716_v63 }
  0x64   :  { %1136 = vmatpush1.bf16.msra.mxu0 %v6671_v23 }
  0x65   :  { %1137 = vmatprep.subr.bf16.mxu0 %v6676_v24 }
  0x68   :  { %1138 = vmatpush1.bf16.msra.mxu0 %v6674_v25 }
  0x69   :  { %1139 = vmatprep.subr.bf16.mxu0 %v6679_v26 }
  0x6c   :  { %1140 = vmatpush1.bf16.msra.mxu0 %v6677_v27 }
  0x6d   :  { %1141 = vmatprep.subr.bf16.mxu0 %v6682_v28 }
  0x70   :  { %1142 = vmatpush1.bf16.msra.mxu0 %v6680_v30 }
  0x71   :  { %1143 = vmatprep.subr.bf16.mxu0 %v6685_v31 }
  0x74   :  { %1144 = vmatpush1.bf16.msra.mxu0 %v6683_v32 }
  0x75   :  { %1145 = vmatprep.subr.bf16.mxu0 %v6688_v33 }
  0x78   :  { %1146 = vmatpush1.bf16.msra.mxu0 %v6686_v34 }
  0x79   :  { %1147 = vmatprep.subr.bf16.mxu0 %v6691_v35  ;;  %v6728_v35 = vld [vmem:[%s9445_s5 + $0x70] sm:$0xff]  }
  0x7c   :  { %1148 = vmatpush1.bf16.msra.mxu0 %v6689_v36  ;;  %v6729_v36 = vld [vmem:[%s9445_s5 + $0x30] sm:$0xff]  }
  0x7d   :  { %1149 = vmatprep.subr.bf16.mxu0 %v6694_v37  ;;  %v6730_v37 = vld [vmem:[%s9445_s5 + $0x78] sm:$0xff]  }
  0x80   :  { %1150 = vmatpush1.bf16.msra.mxu0 %v6692_v38  ;;  %v6731_v38 = vld [vmem:[%s9445_s5 + $0x38] sm:$0xff]  }
  0x81   :  { %1151 = vmatprep.subr.bf16.mxu0 %v6697_v39  ;;  %v6734_v39 = vld [vmem:[%s9440_s0 + $0x104] ss:$8 sps:$4 sm:$0xff]  }
  0x84   :  { %1152 = vmatpush1.bf16.msra.mxu0 %v6695_v40  ;;  %v5316_v40 = vld [vmem:[%s9451_s11 + $0x30] sm:$0xff]  }
  0x85   :  { %1153 = vmatprep.subr.bf16.mxu0 %v6700_v41  ;;  %v256_v41 = vunpack.c.l.bf16 %v5316_v40 }
  0x88   :  { %1154 = vmatpush1.bf16.msra.mxu0 %v6698_v42  ;;  %v278_v42 = vunpack.c.h.bf16 %v5316_v40  ;;  %v6771_v40 = vld [vmem:[%s9440_s0 + $0x1d0] ss:$8 sps:$4 sm:$0xff]  }
  0x89   :  { %1155 = vmatprep.subr.bf16.mxu0 %v6703_v43  ;;  %v262_v43 = vsel %vm217_vm0, %v256_v41, %v7480_v1  ;;  %v6776_v41 = vld [vmem:[%s9440_s0 + $0x1e4] ss:$8 sps:$4 sm:$0xff]  }
  0x8c   :  { %1156 = vmatpush1.bf16.msra.mxu0 %v6701_v44  ;;  %v284_v44 = vsel %vm217_vm0, %v278_v42, %v7480_v1  ;;  %v6774_v42 = vld [vmem:[%s9440_s0 + $0x1e0] ss:$8 sps:$4 sm:$0xff]  }
  0x8d   :  { %1157 = vmatprep.subr.bf16.mxu0 %v6706_v45  ;;  %v264_v45 = vpack.c.bf16 %v7406_v29, %v262_v43  ;;  %v6779_v43 = vld [vmem:[%s9440_s0 + $0x1f4] ss:$8 sps:$4 sm:$0xff]  }
  0x8f   :  { %266 = vst [vmem:[#allocation12 + $0x30] sm:$0xf] %v264_v45 }
  0x90   :  { %1158 = vmatpush1.bf16.msra.mxu0 %v6704_v46  ;;  %v286_v46 = vpack.c.bf16 %v7406_v29, %v284_v44  ;;  %v6777_v44 = vld [vmem:[%s9440_s0 + $0x1f0] ss:$8 sps:$4 sm:$0xff]  }
  0x91   :  { %1159 = vmatprep.subr.bf16.mxu0 %v6709_v57 }
  0x92   :  { %288 = vst [vmem:[#allocation12 + $0x34] sm:$0xf] %v286_v46  ;;  %v6781_v46 = vld [vmem:[%s9441_s1 + $0x100] ss:$8 sps:$4 sm:$0xff]  }
  0x94   :  { %1160 = vmatpush1.bf16.msra.mxu0 %v6707_v58 }
  0x95   :  { %1161 = vmatprep.subr.bf16.mxu0 %v6712_v59 }
  0x98   :  { %1162 = vmatpush1.bf16.msra.mxu0 %v6710_v60 }
  0x99   :  { %1163 = vmatprep.subr.bf16.mxu0 %v6715_v61 }
  0x9c   :  { %1164 = vmatpush1.bf16.msra.mxu0 %v6713_v62 }
 0x132   :  { %v661_v47 = vpop.f32.mrb[0].mxu0 }
 0x133   :  { %v663_v48 = vpop.f32.mrb[1].mxu0 }
 0x134   :  { %v665_v49 = vpop.f32.mrb[2].mxu0 }
 0x135   :  { %v670_v50 = vpack.c.bf16 %v665_v49, %v661_v47  ;;  %v667_v51 = vpop.f32.mrb[3].mxu0  ;;  %v7879_v47 = vld [vmem:[%s9451_s11 + $0x8] sm:$0xff]  }
 0x136   :  { %v671_v52 = vpack.c.bf16 %v667_v51, %v663_v48  ;;  %v961_v48 = vld [vmem:[%s9444_s4] ss:$8 sm:$0x3] }
 0x137   :  { %v672_v53 = vmul.bf16 1009007652, %v670_v50  ;;  %v966_v49 = vrot.slane %v961_v48, %v7840_v14 }
 0x138   :  { %v673_v54 = vmul.bf16 1009007652, %v671_v52 }
 0x139   :  { %v7781_v56 = vmax.bf16 %v672_v53, %v670_v50  ;;  %v970_v50 = vrot.slane %v961_v48, %v7846_v17  ;;  %v6783_v48 = vld [vmem:[%s9441_s1 + $0x104] ss:$8 sps:$4 sm:$0xff]  }
 0x13a   :  { %v7779_v55 = vmax.bf16 %v673_v54, %v671_v52  ;;  %1849 = vmatprep.subr.bf16.mxu0 %v6783_v48  ;;  %v6846_v48 = vld [vmem:[%s9443_s3 + $0x154] ss:$8 sps:$4 sm:$0xff]  }
 0x13b   :  { %v1176_v53 = vunpack.c.l.bf16 %v7781_v56  ;;  %v1178_v62 = vunpack.c.h.bf16 %v7781_v56 }
 0x13c   :  { %912 = vmatprep.mubr.bf16.mxu1 %v7779_v55  ;;  %v1177_v58 = vunpack.c.l.bf16 %v7779_v55 }
 0x13d   :  { %913 = vmatmul.mubr.bf16.vlgmr.msra.gmra.mrb[0].mxu1 %v7781_v56  ;;  %v6737_v56 = vld [vmem:[%s9440_s0 + $0x114] ss:$8 sps:$4 sm:$0xff]  }
 0x13e   :  { %6457 = vmatpush3.bf16.msra.mxu1 %v6717_v0 }
 0x13f   :  { %6458 = vmatprep.subr.bf16.mxu1 %v6718_v2 }
 0x142   :  { %6459 = vmatpush3.bf16.msra.mxu1 %v6719_v3  ;;  %v1179_v3 = vunpack.c.h.bf16 %v7779_v55  ;;  %v6735_v55 = vld [vmem:[%s9440_s0 + $0x110] ss:$8 sps:$4 sm:$0xff]  }
 0x143   :  { %6460 = vmatprep.subr.bf16.mxu1 %v6720_v4 }
 0x146   :  { %6461 = vmatpush3.bf16.msra.mxu1 %v6721_v5  ;;  %v7890_v5 = vld [vmem:[#allocation12 + $0x30] sm:$0xff] }
 0x147   :  { %6462 = vmatprep.subr.bf16.mxu1 %v6722_v6  ;;  %v5472_v45 = vcombine.low %v7879_v47, %v7890_v5 }
 0x14a   :  { %6463 = vmatpush3.bf16.msra.mxu1 %v6723_v7 }
 0x14b   :  { %6464 = vmatprep.subr.bf16.mxu1 %v6724_v8 }
 0x14e   :  { %6465 = vmatpush3.bf16.msra.mxu1 %v6725_v10  ;;  %v6732_v10 = vld [vmem:[%s9440_s0 + $0x100] ss:$8 sps:$4 sm:$0xff]  }
 0x14f   :  { %6466 = vmatprep.subr.bf16.mxu1 %v6726_v11  ;;  %v5473_v11 = vcombine.high %v7879_v47, %v7890_v5  ;;  %v6786_v47 = vld [vmem:[%s9441_s1 + $0x114] ss:$8 sps:$4 sm:$0xff]   ;;  %v6813_v5 = vld [vmem:[%s9441_s1 + $0x1a4] ss:$8 sps:$4 sm:$0xff]  }
 0x152   :  { %6467 = vmatpush3.bf16.msra.mxu1 %v6727_v13  ;;  %v6740_v13 = vld [vmem:[%s9440_s0 + $0x124] ss:$8 sps:$4 sm:$0xff]  }
 0x153   :  { %6468 = vmatprep.subr.bf16.mxu1 %v6728_v35  ;;  %v6767_v35 = vld [vmem:[%s9440_s0 + $0x1b4] ss:$8 sps:$4 sm:$0xff]  }
 0x156   :  { %6469 = vmatpush3.bf16.msra.mxu1 %v6729_v36  ;;  %v6765_v36 = vld [vmem:[%s9440_s0 + $0x1b0] ss:$8 sps:$4 sm:$0xff]  }
 0x157   :  { %6470 = vmatprep.subr.bf16.mxu1 %v6730_v37  ;;  %v6770_v37 = vld [vmem:[%s9440_s0 + $0x1c4] ss:$8 sps:$4 sm:$0xff]  }
 0x15a   :  { %6471 = vmatpush3.bf16.msra.mxu1 %v6731_v38  ;;  %v6768_v38 = vld [vmem:[%s9440_s0 + $0x1c0] ss:$8 sps:$4 sm:$0xff]  }
 0x15b   :  { %1594 = vmatprep.subr.bf16.mxu1 %v6734_v39  ;;  %v6773_v39 = vld [vmem:[%s9440_s0 + $0x1d4] ss:$8 sps:$4 sm:$0xff]  }
 0x210   :  { %v914_v19 = vpop.f32.mrb[0].mxu1 }
 0x211   :  { %v916_v21 = vpop.f32.mrb[1].mxu1  ;;  %v915_v23 = vadd.f32 %v914_v19, %v713_v18  ;;  %v6741_v19 = vld [vmem:[%s9440_s0 + $0x130] ss:$8 sps:$4 sm:$0xff]  }
 0x212   :  { %v918_v22 = vpop.f32.mrb[2].mxu1  ;;  %v917_v26 = vadd.f32 %v916_v21, %v717_v20  ;;  %v6744_v21 = vld [vmem:[%s9440_s0 + $0x140] ss:$8 sps:$4 sm:$0xff]  }
 0x213   :  { %v919_v24 = vadd.f32 %v918_v22, %v713_v18  ;;  %v920_v25 = vpop.f32.mrb[3].mxu1  ;;  %v6743_v18 = vld [vmem:[%s9440_s0 + $0x134] ss:$8 sps:$4 sm:$0xff]  }
 0x214   :  { %v921_v27 = vadd.f32 %v920_v25, %v717_v20  ;;  %v6746_v20 = vld [vmem:[%s9440_s0 + $0x144] ss:$8 sps:$4 sm:$0xff]   ;;  %v6749_v22 = vld [vmem:[%s9440_s0 + $0x154] ss:$8 sps:$4 sm:$0xff]   ;;  %v6750_v25 = vld [vmem:[%s9440_s0 + $0x160] ss:$8 sps:$4 sm:$0xff]  }
 0x215   :  { %v923_v28 = vpack.c.bf16 %v919_v24, %v915_v23  ;;  %v6747_v23 = vld [vmem:[%s9440_s0 + $0x150] ss:$8 sps:$4 sm:$0xff]   ;;  %v6752_v24 = vld [vmem:[%s9440_s0 + $0x164] ss:$8 sps:$4 sm:$0xff]  }
 0x216   :  { %v924_v30 = vpack.c.bf16 %v921_v27, %v917_v26  ;;  %v6755_v26 = vld [vmem:[%s9440_s0 + $0x174] ss:$8 sps:$4 sm:$0xff]   ;;  %v6753_v27 = vld [vmem:[%s9440_s0 + $0x170] ss:$8 sps:$4 sm:$0xff]  }
 0x217   :  { %v925_v31 = vmul.bf16 1009007652, %v923_v28 }
 0x218   :  { %v926_v32 = vmul.bf16 1009007652, %v924_v30 }
 0x219   :  { %v927_v34 = vmax.bf16 %v925_v31, %v923_v28  ;;  %v6758_v28 = vld [vmem:[%s9440_s0 + $0x184] ss:$8 sps:$4 sm:$0xff]   ;;  %v6761_v31 = vld [vmem:[%s9440_s0 + $0x194] ss:$8 sps:$4 sm:$0xff]  }
 0x21a   :  { %v928_v33 = vmax.bf16 %v926_v32, %v924_v30  ;;  %v6756_v30 = vld [vmem:[%s9440_s0 + $0x180] ss:$8 sps:$4 sm:$0xff]   ;;  %v6759_v32 = vld [vmem:[%s9440_s0 + $0x190] ss:$8 sps:$4 sm:$0xff]  }
 0x21c   :  { %1165 = vmatprep.mubr.bf16.mxu0 %v928_v33  ;;  %v6764_v33 = vld [vmem:[%s9440_s0 + $0x1a4] ss:$8 sps:$4 sm:$0xff]  }
 0x21d   :  { %1166 = vmatmul.mubr.bf16.vlgmr.msra.gmra.mrb[4].mxu0 %v927_v34  ;;  %v6762_v34 = vld [vmem:[%s9440_s0 + $0x1a0] ss:$8 sps:$4 sm:$0xff]  }
 0x21e   :  { %1850 = vmatpush1.bf16.msra.mxu0 %v6781_v46  ;;  %v6841_v46 = vld [vmem:[%s9443_s3 + $0x140] ss:$8 sps:$4 sm:$0xff]  }
 0x21f   :  { %1851 = vmatprep.subr.bf16.mxu0 %v6786_v47  ;;  %v6849_v47 = vld [vmem:[%s9443_s3 + $0x164] ss:$8 sps:$4 sm:$0xff]  }
 0x2f0   :  { %v1167_v51 = vpop.f32.mrb[4].mxu0 }
 0x2f1   :  { %v1168_v52 = vadd.f32 %v1167_v51, %v966_v49  ;;  %v1169_v54 = vpop.f32.mrb[5].mxu0  ;;  %v6789_v51 = vld [vmem:[%s9441_s1 + $0x124] ss:$8 sps:$4 sm:$0xff]  }
 0x2f2   :  { %v1170_v57 = vadd.f32 %v1169_v54, %v970_v50  ;;  %v1171_v59 = vpop.f32.mrb[6].mxu0  ;;  %v6795_v54 = vld [vmem:[%s9441_s1 + $0x144] ss:$8 sps:$4 sm:$0xff]  }
 0x2f3   :  { %v1180_v60 = vadd.f32 %v1176_v53, %v1168_v52  ;;  %v1172_v61 = vadd.f32 %v1171_v59, %v966_v49  ;;  %v1173_v63 = vpop.f32.mrb[7].mxu0  ;;  %v6784_v49 = vld [vmem:[%s9441_s1 + $0x110] ss:$8 sps:$4 sm:$0xff]   ;;  %v6792_v52 = vld [vmem:[%s9441_s1 + $0x134] ss:$8 sps:$4 sm:$0xff]  }
 0x2f4   :  { %v1181_v0 = vadd.f32 %v1177_v58, %v1170_v57  ;;  %v1174_v2 = vadd.f32 %v1173_v63, %v970_v50  ;;  %1852 = vmatpush1.bf16.msra.mxu0 %v6784_v49  ;;  %v6787_v50 = vld [vmem:[%s9441_s1 + $0x120] ss:$8 sps:$4 sm:$0xff]   ;;  %v6790_v53 = vld [vmem:[%s9441_s1 + $0x130] ss:$8 sps:$4 sm:$0xff]   ;;  %v6798_v58 = vld [vmem:[%s9441_s1 + $0x154] ss:$8 sps:$4 sm:$0xff]  }
 0x2f5   :  { %v1182_v4 = vadd.f32 %v1178_v62, %v1172_v61  ;;  %1853 = vmatprep.subr.bf16.mxu0 %v6789_v51  ;;  %v6793_v57 = vld [vmem:[%s9441_s1 + $0x140] ss:$8 sps:$4 sm:$0xff]   ;;  %v6796_v59 = vld [vmem:[%s9441_s1 + $0x150] ss:$8 sps:$4 sm:$0xff]   ;;  %v6804_v62 = vld [vmem:[%s9441_s1 + $0x174] ss:$8 sps:$4 sm:$0xff]  }
 0x2f6   :  { %v1183_v6 = vadd.f32 %v1179_v3, %v1174_v2  ;;  %v6799_v61 = vld [vmem:[%s9441_s1 + $0x160] ss:$8 sps:$4 sm:$0xff]   ;;  %v6802_v63 = vld [vmem:[%s9441_s1 + $0x170] ss:$8 sps:$4 sm:$0xff]   ;;  %v6810_v3 = vld [vmem:[%s9441_s1 + $0x194] ss:$8 sps:$4 sm:$0xff]  }
 0x2f7   :  { %v1184_v7 = vpack.c.bf16 %v1182_v4, %v1180_v60  ;;  %v6801_v60 = vld [vmem:[%s9441_s1 + $0x164] ss:$8 sps:$4 sm:$0xff]   ;;  %v6805_v2 = vld [vmem:[%s9441_s1 + $0x180] ss:$8 sps:$4 sm:$0xff]   ;;  %v6808_v4 = vld [vmem:[%s9441_s1 + $0x190] ss:$8 sps:$4 sm:$0xff]  }
 0x2f8   :  { %v1185_v8 = vpack.c.bf16 %v1183_v6, %v1181_v0  ;;  %1854 = vmatpush1.bf16.msra.mxu0 %v6787_v50  ;;  %v6807_v0 = vld [vmem:[%s9441_s1 + $0x184] ss:$8 sps:$4 sm:$0xff]   ;;  %v6811_v6 = vld [vmem:[%s9441_s1 + $0x1a0] ss:$8 sps:$4 sm:$0xff]   ;;  %v6844_v49 = vld [vmem:[%s9443_s3 + $0x150] ss:$8 sps:$4 sm:$0xff]  }
 0x2f9   :  { %1855 = vmatprep.subr.bf16.mxu0 %v6792_v52  ;;  %v6847_v50 = vld [vmem:[%s9443_s3 + $0x160] ss:$8 sps:$4 sm:$0xff]   ;;  %v6852_v51 = vld [vmem:[%s9443_s3 + $0x174] ss:$8 sps:$4 sm:$0xff]   ;;  %v6850_v52 = vld [vmem:[%s9443_s3 + $0x170] ss:$8 sps:$4 sm:$0xff]  }
 0x2fa   :  { %1351 = vmatprep.mubr.bf16.mxu1 %v1185_v8  ;;  %v6814_v8 = vld [vmem:[%s9441_s1 + $0x1b0] ss:$8 sps:$4 sm:$0xff]  }
 0x2fb   :  { %1352 = vmatmul.mubr.bf16.vlgmr.msra.gmra.mrb[4].mxu1 %v1184_v7  ;;  %v6816_v7 = vld [vmem:[%s9441_s1 + $0x1b4] ss:$8 sps:$4 sm:$0xff]  }
 0x2fc   :  { %1595 = vmatpush1.bf16.msra.mxu1 %v6732_v10  ;;  %1626 = vmatprep.mubr.bf16.mxu1 %v5473_v11  ;;  %v6819_v10 = vld [vmem:[%s9441_s1 + $0x1c4] ss:$8 sps:$4 sm:$0xff]   ;;  %v6817_v11 = vld [vmem:[%s9441_s1 + $0x1c0] ss:$8 sps:$4 sm:$0xff]  }
 0x2fd   :  { %1596 = vmatprep.subr.bf16.mxu1 %v6737_v56  ;;  %1856 = vmatpush1.bf16.msra.mxu0 %v6790_v53  ;;  %v6822_v56 = vld [vmem:[%s9441_s1 + $0x1d4] ss:$8 sps:$4 sm:$0xff]  }
 0x2fe   :  { %1857 = vmatprep.subr.bf16.mxu0 %v6795_v54  ;;  %v6855_v54 = vld [vmem:[%s9443_s3 + $0x184] ss:$8 sps:$4 sm:$0xff]  }
 0x300   :  { %1597 = vmatpush1.bf16.msra.mxu1 %v6735_v55  ;;  %v6820_v55 = vld [vmem:[%s9441_s1 + $0x1d0] ss:$8 sps:$4 sm:$0xff]  }
 0x301   :  { %1598 = vmatprep.subr.bf16.mxu1 %v6740_v13  ;;  %1858 = vmatpush1.bf16.msra.mxu0 %v6793_v57  ;;  %v6825_v13 = vld [vmem:[%s9441_s1 + $0x1e4] ss:$8 sps:$4 sm:$0xff]  }
 0x302   :  { %1859 = vmatprep.subr.bf16.mxu0 %v6798_v58 }
 0x304   :  { %1599 = vmatpush1.bf16.msra.mxu1 %v6738_v16  ;;  %v6823_v16 = vld [vmem:[%s9441_s1 + $0x1e0] ss:$8 sps:$4 sm:$0xff]  }
 0x305   :  { %1600 = vmatprep.subr.bf16.mxu1 %v6743_v18  ;;  %1860 = vmatpush1.bf16.msra.mxu0 %v6796_v59  ;;  %v6828_v18 = vld [vmem:[%s9441_s1 + $0x1f4] ss:$8 sps:$4 sm:$0xff]  }
 0x306   :  { %1861 = vmatprep.subr.bf16.mxu0 %v6801_v60 }
 0x308   :  { %1601 = vmatpush1.bf16.msra.mxu1 %v6741_v19  ;;  %v6826_v19 = vld [vmem:[%s9441_s1 + $0x1f0] ss:$8 sps:$4 sm:$0xff]  }
 0x309   :  { %1602 = vmatprep.subr.bf16.mxu1 %v6746_v20  ;;  %1862 = vmatpush1.bf16.msra.mxu0 %v6799_v61  ;;  %v6853_v61 = vld [vmem:[%s9443_s3 + $0x180] ss:$8 sps:$4 sm:$0xff]  }
 0x30a   :  { %1863 = vmatprep.subr.bf16.mxu0 %v6804_v62 }
 0x30c   :  { %1603 = vmatpush1.bf16.msra.mxu1 %v6744_v21  ;;  %v5422_v21 = vld [vmem:[%s9446_s6] ss:$0 sm:$0xff] }
 0x30d   :  { %1604 = vmatprep.subr.bf16.mxu1 %v6749_v22  ;;  %1864 = vmatpush1.bf16.msra.mxu0 %v6802_v63  ;;  %v6858_v63 = vld [vmem:[%s9443_s3 + $0x194] ss:$8 sps:$4 sm:$0xff]  }
 0x30e   :  { %1865 = vmatprep.subr.bf16.mxu0 %v6807_v0 }
 0x310   :  { %1605 = vmatpush1.bf16.msra.mxu1 %v6747_v23 }
 0x311   :  { %1606 = vmatprep.subr.bf16.mxu1 %v6752_v24  ;;  %1866 = vmatpush1.bf16.msra.mxu0 %v6805_v2 }
 0x312   :  { %1867 = vmatprep.subr.bf16.mxu0 %v6810_v3  ;;  %v6856_v3 = vld [vmem:[%s9443_s3 + $0x190] ss:$8 sps:$4 sm:$0xff]  }
 0x314   :  { %1607 = vmatpush1.bf16.msra.mxu1 %v6750_v25 }
 0x315   :  { %1608 = vmatprep.subr.bf16.mxu1 %v6755_v26  ;;  %1868 = vmatpush1.bf16.msra.mxu0 %v6808_v4 }
 0x316   :  { %1869 = vmatprep.subr.bf16.mxu0 %v6813_v5  ;;  %v6861_v5 = vld [vmem:[%s9443_s3 + $0x1a4] ss:$8 sps:$4 sm:$0xff]  }
 0x318   :  { %1609 = vmatpush1.bf16.msra.mxu1 %v6753_v27 }
 0x319   :  { %1610 = vmatprep.subr.bf16.mxu1 %v6758_v28  ;;  %1870 = vmatpush1.bf16.msra.mxu0 %v6811_v6 }
 0x31a   :  { %1871 = vmatprep.subr.bf16.mxu0 %v6816_v7  ;;  %v6859_v7 = vld [vmem:[%s9443_s3 + $0x1a0] ss:$8 sps:$4 sm:$0xff]  }
 0x31c   :  { %1611 = vmatpush1.bf16.msra.mxu1 %v6756_v30 }
 0x31d   :  { %1612 = vmatprep.subr.bf16.mxu1 %v6761_v31  ;;  %1872 = vmatpush1.bf16.msra.mxu0 %v6814_v8  ;;  %v5439_v31 = vld [vmem:[%s9447_s7] ss:$0 sm:$0xff]  ;;  %v6864_v8 = vld [vmem:[%s9443_s3 + $0x1b4] ss:$8 sps:$4 sm:$0xff]  }
 0x31e   :  { %1873 = vmatprep.subr.bf16.mxu0 %v6819_v10  ;;  %v6862_v10 = vld [vmem:[%s9443_s3 + $0x1b0] ss:$8 sps:$4 sm:$0xff]  }
 0x320   :  { %1613 = vmatpush1.bf16.msra.mxu1 %v6759_v32 }
 0x321   :  { %1614 = vmatprep.subr.bf16.mxu1 %v6764_v33  ;;  %1874 = vmatpush1.bf16.msra.mxu0 %v6817_v11  ;;  %v6867_v11 = vld [vmem:[%s9443_s3 + $0x1c4] ss:$8 sps:$4 sm:$0xff]  }
 0x322   :  { %1875 = vmatprep.subr.bf16.mxu0 %v6822_v56  ;;  %v6865_v56 = vld [vmem:[%s9443_s3 + $0x1c0] ss:$8 sps:$4 sm:$0xff]  }
 0x324   :  { %1615 = vmatpush1.bf16.msra.mxu1 %v6762_v34 }
 0x325   :  { %1616 = vmatprep.subr.bf16.mxu1 %v6767_v35  ;;  %1876 = vmatpush1.bf16.msra.mxu0 %v6820_v55  ;;  %v6870_v55 = vld [vmem:[%s9443_s3 + $0x1d4] ss:$8 sps:$4 sm:$0xff]  }
 0x326   :  { %1877 = vmatprep.subr.bf16.mxu0 %v6825_v13  ;;  %v6868_v13 = vld [vmem:[%s9443_s3 + $0x1d0] ss:$8 sps:$4 sm:$0xff]  }
 0x328   :  { %1617 = vmatpush1.bf16.msra.mxu1 %v6765_v36 }
 0x329   :  { %1618 = vmatprep.subr.bf16.mxu1 %v6770_v37  ;;  %1878 = vmatpush1.bf16.msra.mxu0 %v6823_v16  ;;  %v6829_v37 = vld [vmem:[%s9443_s3 + $0x100] ss:$8 sps:$4 sm:$0xff]   ;;  %v6873_v16 = vld [vmem:[%s9443_s3 + $0x1e4] ss:$8 sps:$4 sm:$0xff]  }
 0x32a   :  { %1879 = vmatprep.subr.bf16.mxu0 %v6828_v18  ;;  %v6871_v18 = vld [vmem:[%s9443_s3 + $0x1e0] ss:$8 sps:$4 sm:$0xff]  }
 0x32c   :  { %1619 = vmatpush1.bf16.msra.mxu1 %v6768_v38  ;;  %v6831_v38 = vld [vmem:[%s9443_s3 + $0x104] ss:$8 sps:$4 sm:$0xff]  }
 0x32d   :  { %1620 = vmatprep.subr.bf16.mxu1 %v6773_v39  ;;  %1880 = vmatpush1.bf16.msra.mxu0 %v6826_v19  ;;  %v6834_v39 = vld [vmem:[%s9443_s3 + $0x114] ss:$8 sps:$4 sm:$0xff]  }
 0x32e   :  { %v6876_v19 = vld [vmem:[%s9443_s3 + $0x1f4] ss:$8 sps:$4 sm:$0xff]  }
 0x330   :  { %1621 = vmatpush1.bf16.msra.mxu1 %v6771_v40  ;;  %v6832_v40 = vld [vmem:[%s9443_s3 + $0x110] ss:$8 sps:$4 sm:$0xff]  }
 0x331   :  { %1622 = vmatprep.subr.bf16.mxu1 %v6776_v41  ;;  %v6837_v41 = vld [vmem:[%s9443_s3 + $0x124] ss:$8 sps:$4 sm:$0xff]  }
 0x334   :  { %1623 = vmatpush1.bf16.msra.mxu1 %v6774_v42  ;;  %v6835_v42 = vld [vmem:[%s9443_s3 + $0x120] ss:$8 sps:$4 sm:$0xff]  }
 0x335   :  { %1624 = vmatprep.subr.bf16.mxu1 %v6779_v43  ;;  %v6840_v43 = vld [vmem:[%s9443_s3 + $0x134] ss:$8 sps:$4 sm:$0xff]  }
 0x338   :  { %1625 = vmatpush1.bf16.msra.mxu1 %v6777_v44  ;;  %v6838_v44 = vld [vmem:[%s9443_s3 + $0x130] ss:$8 sps:$4 sm:$0xff]  }
 0x339   :  { %2104 = vmatprep.subr.bf16.mxu1 %v6831_v38 }
 0x33b   :  { %1627 = vmatmul.mubr.bf16.vlgmr.msra.gmra.mrb[8].mxu1 %v5472_v45  ;;  %v6843_v45 = vld [vmem:[%s9443_s3 + $0x144] ss:$8 sps:$4 sm:$0xff]  }
 0x33c   :  { %2105 = vmatpush1.bf16.msra.mxu1 %v6829_v37 }
 0x33d   :  { %2106 = vmatprep.subr.bf16.mxu1 %v6834_v39 }
 0x340   :  { %2107 = vmatpush1.bf16.msra.mxu1 %v6832_v40 }
 0x341   :  { %2108 = vmatprep.subr.bf16.mxu1 %v6837_v41 }
 0x344   :  { %2109 = vmatpush1.bf16.msra.mxu1 %v6835_v42 }
 0x345   :  { %2110 = vmatprep.subr.bf16.mxu1 %v6840_v43 }
 0x348   :  { %2111 = vmatpush1.bf16.msra.mxu1 %v6838_v44 }
 0x349   :  { %2112 = vmatprep.subr.bf16.mxu1 %v6843_v45 }
 0x34c   :  { %2113 = vmatpush1.bf16.msra.mxu1 %v6841_v46 }
 0x34d   :  { %2114 = vmatprep.subr.bf16.mxu1 %v6846_v48 }
 0x350   :  { %2115 = vmatpush1.bf16.msra.mxu1 %v6844_v49 }
 0x351   :  { %2116 = vmatprep.subr.bf16.mxu1 %v6849_v47 }
 0x354   :  { %2117 = vmatpush1.bf16.msra.mxu1 %v6847_v50 }
 0x355   :  { %2118 = vmatprep.subr.bf16.mxu1 %v6852_v51  ;;  %v6889_v51 = vld [vmem:[%s9445_s5 + $0xf0] sm:$0xff]  }
 0x358   :  { %2119 = vmatpush1.bf16.msra.mxu1 %v6850_v52  ;;  %v6890_v52 = vld [vmem:[%s9445_s5 + $0xb0] sm:$0xff]  }
 0x359   :  { %2120 = vmatprep.subr.bf16.mxu1 %v6855_v54  ;;  %v6892_v54 = vld [vmem:[%s9445_s5 + $0xb8] sm:$0xff]  }
 0x35c   :  { %2121 = vmatpush1.bf16.msra.mxu1 %v6853_v61 }
 0x35d   :  { %2122 = vmatprep.subr.bf16.mxu1 %v6858_v63 }
 0x360   :  { %2123 = vmatpush1.bf16.msra.mxu1 %v6856_v3  ;;  %v5603_v3 = vld [vmem:[%s9444_s4 + $0x1] ss:$8 sm:$0x3] }
 0x361   :  { %2124 = vmatprep.subr.bf16.mxu1 %v6861_v5  ;;  %v1937_v5 = vrot.slane %v5603_v3, %v7840_v14 }
 0x364   :  { %2125 = vmatpush1.bf16.msra.mxu1 %v6859_v7  ;;  %v1941_v7 = vrot.slane %v5603_v3, %v7846_v17  ;;  %v6944_v3 = vld [vmem:[%s9441_s1 + $0x204] ss:$8 sps:$4 sm:$0xff]  }
 0x365   :  { %2126 = vmatprep.subr.bf16.mxu1 %v6864_v8 }
 0x368   :  { %2127 = vmatpush1.bf16.msra.mxu1 %v6862_v10 }
 0x369   :  { %2128 = vmatprep.subr.bf16.mxu1 %v6867_v11 }
 0x36c   :  { %2129 = vmatpush1.bf16.msra.mxu1 %v6865_v56 }
 0x36d   :  { %2130 = vmatprep.subr.bf16.mxu1 %v6870_v55 }
 0x370   :  { %2131 = vmatpush1.bf16.msra.mxu1 %v6868_v13 }
 0x371   :  { %2132 = vmatprep.subr.bf16.mxu1 %v6873_v16 }
 0x374   :  { %2133 = vmatpush1.bf16.msra.mxu1 %v6871_v18 }
 0x375   :  { %2134 = vmatprep.subr.bf16.mxu1 %v6876_v19 }
 0x3ce   :  { %v6472_v20 = vpop.f32.mrb[4].mxu1 }
 0x3cf   :  { %v6473_v22 = vpop.f32.mrb[5].mxu1 }
 0x3d0   :  { %v6474_v23 = vadd.f32 %v6473_v22, %v6472_v20  ;;  %v6475_v24 = vpop.f32.mrb[6].mxu1  ;;  %v6874_v20 = vld [vmem:[%s9443_s3 + $0x1f0] ss:$8 sps:$4 sm:$0xff]   ;;  %v6878_v22 = vld [vmem:[%s9445_s5 + $0x80] sm:$0xff]  }
 0x3d1   :  { %v6476_v25 = vpop.f32.mrb[7].mxu1  ;;  %2135 = vmatpush1.bf16.msra.mxu1 %v6874_v20 }
 0x3d2   :  { %v1354_v26 = vadd.f32 %v6474_v23, %v5422_v21  ;;  %v6477_v27 = vadd.f32 %v6476_v25, %v6475_v24  ;;  %v6879_v23 = vld [vmem:[%s9445_s5 + $0xc8] sm:$0xff]   ;;  %v6881_v25 = vld [vmem:[%s9445_s5 + $0xd0] sm:$0xff]   ;;  %2821 = vmatprep.subr.bf16.mxu1 %v6944_v3 }
 0x3d3   :  { %v6880_v24 = vld [vmem:[%s9445_s5 + $0x88] sm:$0xff]   ;;  %v7007_v3 = vld [vmem:[%s9443_s3 + $0x254] ss:$8 sps:$4 sm:$0xff]  }
 0x3d4   :  { %v1357_v28 = vadd.f32 %v6477_v27, %v5422_v21  ;;  %v1360_v30 = vmul.f32 0.01, %v1354_v26  ;;  %v6877_v21 = vld [vmem:[%s9445_s5 + $0xc0] sm:$0xff]   ;;  %v6883_v27 = vld [vmem:[%s9445_s5 + $0xd8] sm:$0xff]  }
 0x3d5   :  { %6478 = vmatprep.subr.bf16.mxu0 %v6877_v21 }
 0x3d6   :  { %v1361_v32 = vmul.f32 0.01, %v1357_v28  ;;  %v1362_v33 = vmax.f32 %v1354_v26, %v1360_v30  ;;  %v6882_v26 = vld [vmem:[%s9445_s5 + $0x90] sm:$0xff]   ;;  %v6885_v30 = vld [vmem:[%s9445_s5 + $0xe0] sm:$0xff]  }
 0x3d8   :  { %v1369_v34 = vmul.f32 %v5439_v31, %v1362_v33  ;;  %v1363_v35 = vmax.f32 %v1357_v28, %v1361_v32  ;;  %v6884_v28 = vld [vmem:[%s9445_s5 + $0x98] sm:$0xff]   ;;  %v6887_v32 = vld [vmem:[%s9445_s5 + $0xe8] sm:$0xff]  }
 0x3d9   :  { %v6888_v33 = vld [vmem:[%s9445_s5 + $0xa8] sm:$0xff]  }
 0x3da   :  { %1371 = vadd.xlane.f32.xlu0 %v1369_v34  ;;  %v1370_v36 = vmul.f32 %v5439_v31, %v1363_v35  ;;  %v6886_v31 = vld [vmem:[%s9445_s5 + $0xa0] sm:$0xff]  }
 0x3db   :  { %v5538_v34 = vld [vmem:[%s9442_s2 + $0x1] ss:$8 sm:$0x3] }
 0x3dc   :  { %v1682_v35 = vrot.slane %v5538_v34, %v7840_v14  ;;  %v1686_v37 = vrot.slane %v5538_v34, %v7846_v17  ;;  %v6899_v34 = vld [vmem:[%s9440_s0 + $0x220] ss:$8 sps:$4 sm:$0xff]  }
 0x3de   :  { %1373 = vadd.xlane.f32.xlu0 %v1370_v36 }
 0x40e   :  { %v1628_v53 = vpop.f32.mrb[8].mxu1 }
 0x40f   :  { %v1630_v57 = vpop.f32.mrb[9].mxu1 }
 0x410   :  { %v1632_v58 = vpop.f32.mrb[10].mxu1 }
 0x411   :  { %v1637_v59 = vpack.c.bf16 %v1632_v58, %v1628_v53  ;;  %v1634_v60 = vpop.f32.mrb[11].mxu1  ;;  %v6891_v53 = vld [vmem:[%s9445_s5 + $0xf8] sm:$0xff]  }
 0x412   :  { %v1638_v62 = vpack.c.bf16 %v1634_v60, %v1630_v57  ;;  %v6895_v57 = vld [vmem:[%s9440_s0 + $0x204] ss:$8 sps:$4 sm:$0xff]   ;;  %v5318_v58 = vld [vmem:[%s9451_s11 + $0x38] sm:$0xff]  }
 0x413   :  { %v1639_v0 = vmul.bf16 1009007652, %v1637_v59  ;;  %v322_v60 = vunpack.c.h.bf16 %v5318_v58 }
 0x414   :  { %v1640_v2 = vmul.bf16 1009007652, %v1638_v62 }
 0x415   :  { %v8156_v6 = vmax.bf16 %v1639_v0, %v1637_v59  ;;  %v300_v59 = vunpack.c.l.bf16 %v5318_v58  ;;  %v6932_v58 = vld [vmem:[%s9440_s0 + $0x2d0] ss:$8 sps:$4 sm:$0xff]  }
 0x416   :  { %v8151_v4 = vmax.bf16 %v1640_v2, %v1638_v62  ;;  %v328_v62 = vsel %vm217_vm0, %v322_v60, %v7480_v1  ;;  %v8263_v2 = vld [vmem:[%s9451_s11 + $0x10] sm:$0xff]   ;;  %v6935_v60 = vld [vmem:[%s9440_s0 + $0x2e0] ss:$8 sps:$4 sm:$0xff]  }
 0x417   :  { %v306_v61 = vsel %vm217_vm0, %v300_v59, %v7480_v1  ;;  %v330_v0 = vpack.c.bf16 %v7406_v29, %v328_v62  ;;  %v2147_v11 = vunpack.c.l.bf16 %v8156_v6  ;;  %v2149_v20 = vunpack.c.h.bf16 %v8156_v6  ;;  %v6937_v59 = vld [vmem:[%s9440_s0 + $0x2e4] ss:$8 sps:$4 sm:$0xff]   ;;  %v6938_v62 = vld [vmem:[%s9440_s0 + $0x2f0] ss:$8 sps:$4 sm:$0xff]  }
 0x418   :  { %1881 = vmatprep.mubr.bf16.mxu0 %v8151_v4  ;;  %v308_v63 = vpack.c.bf16 %v7406_v29, %v306_v61  ;;  %v2148_v13 = vunpack.c.l.bf16 %v8151_v4  ;;  %v6940_v61 = vld [vmem:[%s9440_s0 + $0x2f4] ss:$8 sps:$4 sm:$0xff]  }
 0x419   :  { %1882 = vmatmul.mubr.bf16.vlgmr.msra.gmra.mrb[8].mxu0 %v8156_v6  ;;  %332 = vst [vmem:[#allocation12 + $0x3c] sm:$0xf] %v330_v0  ;;  %v6898_v6 = vld [vmem:[%s9440_s0 + $0x214] ss:$8 sps:$4 sm:$0xff]   ;;  %v6942_v0 = vld [vmem:[%s9441_s1 + $0x200] ss:$8 sps:$4 sm:$0xff]  }
 0x41a   :  { %6479 = vmatpush3.bf16.msra.mxu0 %v6878_v22  ;;  %310 = vst [vmem:[#allocation12 + $0x38] sm:$0xf] %v308_v63 }
 0x41b   :  { %6480 = vmatprep.subr.bf16.mxu0 %v6879_v23 }
 0x41e   :  { %6481 = vmatpush3.bf16.msra.mxu0 %v6880_v24  ;;  %v2150_v24 = vunpack.c.h.bf16 %v8151_v4  ;;  %v6896_v4 = vld [vmem:[%s9440_s0 + $0x210] ss:$8 sps:$4 sm:$0xff]  }
 0x41f   :  { %6482 = vmatprep.subr.bf16.mxu0 %v6881_v25 }
 0x422   :  { %6483 = vmatpush3.bf16.msra.mxu0 %v6882_v26  ;;  %v8274_v26 = vld [vmem:[#allocation12 + $0x38] sm:$0xff] }
 0x423   :  { %6484 = vmatprep.subr.bf16.mxu0 %v6883_v27  ;;  %v5720_v63 = vcombine.low %v8263_v2, %v8274_v26 }
 0x426   :  { %6485 = vmatpush3.bf16.msra.mxu0 %v6884_v28 }
 0x427   :  { %6486 = vmatprep.subr.bf16.mxu0 %v6885_v30 }
 0x42a   :  { %6487 = vmatpush3.bf16.msra.mxu0 %v6886_v31  ;;  %v6893_v31 = vld [vmem:[%s9440_s0 + $0x200] ss:$8 sps:$4 sm:$0xff]  }
 0x42b   :  { %6488 = vmatprep.subr.bf16.mxu0 %v6887_v32  ;;  %v5721_v32 = vcombine.high %v8263_v2, %v8274_v26  ;;  %v6947_v2 = vld [vmem:[%s9441_s1 + $0x214] ss:$8 sps:$4 sm:$0xff]   ;;  %v6974_v26 = vld [vmem:[%s9441_s1 + $0x2a4] ss:$8 sps:$4 sm:$0xff]  }
 0x42e   :  { %6489 = vmatpush3.bf16.msra.mxu0 %v6888_v33  ;;  %v6901_v33 = vld [vmem:[%s9440_s0 + $0x224] ss:$8 sps:$4 sm:$0xff]  }
 0x42f   :  { %6490 = vmatprep.subr.bf16.mxu0 %v6889_v51  ;;  %v6928_v51 = vld [vmem:[%s9440_s0 + $0x2b4] ss:$8 sps:$4 sm:$0xff]  }
 0x432   :  { %6491 = vmatpush3.bf16.msra.mxu0 %v6890_v52  ;;  %v6926_v52 = vld [vmem:[%s9440_s0 + $0x2b0] ss:$8 sps:$4 sm:$0xff]  }
 0x433   :  { %6492 = vmatprep.subr.bf16.mxu0 %v6891_v53  ;;  %v6931_v53 = vld [vmem:[%s9440_s0 + $0x2c4] ss:$8 sps:$4 sm:$0xff]  }
 0x436   :  { %6493 = vmatpush3.bf16.msra.mxu0 %v6892_v54  ;;  %v6929_v54 = vld [vmem:[%s9440_s0 + $0x2c0] ss:$8 sps:$4 sm:$0xff]  }
 0x437   :  { %2566 = vmatprep.subr.bf16.mxu0 %v6895_v57  ;;  %v6934_v57 = vld [vmem:[%s9440_s0 + $0x2d4] ss:$8 sps:$4 sm:$0xff]  }
 0x4ec   :  { %v1883_v36 = vpop.f32.mrb[8].mxu0 }
 0x4ed   :  { %v1885_v38 = vpop.f32.mrb[9].mxu0  ;;  %v1884_v40 = vadd.f32 %v1883_v36, %v1682_v35  ;;  %v6902_v36 = vld [vmem:[%s9440_s0 + $0x230] ss:$8 sps:$4 sm:$0xff]  }
 0x4ee   :  { %v1887_v39 = vpop.f32.mrb[10].mxu0  ;;  %v1886_v43 = vadd.f32 %v1885_v38, %v1686_v37  ;;  %v6905_v38 = vld [vmem:[%s9440_s0 + $0x240] ss:$8 sps:$4 sm:$0xff]  }
 0x4ef   :  { %v1888_v41 = vadd.f32 %v1887_v39, %v1682_v35  ;;  %v1889_v42 = vpop.f32.mrb[11].mxu0  ;;  %v6904_v35 = vld [vmem:[%s9440_s0 + $0x234] ss:$8 sps:$4 sm:$0xff]  }
 0x4f0   :  { %v1890_v44 = vadd.f32 %v1889_v42, %v1686_v37  ;;  %v6907_v37 = vld [vmem:[%s9440_s0 + $0x244] ss:$8 sps:$4 sm:$0xff]   ;;  %v6910_v39 = vld [vmem:[%s9440_s0 + $0x254] ss:$8 sps:$4 sm:$0xff]   ;;  %v6911_v42 = vld [vmem:[%s9440_s0 + $0x260] ss:$8 sps:$4 sm:$0xff]  }
 0x4f1   :  { %v1892_v45 = vpack.c.bf16 %v1888_v41, %v1884_v40  ;;  %v6908_v40 = vld [vmem:[%s9440_s0 + $0x250] ss:$8 sps:$4 sm:$0xff]   ;;  %v6913_v41 = vld [vmem:[%s9440_s0 + $0x264] ss:$8 sps:$4 sm:$0xff]  }
 0x4f2   :  { %v1893_v46 = vpack.c.bf16 %v1890_v44, %v1886_v43  ;;  %v6916_v43 = vld [vmem:[%s9440_s0 + $0x274] ss:$8 sps:$4 sm:$0xff]   ;;  %v6914_v44 = vld [vmem:[%s9440_s0 + $0x270] ss:$8 sps:$4 sm:$0xff]  }
 0x4f3   :  { %v1894_v48 = vmul.bf16 1009007652, %v1892_v45 }
 0x4f4   :  { %v1895_v49 = vmul.bf16 1009007652, %v1893_v46 }
 0x4f5   :  { %v1896_v50 = vmax.bf16 %v1894_v48, %v1892_v45  ;;  %v6919_v45 = vld [vmem:[%s9440_s0 + $0x284] ss:$8 sps:$4 sm:$0xff]   ;;  %v6922_v48 = vld [vmem:[%s9440_s0 + $0x294] ss:$8 sps:$4 sm:$0xff]  }
 0x4f6   :  { %v1897_v47 = vmax.bf16 %v1895_v49, %v1893_v46  ;;  %v6917_v46 = vld [vmem:[%s9440_s0 + $0x280] ss:$8 sps:$4 sm:$0xff]   ;;  %v6920_v49 = vld [vmem:[%s9440_s0 + $0x290] ss:$8 sps:$4 sm:$0xff]  }
 0x4f8   :  { %2136 = vmatprep.mubr.bf16.mxu1 %v1897_v47  ;;  %v6925_v47 = vld [vmem:[%s9440_s0 + $0x2a4] ss:$8 sps:$4 sm:$0xff]  }
 0x4f9   :  { %2137 = vmatmul.mubr.bf16.vlgmr.msra.gmra.mrb[12].mxu1 %v1896_v50  ;;  %v6923_v50 = vld [vmem:[%s9440_s0 + $0x2a0] ss:$8 sps:$4 sm:$0xff]  }
 0x4fa   :  { %2822 = vmatpush1.bf16.msra.mxu1 %v6942_v0  ;;  %v7002_v0 = vld [vmem:[%s9443_s3 + $0x240] ss:$8 sps:$4 sm:$0xff]  }
 0x4fb   :  { %2823 = vmatprep.subr.bf16.mxu1 %v6947_v2  ;;  %v7010_v2 = vld [vmem:[%s9443_s3 + $0x264] ss:$8 sps:$4 sm:$0xff]  }
 0x5cc   :  { %v2138_v8 = vpop.f32.mrb[12].mxu1 }
 0x5cd   :  { %v2139_v10 = vadd.f32 %v2138_v8, %v1937_v5  ;;  %v2140_v56 = vpop.f32.mrb[13].mxu1  ;;  %v6950_v8 = vld [vmem:[%s9441_s1 + $0x224] ss:$8 sps:$4 sm:$0xff]  }
 0x5ce   :  { %v2141_v55 = vadd.f32 %v2140_v56, %v1941_v7  ;;  %v2142_v16 = vpop.f32.mrb[14].mxu1  ;;  %v6956_v56 = vld [vmem:[%s9441_s1 + $0x244] ss:$8 sps:$4 sm:$0xff]  }
 0x5cf   :  { %v2151_v18 = vadd.f32 %v2147_v11, %v2139_v10  ;;  %v2143_v19 = vadd.f32 %v2142_v16, %v1937_v5  ;;  %v2144_v21 = vpop.f32.mrb[15].mxu1  ;;  %v6945_v5 = vld [vmem:[%s9441_s1 + $0x210] ss:$8 sps:$4 sm:$0xff]   ;;  %v6953_v10 = vld [vmem:[%s9441_s1 + $0x234] ss:$8 sps:$4 sm:$0xff]  }
 0x5d0   :  { %v2152_v22 = vadd.f32 %v2148_v13, %v2141_v55  ;;  %v2145_v23 = vadd.f32 %v2144_v21, %v1941_v7  ;;  %2824 = vmatpush1.bf16.msra.mxu1 %v6945_v5  ;;  %v6948_v7 = vld [vmem:[%s9441_s1 + $0x220] ss:$8 sps:$4 sm:$0xff]   ;;  %v6951_v11 = vld [vmem:[%s9441_s1 + $0x230] ss:$8 sps:$4 sm:$0xff]   ;;  %v6959_v13 = vld [vmem:[%s9441_s1 + $0x254] ss:$8 sps:$4 sm:$0xff]  }
 0x5d1   :  { %v2153_v25 = vadd.f32 %v2149_v20, %v2143_v19  ;;  %2825 = vmatprep.subr.bf16.mxu1 %v6950_v8  ;;  %v6954_v55 = vld [vmem:[%s9441_s1 + $0x240] ss:$8 sps:$4 sm:$0xff]   ;;  %v6957_v16 = vld [vmem:[%s9441_s1 + $0x250] ss:$8 sps:$4 sm:$0xff]   ;;  %v6965_v20 = vld [vmem:[%s9441_s1 + $0x274] ss:$8 sps:$4 sm:$0xff]  }
 0x5d2   :  { %v2154_v27 = vadd.f32 %v2150_v24, %v2145_v23  ;;  %v6960_v19 = vld [vmem:[%s9441_s1 + $0x260] ss:$8 sps:$4 sm:$0xff]   ;;  %v6963_v21 = vld [vmem:[%s9441_s1 + $0x270] ss:$8 sps:$4 sm:$0xff]   ;;  %v6971_v24 = vld [vmem:[%s9441_s1 + $0x294] ss:$8 sps:$4 sm:$0xff]  }
 0x5d3   :  { %v2155_v28 = vpack.c.bf16 %v2153_v25, %v2151_v18  ;;  %v6962_v18 = vld [vmem:[%s9441_s1 + $0x264] ss:$8 sps:$4 sm:$0xff]   ;;  %v6966_v23 = vld [vmem:[%s9441_s1 + $0x280] ss:$8 sps:$4 sm:$0xff]   ;;  %v6969_v25 = vld [vmem:[%s9441_s1 + $0x290] ss:$8 sps:$4 sm:$0xff]  }
 0x5d4   :  { %v2156_v30 = vpack.c.bf16 %v2154_v27, %v2152_v22  ;;  %2826 = vmatpush1.bf16.msra.mxu1 %v6948_v7  ;;  %v6968_v22 = vld [vmem:[%s9441_s1 + $0x284] ss:$8 sps:$4 sm:$0xff]   ;;  %v6972_v27 = vld [vmem:[%s9441_s1 + $0x2a0] ss:$8 sps:$4 sm:$0xff]   ;;  %v7005_v5 = vld [vmem:[%s9443_s3 + $0x250] ss:$8 sps:$4 sm:$0xff]  }
 0x5d5   :  { %2827 = vmatprep.subr.bf16.mxu1 %v6953_v10  ;;  %v7008_v7 = vld [vmem:[%s9443_s3 + $0x260] ss:$8 sps:$4 sm:$0xff]   ;;  %v7013_v8 = vld [vmem:[%s9443_s3 + $0x274] ss:$8 sps:$4 sm:$0xff]  }
 0x5d6   :  { %2323 = vmatprep.mubr.bf16.mxu0 %v2156_v30  ;;  %v6975_v30 = vld [vmem:[%s9441_s1 + $0x2b0] ss:$8 sps:$4 sm:$0xff]  }
 0x5d7   :  { %2324 = vmatmul.mubr.bf16.vlgmr.msra.gmra.mrb[12].mxu0 %v2155_v28  ;;  %v6977_v28 = vld [vmem:[%s9441_s1 + $0x2b4] ss:$8 sps:$4 sm:$0xff]  }
 0x5d8   :  { %2567 = vmatpush1.bf16.msra.mxu0 %v6893_v31  ;;  %2598 = vmatprep.mubr.bf16.mxu0 %v5721_v32  ;;  %v6980_v31 = vld [vmem:[%s9441_s1 + $0x2c4] ss:$8 sps:$4 sm:$0xff]   ;;  %v6978_v32 = vld [vmem:[%s9441_s1 + $0x2c0] ss:$8 sps:$4 sm:$0xff]  }
 0x5d9   :  { %2568 = vmatprep.subr.bf16.mxu0 %v6898_v6  ;;  %2828 = vmatpush1.bf16.msra.mxu1 %v6951_v11  ;;  %v6983_v6 = vld [vmem:[%s9441_s1 + $0x2d4] ss:$8 sps:$4 sm:$0xff]  }
 0x5da   :  { %2829 = vmatprep.subr.bf16.mxu1 %v6956_v56  ;;  %v7011_v56 = vld [vmem:[%s9443_s3 + $0x270] ss:$8 sps:$4 sm:$0xff]  }
 0x5dc   :  { %2569 = vmatpush1.bf16.msra.mxu0 %v6896_v4  ;;  %v6981_v4 = vld [vmem:[%s9441_s1 + $0x2d0] ss:$8 sps:$4 sm:$0xff]  }
 0x5dd   :  { %2570 = vmatprep.subr.bf16.mxu0 %v6901_v33  ;;  %2830 = vmatpush1.bf16.msra.mxu1 %v6954_v55  ;;  %v6986_v33 = vld [vmem:[%s9441_s1 + $0x2e4] ss:$8 sps:$4 sm:$0xff]  }
 0x5de   :  { %2831 = vmatprep.subr.bf16.mxu1 %v6959_v13  ;;  %v7016_v13 = vld [vmem:[%s9443_s3 + $0x284] ss:$8 sps:$4 sm:$0xff]  }
 0x5e0   :  { %2571 = vmatpush1.bf16.msra.mxu0 %v6899_v34  ;;  %v6984_v34 = vld [vmem:[%s9441_s1 + $0x2e0] ss:$8 sps:$4 sm:$0xff]  }
 0x5e1   :  { %2572 = vmatprep.subr.bf16.mxu0 %v6904_v35  ;;  %2832 = vmatpush1.bf16.msra.mxu1 %v6957_v16  ;;  %v6989_v35 = vld [vmem:[%s9441_s1 + $0x2f4] ss:$8 sps:$4 sm:$0xff]  }
 0x5e2   :  { %2833 = vmatprep.subr.bf16.mxu1 %v6962_v18 }
 0x5e4   :  { %2573 = vmatpush1.bf16.msra.mxu0 %v6902_v36  ;;  %v6987_v36 = vld [vmem:[%s9441_s1 + $0x2f0] ss:$8 sps:$4 sm:$0xff]  }
 0x5e5   :  { %2574 = vmatprep.subr.bf16.mxu0 %v6907_v37  ;;  %2834 = vmatpush1.bf16.msra.mxu1 %v6960_v19 }
 0x5e6   :  { %2835 = vmatprep.subr.bf16.mxu1 %v6965_v20 }
 0x5e8   :  { %2575 = vmatpush1.bf16.msra.mxu0 %v6905_v38  ;;  %v5668_v38 = vld [vmem:[%s9446_s6 + $0x1] ss:$0 sm:$0xff] }
 0x5e9   :  { %2576 = vmatprep.subr.bf16.mxu0 %v6910_v39  ;;  %2836 = vmatpush1.bf16.msra.mxu1 %v6963_v21  ;;  %v7014_v21 = vld [vmem:[%s9443_s3 + $0x280] ss:$8 sps:$4 sm:$0xff]  }
 0x5ea   :  { %2837 = vmatprep.subr.bf16.mxu1 %v6968_v22 }
 0x5ec   :  { %2577 = vmatpush1.bf16.msra.mxu0 %v6908_v40 }
 0x5ed   :  { %2578 = vmatprep.subr.bf16.mxu0 %v6913_v41  ;;  %2838 = vmatpush1.bf16.msra.mxu1 %v6966_v23  ;;  %v7019_v23 = vld [vmem:[%s9443_s3 + $0x294] ss:$8 sps:$4 sm:$0xff]  }
 0x5ee   :  { %2839 = vmatprep.subr.bf16.mxu1 %v6971_v24 }
 0x5f0   :  { %2579 = vmatpush1.bf16.msra.mxu0 %v6911_v42 }
 0x5f1   :  { %2580 = vmatprep.subr.bf16.mxu0 %v6916_v43  ;;  %2840 = vmatpush1.bf16.msra.mxu1 %v6969_v25 }
 0x5f2   :  { %2841 = vmatprep.subr.bf16.mxu1 %v6974_v26  ;;  %v7017_v26 = vld [vmem:[%s9443_s3 + $0x290] ss:$8 sps:$4 sm:$0xff]  }
 0x5f4   :  { %2581 = vmatpush1.bf16.msra.mxu0 %v6914_v44 }
 0x5f5   :  { %2582 = vmatprep.subr.bf16.mxu0 %v6919_v45  ;;  %2842 = vmatpush1.bf16.msra.mxu1 %v6972_v27  ;;  %v7022_v27 = vld [vmem:[%s9443_s3 + $0x2a4] ss:$8 sps:$4 sm:$0xff]  }
 0x5f6   :  { %2843 = vmatprep.subr.bf16.mxu1 %v6977_v28  ;;  %v7020_v28 = vld [vmem:[%s9443_s3 + $0x2a0] ss:$8 sps:$4 sm:$0xff]  }
 0x5f8   :  { %2583 = vmatpush1.bf16.msra.mxu0 %v6917_v46 }
 0x5f9   :  { %2584 = vmatprep.subr.bf16.mxu0 %v6922_v48  ;;  %2844 = vmatpush1.bf16.msra.mxu1 %v6975_v30  ;;  %v5685_v48 = vld [vmem:[%s9447_s7 + $0x1] ss:$0 sm:$0xff]  ;;  %v7025_v30 = vld [vmem:[%s9443_s3 + $0x2b4] ss:$8 sps:$4 sm:$0xff]  }
 0x5fa   :  { %2845 = vmatprep.subr.bf16.mxu1 %v6980_v31  ;;  %v7023_v31 = vld [vmem:[%s9443_s3 + $0x2b0] ss:$8 sps:$4 sm:$0xff]  }
 0x5fc   :  { %2585 = vmatpush1.bf16.msra.mxu0 %v6920_v49 }
 0x5fd   :  { %2586 = vmatprep.subr.bf16.mxu0 %v6925_v47  ;;  %2846 = vmatpush1.bf16.msra.mxu1 %v6978_v32  ;;  %v7028_v32 = vld [vmem:[%s9443_s3 + $0x2c4] ss:$8 sps:$4 sm:$0xff]  }
 0x5fe   :  { %2847 = vmatprep.subr.bf16.mxu1 %v6983_v6  ;;  %v7026_v6 = vld [vmem:[%s9443_s3 + $0x2c0] ss:$8 sps:$4 sm:$0xff]  }
 0x600   :  { %2587 = vmatpush1.bf16.msra.mxu0 %v6923_v50 }
 0x601   :  { %2588 = vmatprep.subr.bf16.mxu0 %v6928_v51  ;;  %2848 = vmatpush1.bf16.msra.mxu1 %v6981_v4  ;;  %v7031_v4 = vld [vmem:[%s9443_s3 + $0x2d4] ss:$8 sps:$4 sm:$0xff]  }
 0x602   :  { %2849 = vmatprep.subr.bf16.mxu1 %v6986_v33  ;;  %v7029_v33 = vld [vmem:[%s9443_s3 + $0x2d0] ss:$8 sps:$4 sm:$0xff]  }
 0x604   :  { %2589 = vmatpush1.bf16.msra.mxu0 %v6926_v52 }
 0x605   :  { %2590 = vmatprep.subr.bf16.mxu0 %v6931_v53  ;;  %2850 = vmatpush1.bf16.msra.mxu1 %v6984_v34  ;;  %v6990_v53 = vld [vmem:[%s9443_s3 + $0x200] ss:$8 sps:$4 sm:$0xff]   ;;  %v7034_v34 = vld [vmem:[%s9443_s3 + $0x2e4] ss:$8 sps:$4 sm:$0xff]  }
 0x606   :  { %2851 = vmatprep.subr.bf16.mxu1 %v6989_v35  ;;  %v7032_v35 = vld [vmem:[%s9443_s3 + $0x2e0] ss:$8 sps:$4 sm:$0xff]  }
 0x608   :  { %2591 = vmatpush1.bf16.msra.mxu0 %v6929_v54  ;;  %v6992_v54 = vld [vmem:[%s9443_s3 + $0x204] ss:$8 sps:$4 sm:$0xff]  }
 0x609   :  { %2592 = vmatprep.subr.bf16.mxu0 %v6934_v57  ;;  %2852 = vmatpush1.bf16.msra.mxu1 %v6987_v36  ;;  %v6995_v57 = vld [vmem:[%s9443_s3 + $0x214] ss:$8 sps:$4 sm:$0xff]  }
 0x60a   :  { %v7037_v36 = vld [vmem:[%s9443_s3 + $0x2f4] ss:$8 sps:$4 sm:$0xff]  }
 0x60c   :  { %2593 = vmatpush1.bf16.msra.mxu0 %v6932_v58  ;;  %v6993_v58 = vld [vmem:[%s9443_s3 + $0x210] ss:$8 sps:$4 sm:$0xff]  }
 0x60d   :  { %2594 = vmatprep.subr.bf16.mxu0 %v6937_v59  ;;  %v6998_v59 = vld [vmem:[%s9443_s3 + $0x224] ss:$8 sps:$4 sm:$0xff]  }
 0x610   :  { %2595 = vmatpush1.bf16.msra.mxu0 %v6935_v60  ;;  %v6996_v60 = vld [vmem:[%s9443_s3 + $0x220] ss:$8 sps:$4 sm:$0xff]  }
 0x611   :  { %2596 = vmatprep.subr.bf16.mxu0 %v6940_v61  ;;  %v7001_v61 = vld [vmem:[%s9443_s3 + $0x234] ss:$8 sps:$4 sm:$0xff]  }
 0x614   :  { %2597 = vmatpush1.bf16.msra.mxu0 %v6938_v62  ;;  %v6999_v62 = vld [vmem:[%s9443_s3 + $0x230] ss:$8 sps:$4 sm:$0xff]  }
 0x615   :  { %3076 = vmatprep.subr.bf16.mxu0 %v6992_v54 }
 0x617   :  { %2599 = vmatmul.mubr.bf16.vlgmr.msra.gmra.mrb[16].mxu0 %v5720_v63  ;;  %v7004_v63 = vld [vmem:[%s9443_s3 + $0x244] ss:$8 sps:$4 sm:$0xff]  }
 0x618   :  { %3077 = vmatpush1.bf16.msra.mxu0 %v6990_v53 }
 0x619   :  { %3078 = vmatprep.subr.bf16.mxu0 %v6995_v57 }
 0x61c   :  { %3079 = vmatpush1.bf16.msra.mxu0 %v6993_v58 }
 0x61d   :  { %3080 = vmatprep.subr.bf16.mxu0 %v6998_v59 }
 0x620   :  { %3081 = vmatpush1.bf16.msra.mxu0 %v6996_v60 }
 0x621   :  { %3082 = vmatprep.subr.bf16.mxu0 %v7001_v61 }
 0x624   :  { %3083 = vmatpush1.bf16.msra.mxu0 %v6999_v62 }
 0x625   :  { %3084 = vmatprep.subr.bf16.mxu0 %v7004_v63 }
 0x628   :  { %3085 = vmatpush1.bf16.msra.mxu0 %v7002_v0 }
 0x629   :  { %3086 = vmatprep.subr.bf16.mxu0 %v7007_v3 }
 0x62c   :  { %3087 = vmatpush1.bf16.msra.mxu0 %v7005_v5 }
 0x62d   :  { %3088 = vmatprep.subr.bf16.mxu0 %v7010_v2 }
 0x630   :  { %3089 = vmatpush1.bf16.msra.mxu0 %v7008_v7 }
 0x631   :  { %3090 = vmatprep.subr.bf16.mxu0 %v7013_v8  ;;  %v7050_v8 = vld [vmem:[%s9445_s5 + $0x170] sm:$0xff]  }
 0x634   :  { %3091 = vmatpush1.bf16.msra.mxu0 %v7011_v56  ;;  %v7053_v56 = vld [vmem:[%s9445_s5 + $0x138] sm:$0xff]  }
 0x635   :  { %3092 = vmatprep.subr.bf16.mxu0 %v7016_v13  ;;  %v5320_v13 = vld [vmem:[%s9451_s11 + $0x40] sm:$0xff]  }
 0x638   :  { %3093 = vmatpush1.bf16.msra.mxu0 %v7014_v21 }
 0x639   :  { %3094 = vmatprep.subr.bf16.mxu0 %v7019_v23  ;;  %v8647_v23 = vld [vmem:[%s9451_s11 + $0x18] sm:$0xff]  }
 0x63c   :  { %3095 = vmatpush1.bf16.msra.mxu0 %v7017_v26  ;;  %v5851_v26 = vld [vmem:[%s9444_s4 + $0x2] ss:$8 sm:$0x3] }
 0x63d   :  { %3096 = vmatprep.subr.bf16.mxu0 %v7022_v27  ;;  %v2909_v27 = vrot.slane %v5851_v26, %v7840_v14 }
 0x640   :  { %3097 = vmatpush1.bf16.msra.mxu0 %v7020_v28  ;;  %v2913_v28 = vrot.slane %v5851_v26, %v7846_v17  ;;  %v7105_v26 = vld [vmem:[%s9441_s1 + $0x304] ss:$8 sps:$4 sm:$0xff]  }
 0x641   :  { %3098 = vmatprep.subr.bf16.mxu0 %v7025_v30 }
 0x644   :  { %3099 = vmatpush1.bf16.msra.mxu0 %v7023_v31 }
 0x645   :  { %3100 = vmatprep.subr.bf16.mxu0 %v7028_v32 }
 0x648   :  { %3101 = vmatpush1.bf16.msra.mxu0 %v7026_v6 }
 0x649   :  { %3102 = vmatprep.subr.bf16.mxu0 %v7031_v4 }
 0x64c   :  { %3103 = vmatpush1.bf16.msra.mxu0 %v7029_v33 }
 0x64d   :  { %3104 = vmatprep.subr.bf16.mxu0 %v7034_v34 }
 0x650   :  { %3105 = vmatpush1.bf16.msra.mxu0 %v7032_v35 }
 0x651   :  { %3106 = vmatprep.subr.bf16.mxu0 %v7037_v36 }
 0x6aa   :  { %v6494_v37 = vpop.f32.mrb[12].mxu0 }
 0x6ab   :  { %v6495_v39 = vpop.f32.mrb[13].mxu0 }
 0x6ac   :  { %v6496_v40 = vadd.f32 %v6495_v39, %v6494_v37  ;;  %v6497_v41 = vpop.f32.mrb[14].mxu0  ;;  %v7035_v37 = vld [vmem:[%s9443_s3 + $0x2f0] ss:$8 sps:$4 sm:$0xff]   ;;  %v7039_v39 = vld [vmem:[%s9445_s5 + $0x100] sm:$0xff]  }
 0x6ad   :  { %v6498_v42 = vpop.f32.mrb[15].mxu0  ;;  %3107 = vmatpush1.bf16.msra.mxu0 %v7035_v37 }
 0x6ae   :  { %v2326_v43 = vadd.f32 %v6496_v40, %v5668_v38  ;;  %v6499_v44 = vadd.f32 %v6498_v42, %v6497_v41  ;;  %v7040_v40 = vld [vmem:[%s9445_s5 + $0x148] sm:$0xff]   ;;  %v7042_v42 = vld [vmem:[%s9445_s5 + $0x150] sm:$0xff]   ;;  %3793 = vmatprep.subr.bf16.mxu0 %v7105_v26 }
 0x6af   :  { %v7041_v41 = vld [vmem:[%s9445_s5 + $0x108] sm:$0xff]   ;;  %v7168_v26 = vld [vmem:[%s9443_s3 + $0x354] ss:$8 sps:$4 sm:$0xff]  }
 0x6b0   :  { %v2329_v45 = vadd.f32 %v6499_v44, %v5668_v38  ;;  %v2332_v46 = vmul.f32 0.01, %v2326_v43  ;;  %v7038_v38 = vld [vmem:[%s9445_s5 + $0x140] sm:$0xff]   ;;  %v7044_v44 = vld [vmem:[%s9445_s5 + $0x158] sm:$0xff]  }
 0x6b1   :  { %6500 = vmatprep.subr.bf16.mxu1 %v7038_v38 }
 0x6b2   :  { %v2333_v49 = vmul.f32 0.01, %v2329_v45  ;;  %v2334_v47 = vmax.f32 %v2326_v43, %v2332_v46  ;;  %v7043_v43 = vld [vmem:[%s9445_s5 + $0x110] sm:$0xff]   ;;  %v7046_v46 = vld [vmem:[%s9445_s5 + $0x160] sm:$0xff]  }
 0x6b4   :  { %v2341_v50 = vmul.f32 %v5685_v48, %v2334_v47  ;;  %v2335_v51 = vmax.f32 %v2329_v45, %v2333_v49  ;;  %v7045_v45 = vld [vmem:[%s9445_s5 + $0x118] sm:$0xff]   ;;  %v7048_v49 = vld [vmem:[%s9445_s5 + $0x168] sm:$0xff]  }
 0x6b5   :  { %v7049_v47 = vld [vmem:[%s9445_s5 + $0x128] sm:$0xff]  }
 0x6b6   :  { %2343 = vadd.xlane.f32.xlu1 %v2341_v50  ;;  %v2342_v52 = vmul.f32 %v5685_v48, %v2335_v51  ;;  %v7047_v48 = vld [vmem:[%s9445_s5 + $0x120] sm:$0xff]  }
 0x6b7   :  { %v5786_v50 = vld [vmem:[%s9442_s2 + $0x2] ss:$8 sm:$0x3] }
 0x6b8   :  { %v2654_v51 = vrot.slane %v5786_v50, %v7840_v14  ;;  %v2658_v53 = vrot.slane %v5786_v50, %v7846_v17  ;;  %v7060_v50 = vld [vmem:[%s9440_s0 + $0x320] ss:$8 sps:$4 sm:$0xff]  }
 0x6ba   :  { %2345 = vadd.xlane.f32.xlu1 %v2342_v52 }
 0x6ea   :  { %v2600_v10 = vpop.f32.mrb[16].mxu0 }
 0x6eb   :  { %v2602_v11 = vpop.f32.mrb[17].mxu0 }
 0x6ec   :  { %v2604_v55 = vpop.f32.mrb[18].mxu0 }
 0x6ed   :  { %v2609_v16 = vpack.c.bf16 %v2604_v55, %v2600_v10  ;;  %v2606_v18 = vpop.f32.mrb[19].mxu0  ;;  %v7051_v10 = vld [vmem:[%s9445_s5 + $0x130] sm:$0xff]   ;;  %v7056_v55 = vld [vmem:[%s9440_s0 + $0x304] ss:$8 sps:$4 sm:$0xff]  }
 0x6ee   :  { %v2610_v19 = vpack.c.bf16 %v2606_v18, %v2602_v11  ;;  %v7052_v11 = vld [vmem:[%s9445_s5 + $0x178] sm:$0xff]   ;;  %v366_v18 = vunpack.c.h.bf16 %v5320_v13 }
 0x6ef   :  { %v2611_v20 = vmul.bf16 1009007652, %v2609_v16 }
 0x6f0   :  { %v2612_v22 = vmul.bf16 1009007652, %v2610_v19 }
 0x6f1   :  { %v8534_v25 = vmax.bf16 %v2611_v20, %v2609_v16  ;;  %v344_v16 = vunpack.c.l.bf16 %v5320_v13  ;;  %v372_v20 = vsel %vm217_vm0, %v366_v18, %v7480_v1  ;;  %v7093_v13 = vld [vmem:[%s9440_s0 + $0x3d0] ss:$8 sps:$4 sm:$0xff]   ;;  %v7096_v18 = vld [vmem:[%s9440_s0 + $0x3e0] ss:$8 sps:$4 sm:$0xff]  }
 0x6f2   :  { %v8532_v24 = vmax.bf16 %v2612_v22, %v2610_v19  ;;  %v374_v22 = vpack.c.bf16 %v7406_v29, %v372_v20  ;;  %v7099_v20 = vld [vmem:[%s9440_s0 + $0x3f0] ss:$8 sps:$4 sm:$0xff]  }
 0x6f3   :  { %v350_v19 = vsel %vm217_vm0, %v344_v16, %v7480_v1  ;;  %v3119_v32 = vunpack.c.l.bf16 %v8534_v25  ;;  %v3121_v37 = vunpack.c.h.bf16 %v8534_v25  ;;  %v7098_v16 = vld [vmem:[%s9440_s0 + $0x3e4] ss:$8 sps:$4 sm:$0xff]  }
 0x6f4   :  { %2853 = vmatprep.mubr.bf16.mxu1 %v8532_v24  ;;  %v352_v21 = vpack.c.bf16 %v7406_v29, %v350_v19  ;;  %376 = vst [vmem:[#allocation12 + $0x44] sm:$0xf] %v374_v22  ;;  %v3120_v33 = vunpack.c.l.bf16 %v8532_v24  ;;  %v7101_v19 = vld [vmem:[%s9440_s0 + $0x3f4] ss:$8 sps:$4 sm:$0xff]   ;;  %v7103_v22 = vld [vmem:[%s9441_s1 + $0x300] ss:$8 sps:$4 sm:$0xff]  }
 0x6f5   :  { %2854 = vmatmul.mubr.bf16.vlgmr.msra.gmra.mrb[16].mxu1 %v8534_v25  ;;  %v7059_v25 = vld [vmem:[%s9440_s0 + $0x314] ss:$8 sps:$4 sm:$0xff]  }
 0x6f6   :  { %6501 = vmatpush3.bf16.msra.mxu1 %v7039_v39  ;;  %354 = vst [vmem:[#allocation12 + $0x40] sm:$0xf] %v352_v21 }
 0x6f7   :  { %6502 = vmatprep.subr.bf16.mxu1 %v7040_v40 }
 0x6fa   :  { %6503 = vmatpush3.bf16.msra.mxu1 %v7041_v41  ;;  %v3122_v41 = vunpack.c.h.bf16 %v8532_v24  ;;  %v7057_v24 = vld [vmem:[%s9440_s0 + $0x310] ss:$8 sps:$4 sm:$0xff]  }
 0x6fb   :  { %6504 = vmatprep.subr.bf16.mxu1 %v7042_v42 }
 0x6fe   :  { %6505 = vmatpush3.bf16.msra.mxu1 %v7043_v43  ;;  %v8658_v43 = vld [vmem:[#allocation12 + $0x40] sm:$0xff] }
 0x6ff   :  { %6506 = vmatprep.subr.bf16.mxu1 %v7044_v44  ;;  %v5968_v21 = vcombine.low %v8647_v23, %v8658_v43 }
 0x702   :  { %6507 = vmatpush3.bf16.msra.mxu1 %v7045_v45 }
 0x703   :  { %6508 = vmatprep.subr.bf16.mxu1 %v7046_v46 }
 0x706   :  { %6509 = vmatpush3.bf16.msra.mxu1 %v7047_v48  ;;  %v7054_v48 = vld [vmem:[%s9440_s0 + $0x300] ss:$8 sps:$4 sm:$0xff]  }
 0x707   :  { %6510 = vmatprep.subr.bf16.mxu1 %v7048_v49  ;;  %v5969_v49 = vcombine.high %v8647_v23, %v8658_v43  ;;  %v7108_v23 = vld [vmem:[%s9441_s1 + $0x314] ss:$8 sps:$4 sm:$0xff]   ;;  %v7135_v43 = vld [vmem:[%s9441_s1 + $0x3a4] ss:$8 sps:$4 sm:$0xff]  }
 0x70a   :  { %6511 = vmatpush3.bf16.msra.mxu1 %v7049_v47  ;;  %v7062_v47 = vld [vmem:[%s9440_s0 + $0x324] ss:$8 sps:$4 sm:$0xff]  }
 0x70b   :  { %6512 = vmatprep.subr.bf16.mxu1 %v7050_v8  ;;  %v7089_v8 = vld [vmem:[%s9440_s0 + $0x3b4] ss:$8 sps:$4 sm:$0xff]  }
 0x70e   :  { %6513 = vmatpush3.bf16.msra.mxu1 %v7051_v10  ;;  %v7087_v10 = vld [vmem:[%s9440_s0 + $0x3b0] ss:$8 sps:$4 sm:$0xff]  }
 0x70f   :  { %6514 = vmatprep.subr.bf16.mxu1 %v7052_v11  ;;  %v7092_v11 = vld [vmem:[%s9440_s0 + $0x3c4] ss:$8 sps:$4 sm:$0xff]  }
 0x712   :  { %6515 = vmatpush3.bf16.msra.mxu1 %v7053_v56  ;;  %v7090_v56 = vld [vmem:[%s9440_s0 + $0x3c0] ss:$8 sps:$4 sm:$0xff]  }
 0x713   :  { %3538 = vmatprep.subr.bf16.mxu1 %v7056_v55  ;;  %v7095_v55 = vld [vmem:[%s9440_s0 + $0x3d4] ss:$8 sps:$4 sm:$0xff]  }
 0x7c8   :  { %v2855_v52 = vpop.f32.mrb[16].mxu1 }
 0x7c9   :  { %v2857_v54 = vpop.f32.mrb[17].mxu1  ;;  %v2856_v58 = vadd.f32 %v2855_v52, %v2654_v51  ;;  %v7063_v52 = vld [vmem:[%s9440_s0 + $0x330] ss:$8 sps:$4 sm:$0xff]  }
 0x7ca   :  { %v2859_v57 = vpop.f32.mrb[18].mxu1  ;;  %v2858_v61 = vadd.f32 %v2857_v54, %v2658_v53  ;;  %v7066_v54 = vld [vmem:[%s9440_s0 + $0x340] ss:$8 sps:$4 sm:$0xff]  }
 0x7cb   :  { %v2860_v59 = vadd.f32 %v2859_v57, %v2654_v51  ;;  %v2861_v60 = vpop.f32.mrb[19].mxu1  ;;  %v7065_v51 = vld [vmem:[%s9440_s0 + $0x334] ss:$8 sps:$4 sm:$0xff]  }
 0x7cc   :  { %v2862_v62 = vadd.f32 %v2861_v60, %v2658_v53  ;;  %v7068_v53 = vld [vmem:[%s9440_s0 + $0x344] ss:$8 sps:$4 sm:$0xff]   ;;  %v7071_v57 = vld [vmem:[%s9440_s0 + $0x354] ss:$8 sps:$4 sm:$0xff]   ;;  %v7072_v60 = vld [vmem:[%s9440_s0 + $0x360] ss:$8 sps:$4 sm:$0xff]  }
 0x7cd   :  { %v2864_v63 = vpack.c.bf16 %v2860_v59, %v2856_v58  ;;  %v7069_v58 = vld [vmem:[%s9440_s0 + $0x350] ss:$8 sps:$4 sm:$0xff]   ;;  %v7074_v59 = vld [vmem:[%s9440_s0 + $0x364] ss:$8 sps:$4 sm:$0xff]  }
 0x7ce   :  { %v2865_v0 = vpack.c.bf16 %v2862_v62, %v2858_v61  ;;  %v7077_v61 = vld [vmem:[%s9440_s0 + $0x374] ss:$8 sps:$4 sm:$0xff]   ;;  %v7075_v62 = vld [vmem:[%s9440_s0 + $0x370] ss:$8 sps:$4 sm:$0xff]  }
 0x7cf   :  { %v2866_v3 = vmul.bf16 1009007652, %v2864_v63 }
 0x7d0   :  { %v2867_v5 = vmul.bf16 1009007652, %v2865_v0 }
 0x7d1   :  { %v2868_v7 = vmax.bf16 %v2866_v3, %v2864_v63  ;;  %v7080_v63 = vld [vmem:[%s9440_s0 + $0x384] ss:$8 sps:$4 sm:$0xff]   ;;  %v7083_v3 = vld [vmem:[%s9440_s0 + $0x394] ss:$8 sps:$4 sm:$0xff]  }
 0x7d2   :  { %v2869_v2 = vmax.bf16 %v2867_v5, %v2865_v0  ;;  %v7078_v0 = vld [vmem:[%s9440_s0 + $0x380] ss:$8 sps:$4 sm:$0xff]   ;;  %v7081_v5 = vld [vmem:[%s9440_s0 + $0x390] ss:$8 sps:$4 sm:$0xff]  }
 0x7d4   :  { %3108 = vmatprep.mubr.bf16.mxu0 %v2869_v2  ;;  %v7086_v2 = vld [vmem:[%s9440_s0 + $0x3a4] ss:$8 sps:$4 sm:$0xff]  }
 0x7d5   :  { %3109 = vmatmul.mubr.bf16.vlgmr.msra.gmra.mrb[20].mxu0 %v2868_v7  ;;  %v7084_v7 = vld [vmem:[%s9440_s0 + $0x3a0] ss:$8 sps:$4 sm:$0xff]  }
 0x7d6   :  { %3794 = vmatpush1.bf16.msra.mxu0 %v7103_v22  ;;  %v7163_v22 = vld [vmem:[%s9443_s3 + $0x340] ss:$8 sps:$4 sm:$0xff]  }
 0x7d7   :  { %3795 = vmatprep.subr.bf16.mxu0 %v7108_v23  ;;  %v7171_v23 = vld [vmem:[%s9443_s3 + $0x364] ss:$8 sps:$4 sm:$0xff]  }
 0x8a8   :  { %v3110_v30 = vpop.f32.mrb[20].mxu0 }
 0x8a9   :  { %v3111_v31 = vadd.f32 %v3110_v30, %v2909_v27  ;;  %v3112_v6 = vpop.f32.mrb[21].mxu0  ;;  %v7109_v30 = vld [vmem:[%s9441_s1 + $0x320] ss:$8 sps:$4 sm:$0xff]  }
 0x8aa   :  { %v3113_v4 = vadd.f32 %v3112_v6, %v2913_v28  ;;  %v3114_v34 = vpop.f32.mrb[22].mxu0  ;;  %v7117_v6 = vld [vmem:[%s9441_s1 + $0x344] ss:$8 sps:$4 sm:$0xff]  }
 0x8ab   :  { %v3123_v35 = vadd.f32 %v3119_v32, %v3111_v31  ;;  %v3115_v36 = vadd.f32 %v3114_v34, %v2909_v27  ;;  %v3116_v38 = vpop.f32.mrb[23].mxu0  ;;  %v7106_v27 = vld [vmem:[%s9441_s1 + $0x310] ss:$8 sps:$4 sm:$0xff]   ;;  %v7114_v31 = vld [vmem:[%s9441_s1 + $0x334] ss:$8 sps:$4 sm:$0xff]  }
 0x8ac   :  { %v3124_v39 = vadd.f32 %v3120_v33, %v3113_v4  ;;  %v3117_v40 = vadd.f32 %v3116_v38, %v2913_v28  ;;  %v7111_v28 = vld [vmem:[%s9441_s1 + $0x324] ss:$8 sps:$4 sm:$0xff]   ;;  %3796 = vmatpush1.bf16.msra.mxu0 %v7106_v27  ;;  %v7112_v32 = vld [vmem:[%s9441_s1 + $0x330] ss:$8 sps:$4 sm:$0xff]   ;;  %v7115_v4 = vld [vmem:[%s9441_s1 + $0x340] ss:$8 sps:$4 sm:$0xff]  }
 0x8ad   :  { %v3125_v42 = vadd.f32 %v3121_v37, %v3115_v36  ;;  %3797 = vmatprep.subr.bf16.mxu0 %v7111_v28  ;;  %v7120_v33 = vld [vmem:[%s9441_s1 + $0x354] ss:$8 sps:$4 sm:$0xff]   ;;  %v7118_v34 = vld [vmem:[%s9441_s1 + $0x350] ss:$8 sps:$4 sm:$0xff]   ;;  %v7121_v36 = vld [vmem:[%s9441_s1 + $0x360] ss:$8 sps:$4 sm:$0xff]  }
 0x8ae   :  { %v3126_v44 = vadd.f32 %v3122_v41, %v3117_v40  ;;  %v7126_v37 = vld [vmem:[%s9441_s1 + $0x374] ss:$8 sps:$4 sm:$0xff]   ;;  %v7124_v38 = vld [vmem:[%s9441_s1 + $0x370] ss:$8 sps:$4 sm:$0xff]   ;;  %v7127_v40 = vld [vmem:[%s9441_s1 + $0x380] ss:$8 sps:$4 sm:$0xff]  }
 0x8af   :  { %v3127_v45 = vpack.c.bf16 %v3125_v42, %v3123_v35  ;;  %v7123_v35 = vld [vmem:[%s9441_s1 + $0x364] ss:$8 sps:$4 sm:$0xff]   ;;  %v7132_v41 = vld [vmem:[%s9441_s1 + $0x394] ss:$8 sps:$4 sm:$0xff]   ;;  %v7130_v42 = vld [vmem:[%s9441_s1 + $0x390] ss:$8 sps:$4 sm:$0xff]  }
 0x8b0   :  { %v3128_v46 = vpack.c.bf16 %v3126_v44, %v3124_v39  ;;  %3798 = vmatpush1.bf16.msra.mxu0 %v7109_v30  ;;  %v7129_v39 = vld [vmem:[%s9441_s1 + $0x384] ss:$8 sps:$4 sm:$0xff]   ;;  %v7133_v44 = vld [vmem:[%s9441_s1 + $0x3a0] ss:$8 sps:$4 sm:$0xff]   ;;  %v7166_v27 = vld [vmem:[%s9443_s3 + $0x350] ss:$8 sps:$4 sm:$0xff]  }
 0x8b1   :  { %3799 = vmatprep.subr.bf16.mxu0 %v7114_v31  ;;  %v7169_v28 = vld [vmem:[%s9443_s3 + $0x360] ss:$8 sps:$4 sm:$0xff]   ;;  %v7174_v30 = vld [vmem:[%s9443_s3 + $0x374] ss:$8 sps:$4 sm:$0xff]   ;;  %v7172_v31 = vld [vmem:[%s9443_s3 + $0x370] ss:$8 sps:$4 sm:$0xff]  }
 0x8b2   :  { %3295 = vmatprep.mubr.bf16.mxu1 %v3128_v46  ;;  %v7136_v46 = vld [vmem:[%s9441_s1 + $0x3b0] ss:$8 sps:$4 sm:$0xff]  }
 0x8b3   :  { %3296 = vmatmul.mubr.bf16.vlgmr.msra.gmra.mrb[20].mxu1 %v3127_v45  ;;  %v7138_v45 = vld [vmem:[%s9441_s1 + $0x3b4] ss:$8 sps:$4 sm:$0xff]  }
 0x8b4   :  { %3539 = vmatpush1.bf16.msra.mxu1 %v7054_v48  ;;  %3570 = vmatprep.mubr.bf16.mxu1 %v5969_v49  ;;  %v7141_v48 = vld [vmem:[%s9441_s1 + $0x3c4] ss:$8 sps:$4 sm:$0xff]   ;;  %v7139_v49 = vld [vmem:[%s9441_s1 + $0x3c0] ss:$8 sps:$4 sm:$0xff]  }
 0x8b5   :  { %3540 = vmatprep.subr.bf16.mxu1 %v7059_v25  ;;  %3800 = vmatpush1.bf16.msra.mxu0 %v7112_v32  ;;  %v7144_v25 = vld [vmem:[%s9441_s1 + $0x3d4] ss:$8 sps:$4 sm:$0xff]  }
 0x8b6   :  { %3801 = vmatprep.subr.bf16.mxu0 %v7117_v6  ;;  %v7177_v6 = vld [vmem:[%s9443_s3 + $0x384] ss:$8 sps:$4 sm:$0xff]  }
 0x8b8   :  { %3541 = vmatpush1.bf16.msra.mxu1 %v7057_v24  ;;  %v7142_v24 = vld [vmem:[%s9441_s1 + $0x3d0] ss:$8 sps:$4 sm:$0xff]  }
 0x8b9   :  { %3542 = vmatprep.subr.bf16.mxu1 %v7062_v47  ;;  %3802 = vmatpush1.bf16.msra.mxu0 %v7115_v4  ;;  %v7147_v47 = vld [vmem:[%s9441_s1 + $0x3e4] ss:$8 sps:$4 sm:$0xff]  }
 0x8ba   :  { %3803 = vmatprep.subr.bf16.mxu0 %v7120_v33 }
 0x8bc   :  { %3543 = vmatpush1.bf16.msra.mxu1 %v7060_v50  ;;  %v7145_v50 = vld [vmem:[%s9441_s1 + $0x3e0] ss:$8 sps:$4 sm:$0xff]  }
 0x8bd   :  { %3544 = vmatprep.subr.bf16.mxu1 %v7065_v51  ;;  %3804 = vmatpush1.bf16.msra.mxu0 %v7118_v34  ;;  %v7150_v51 = vld [vmem:[%s9441_s1 + $0x3f4] ss:$8 sps:$4 sm:$0xff]  }
 0x8be   :  { %3805 = vmatprep.subr.bf16.mxu0 %v7123_v35 }
 0x8c0   :  { %3545 = vmatpush1.bf16.msra.mxu1 %v7063_v52  ;;  %v7148_v52 = vld [vmem:[%s9441_s1 + $0x3f0] ss:$8 sps:$4 sm:$0xff]  }
 0x8c1   :  { %3546 = vmatprep.subr.bf16.mxu1 %v7068_v53  ;;  %3806 = vmatpush1.bf16.msra.mxu0 %v7121_v36  ;;  %v7175_v36 = vld [vmem:[%s9443_s3 + $0x380] ss:$8 sps:$4 sm:$0xff]  }
 0x8c2   :  { %3807 = vmatprep.subr.bf16.mxu0 %v7126_v37 }
 0x8c4   :  { %3547 = vmatpush1.bf16.msra.mxu1 %v7066_v54  ;;  %v5916_v54 = vld [vmem:[%s9446_s6 + $0x2] ss:$0 sm:$0xff] }
 0x8c5   :  { %3548 = vmatprep.subr.bf16.mxu1 %v7071_v57  ;;  %3808 = vmatpush1.bf16.msra.mxu0 %v7124_v38  ;;  %v7180_v38 = vld [vmem:[%s9443_s3 + $0x394] ss:$8 sps:$4 sm:$0xff]  }
 0x8c6   :  { %3809 = vmatprep.subr.bf16.mxu0 %v7129_v39 }
 0x8c8   :  { %3549 = vmatpush1.bf16.msra.mxu1 %v7069_v58 }
 0x8c9   :  { %3550 = vmatprep.subr.bf16.mxu1 %v7074_v59  ;;  %3810 = vmatpush1.bf16.msra.mxu0 %v7127_v40 }
 0x8ca   :  { %3811 = vmatprep.subr.bf16.mxu0 %v7132_v41  ;;  %v7178_v41 = vld [vmem:[%s9443_s3 + $0x390] ss:$8 sps:$4 sm:$0xff]  }
 0x8cc   :  { %3551 = vmatpush1.bf16.msra.mxu1 %v7072_v60 }
 0x8cd   :  { %3552 = vmatprep.subr.bf16.mxu1 %v7077_v61  ;;  %3812 = vmatpush1.bf16.msra.mxu0 %v7130_v42 }
 0x8ce   :  { %3813 = vmatprep.subr.bf16.mxu0 %v7135_v43  ;;  %v7183_v43 = vld [vmem:[%s9443_s3 + $0x3a4] ss:$8 sps:$4 sm:$0xff]  }
 0x8d0   :  { %3553 = vmatpush1.bf16.msra.mxu1 %v7075_v62 }
 0x8d1   :  { %3554 = vmatprep.subr.bf16.mxu1 %v7080_v63  ;;  %3814 = vmatpush1.bf16.msra.mxu0 %v7133_v44 }
 0x8d2   :  { %3815 = vmatprep.subr.bf16.mxu0 %v7138_v45  ;;  %v7181_v45 = vld [vmem:[%s9443_s3 + $0x3a0] ss:$8 sps:$4 sm:$0xff]  }
 0x8d4   :  { %3555 = vmatpush1.bf16.msra.mxu1 %v7078_v0 }
 0x8d5   :  { %3556 = vmatprep.subr.bf16.mxu1 %v7083_v3  ;;  %3816 = vmatpush1.bf16.msra.mxu0 %v7136_v46  ;;  %v5933_v3 = vld [vmem:[%s9447_s7 + $0x2] ss:$0 sm:$0xff]  ;;  %v7186_v46 = vld [vmem:[%s9443_s3 + $0x3b4] ss:$8 sps:$4 sm:$0xff]  }
 0x8d6   :  { %3817 = vmatprep.subr.bf16.mxu0 %v7141_v48  ;;  %v7184_v48 = vld [vmem:[%s9443_s3 + $0x3b0] ss:$8 sps:$4 sm:$0xff]  }
 0x8d8   :  { %3557 = vmatpush1.bf16.msra.mxu1 %v7081_v5 }
 0x8d9   :  { %3558 = vmatprep.subr.bf16.mxu1 %v7086_v2  ;;  %3818 = vmatpush1.bf16.msra.mxu0 %v7139_v49  ;;  %v7189_v49 = vld [vmem:[%s9443_s3 + $0x3c4] ss:$8 sps:$4 sm:$0xff]  }
 0x8da   :  { %3819 = vmatprep.subr.bf16.mxu0 %v7144_v25  ;;  %v7187_v25 = vld [vmem:[%s9443_s3 + $0x3c0] ss:$8 sps:$4 sm:$0xff]  }
 0x8dc   :  { %3559 = vmatpush1.bf16.msra.mxu1 %v7084_v7 }
 0x8dd   :  { %3560 = vmatprep.subr.bf16.mxu1 %v7089_v8  ;;  %3820 = vmatpush1.bf16.msra.mxu0 %v7142_v24  ;;  %v7192_v24 = vld [vmem:[%s9443_s3 + $0x3d4] ss:$8 sps:$4 sm:$0xff]  }
 0x8de   :  { %3821 = vmatprep.subr.bf16.mxu0 %v7147_v47  ;;  %v7190_v47 = vld [vmem:[%s9443_s3 + $0x3d0] ss:$8 sps:$4 sm:$0xff]  }
 0x8e0   :  { %3561 = vmatpush1.bf16.msra.mxu1 %v7087_v10 }
 0x8e1   :  { %3562 = vmatprep.subr.bf16.mxu1 %v7092_v11  ;;  %3822 = vmatpush1.bf16.msra.mxu0 %v7145_v50  ;;  %v7151_v11 = vld [vmem:[%s9443_s3 + $0x300] ss:$8 sps:$4 sm:$0xff]   ;;  %v7195_v50 = vld [vmem:[%s9443_s3 + $0x3e4] ss:$8 sps:$4 sm:$0xff]  }
 0x8e2   :  { %3823 = vmatprep.subr.bf16.mxu0 %v7150_v51  ;;  %v7193_v51 = vld [vmem:[%s9443_s3 + $0x3e0] ss:$8 sps:$4 sm:$0xff]  }
 0x8e4   :  { %3563 = vmatpush1.bf16.msra.mxu1 %v7090_v56  ;;  %v7153_v56 = vld [vmem:[%s9443_s3 + $0x304] ss:$8 sps:$4 sm:$0xff]  }
 0x8e5   :  { %3564 = vmatprep.subr.bf16.mxu1 %v7095_v55  ;;  %3824 = vmatpush1.bf16.msra.mxu0 %v7148_v52  ;;  %v7156_v55 = vld [vmem:[%s9443_s3 + $0x314] ss:$8 sps:$4 sm:$0xff]  }
 0x8e6   :  { %v7198_v52 = vld [vmem:[%s9443_s3 + $0x3f4] ss:$8 sps:$4 sm:$0xff]  }
 0x8e8   :  { %3565 = vmatpush1.bf16.msra.mxu1 %v7093_v13  ;;  %v7154_v13 = vld [vmem:[%s9443_s3 + $0x310] ss:$8 sps:$4 sm:$0xff]  }
 0x8e9   :  { %3566 = vmatprep.subr.bf16.mxu1 %v7098_v16  ;;  %v7159_v16 = vld [vmem:[%s9443_s3 + $0x324] ss:$8 sps:$4 sm:$0xff]  }
 0x8ec   :  { %3567 = vmatpush1.bf16.msra.mxu1 %v7096_v18  ;;  %v7157_v18 = vld [vmem:[%s9443_s3 + $0x320] ss:$8 sps:$4 sm:$0xff]  }
 0x8ed   :  { %3568 = vmatprep.subr.bf16.mxu1 %v7101_v19  ;;  %v7162_v19 = vld [vmem:[%s9443_s3 + $0x334] ss:$8 sps:$4 sm:$0xff]  }
 0x8f0   :  { %3569 = vmatpush1.bf16.msra.mxu1 %v7099_v20  ;;  %v7160_v20 = vld [vmem:[%s9443_s3 + $0x330] ss:$8 sps:$4 sm:$0xff]  }
 0x8f1   :  { %4048 = vmatprep.subr.bf16.mxu1 %v7153_v56 }
 0x8f3   :  { %3571 = vmatmul.mubr.bf16.vlgmr.msra.gmra.mrb[24].mxu1 %v5968_v21  ;;  %v7165_v21 = vld [vmem:[%s9443_s3 + $0x344] ss:$8 sps:$4 sm:$0xff]  }
 0x8f4   :  { %4049 = vmatpush1.bf16.msra.mxu1 %v7151_v11 }
 0x8f5   :  { %4050 = vmatprep.subr.bf16.mxu1 %v7156_v55 }
 0x8f8   :  { %4051 = vmatpush1.bf16.msra.mxu1 %v7154_v13 }
 0x8f9   :  { %4052 = vmatprep.subr.bf16.mxu1 %v7159_v16 }
 0x8fc   :  { %4053 = vmatpush1.bf16.msra.mxu1 %v7157_v18 }
 0x8fd   :  { %4054 = vmatprep.subr.bf16.mxu1 %v7162_v19 }
 0x900   :  { %4055 = vmatpush1.bf16.msra.mxu1 %v7160_v20 }
 0x901   :  { %4056 = vmatprep.subr.bf16.mxu1 %v7165_v21 }
 0x904   :  { %4057 = vmatpush1.bf16.msra.mxu1 %v7163_v22 }
 0x905   :  { %4058 = vmatprep.subr.bf16.mxu1 %v7168_v26 }
 0x908   :  { %4059 = vmatpush1.bf16.msra.mxu1 %v7166_v27 }
 0x909   :  { %4060 = vmatprep.subr.bf16.mxu1 %v7171_v23 }
 0x90c   :  { %4061 = vmatpush1.bf16.msra.mxu1 %v7169_v28 }
 0x90d   :  { %4062 = vmatprep.subr.bf16.mxu1 %v7174_v30  ;;  %v7211_v30 = vld [vmem:[%s9445_s5 + $0x1f0] sm:$0xff]  }
 0x910   :  { %4063 = vmatpush1.bf16.msra.mxu1 %v7172_v31  ;;  %v7212_v31 = vld [vmem:[%s9445_s5 + $0x1b0] sm:$0xff]  }
 0x911   :  { %4064 = vmatprep.subr.bf16.mxu1 %v7177_v6  ;;  %v7214_v6 = vld [vmem:[%s9445_s5 + $0x1b8] sm:$0xff]  }
 0x914   :  { %4065 = vmatpush1.bf16.msra.mxu1 %v7175_v36 }
 0x915   :  { %4066 = vmatprep.subr.bf16.mxu1 %v7180_v38 }
 0x918   :  { %4067 = vmatpush1.bf16.msra.mxu1 %v7178_v41  ;;  %v6099_v41 = vld [vmem:[%s9444_s4 + $0x3] ss:$8 sm:$0x3] }
 0x919   :  { %4068 = vmatprep.subr.bf16.mxu1 %v7183_v43  ;;  %v3881_v43 = vrot.slane %v6099_v41, %v7840_v14  ;;  %v3885_v15 = vrot.slane %v6099_v41, %v7846_v17  ;;  %v7270_v41 = vld [vmem:[%s9441_s1 + $0x420] ss:$8 sps:$4 sm:$0xff]  }
 0x91c   :  { %4069 = vmatpush1.bf16.msra.mxu1 %v7181_v45 }
 0x91d   :  { %4070 = vmatprep.subr.bf16.mxu1 %v7186_v46 }
 0x920   :  { %4071 = vmatpush1.bf16.msra.mxu1 %v7184_v48 }
 0x921   :  { %4072 = vmatprep.subr.bf16.mxu1 %v7189_v49 }
 0x924   :  { %4073 = vmatpush1.bf16.msra.mxu1 %v7187_v25 }
 0x925   :  { %4074 = vmatprep.subr.bf16.mxu1 %v7192_v24 }
 0x928   :  { %4075 = vmatpush1.bf16.msra.mxu1 %v7190_v47 }
 0x929   :  { %4076 = vmatprep.subr.bf16.mxu1 %v7195_v50 }
 0x92c   :  { %4077 = vmatpush1.bf16.msra.mxu1 %v7193_v51 }
 0x92d   :  { %4078 = vmatprep.subr.bf16.mxu1 %v7198_v52 }
 0x986   :  { %v6516_v53 = vpop.f32.mrb[20].mxu1 }
 0x987   :  { %v6517_v57 = vpop.f32.mrb[21].mxu1 }
 0x988   :  { %v6518_v58 = vadd.f32 %v6517_v57, %v6516_v53  ;;  %v6519_v59 = vpop.f32.mrb[22].mxu1  ;;  %v7196_v53 = vld [vmem:[%s9443_s3 + $0x3f0] ss:$8 sps:$4 sm:$0xff]   ;;  %v7200_v57 = vld [vmem:[%s9445_s5 + $0x180] sm:$0xff]  }
 0x989   :  { %v6520_v60 = vpop.f32.mrb[23].mxu1  ;;  %4079 = vmatpush1.bf16.msra.mxu1 %v7196_v53 }
 0x98a   :  { %v3298_v61 = vadd.f32 %v6518_v58, %v5916_v54  ;;  %v6521_v62 = vadd.f32 %v6520_v60, %v6519_v59  ;;  %v7201_v58 = vld [vmem:[%s9445_s5 + $0x1c8] sm:$0xff]   ;;  %v7203_v60 = vld [vmem:[%s9445_s5 + $0x1d0] sm:$0xff]  }
 0x98b   :  { %v7202_v59 = vld [vmem:[%s9445_s5 + $0x188] sm:$0xff]  }
 0x98c   :  { %v3304_v63 = vmul.f32 0.01, %v3298_v61  ;;  %v3301_v0 = vadd.f32 %v6521_v62, %v5916_v54  ;;  %v7199_v54 = vld [vmem:[%s9445_s5 + $0x1c0] sm:$0xff]   ;;  %v7205_v62 = vld [vmem:[%s9445_s5 + $0x1d8] sm:$0xff]  }
 0x98d   :  { %6522 = vmatprep.subr.bf16.mxu0 %v7199_v54 }
 0x98e   :  { %v3305_v5 = vmul.f32 0.01, %v3301_v0  ;;  %v3306_v2 = vmax.f32 %v3298_v61, %v3304_v63  ;;  %v7204_v61 = vld [vmem:[%s9445_s5 + $0x190] sm:$0xff]   ;;  %v7206_v63 = vld [vmem:[%s9445_s5 + $0x198] sm:$0xff]  }
 0x990   :  { %v3313_v7 = vmul.f32 %v5933_v3, %v3306_v2  ;;  %v3307_v8 = vmax.f32 %v3301_v0, %v3305_v5  ;;  %v7207_v0 = vld [vmem:[%s9445_s5 + $0x1e0] sm:$0xff]   ;;  %v7209_v5 = vld [vmem:[%s9445_s5 + $0x1e8] sm:$0xff]  }
 0x991   :  { %v7210_v2 = vld [vmem:[%s9445_s5 + $0x1a8] sm:$0xff]  }
 0x992   :  { %3315 = vadd.xlane.f32.xlu0 %v3313_v7  ;;  %v3314_v10 = vmul.f32 %v5933_v3, %v3307_v8  ;;  %v7208_v3 = vld [vmem:[%s9445_s5 + $0x1a0] sm:$0xff]  }
 0x993   :  { %v6034_v7 = vld [vmem:[%s9442_s2 + $0x3] ss:$8 sm:$0x3] }
 0x994   :  { %3317 = vadd.xlane.f32.xlu1 %v3314_v10  ;;  %v3626_v8 = vrot.slane %v6034_v7, %v7840_v14  ;;  %v3630_v11 = vrot.slane %v6034_v7, %v7846_v17  ;;  %v7229_v7 = vld [vmem:[%s9440_s0 + $0x444] ss:$8 sps:$4 sm:$0xff]  }
 0x9c6   :  { %v3572_v32 = vpop.f32.mrb[24].mxu1 }
 0x9c7   :  { %v3574_v4 = vpop.f32.mrb[25].mxu1 }
 0x9c8   :  { %v3576_v33 = vpop.f32.mrb[26].mxu1 }
 0x9c9   :  { %v3581_v34 = vpack.c.bf16 %v3576_v33, %v3572_v32  ;;  %v3578_v35 = vpop.f32.mrb[27].mxu1  ;;  %v7213_v32 = vld [vmem:[%s9445_s5 + $0x1f8] sm:$0xff]   ;;  %v5322_v33 = vld [vmem:[%s9451_s11 + $0x48] sm:$0xff]  }
 0x9ca   :  { %v3582_v37 = vpack.c.bf16 %v3578_v35, %v3574_v4  ;;  %v7217_v4 = vld [vmem:[%s9440_s0 + $0x404] ss:$8 sps:$4 sm:$0xff]   ;;  %v410_v35 = vunpack.c.h.bf16 %v5322_v33 }
 0x9cb   :  { %v3583_v39 = vmul.bf16 1009007652, %v3581_v34 }
 0x9cc   :  { %v3584_v40 = vmul.bf16 1009007652, %v3582_v37 }
 0x9cd   :  { %v8924_v44 = vmax.bf16 %v3583_v39, %v3581_v34  ;;  %v388_v34 = vunpack.c.l.bf16 %v5322_v33  ;;  %v7262_v33 = vld [vmem:[%s9440_s0 + $0x4f4] ss:$8 sps:$4 sm:$0xff]  }
 0x9ce   :  { %v8919_v42 = vmax.bf16 %v3584_v40, %v3582_v37  ;;  %v416_v37 = vsel %vm217_vm0, %v410_v35, %v7480_v1  ;;  %v9031_v40 = vld [vmem:[%s9451_s11 + $0x20] sm:$0xff]  }
 0x9cf   :  { %v394_v36 = vsel %vm217_vm0, %v388_v34, %v7480_v1  ;;  %v418_v39 = vpack.c.bf16 %v7406_v29, %v416_v37  ;;  %v4091_v46 = vunpack.c.l.bf16 %v8924_v44  ;;  %v4093_v50 = vunpack.c.h.bf16 %v8924_v44  ;;  %v7260_v34 = vld [vmem:[%s9440_s0 + $0x4f0] ss:$8 sps:$4 sm:$0xff]   ;;  %v7266_v37 = vld [vmem:[%s9441_s1 + $0x404] ss:$8 sps:$4 sm:$0xff]  }
 0x9d0   :  { %3825 = vmatprep.mubr.bf16.mxu0 %v8919_v42  ;;  %v396_v38 = vpack.c.bf16 %v7406_v29, %v394_v36  ;;  %v4092_v49 = vunpack.c.l.bf16 %v8919_v42  ;;  %v4094_v54 = vunpack.c.h.bf16 %v8919_v42  ;;  %v7218_v42 = vld [vmem:[%s9440_s0 + $0x410] ss:$8 sps:$4 sm:$0xff]   ;;  %v7264_v36 = vld [vmem:[%s9441_s1 + $0x400] ss:$8 sps:$4 sm:$0xff]   ;;  %4765 = vmatprep.subr.bf16.mxu1 %v7266_v37 }
 0x9d1   :  { %3826 = vmatmul.mubr.bf16.vlgmr.msra.gmra.mrb[24].mxu0 %v8924_v44  ;;  %420 = vst [vmem:[#allocation12 + $0x4c] sm:$0xf] %v418_v39  ;;  %v7220_v44 = vld [vmem:[%s9440_s0 + $0x414] ss:$8 sps:$4 sm:$0xff]   ;;  %v7330_v37 = vld [vmem:[%s9443_s3 + $0x460] ss:$8 sps:$4 sm:$0xff]  }
 0x9d2   :  { %6523 = vmatpush3.bf16.msra.mxu0 %v7200_v57  ;;  %398 = vst [vmem:[#allocation12 + $0x48] sm:$0xf] %v396_v38  ;;  %v7267_v38 = vld [vmem:[%s9441_s1 + $0x410] ss:$8 sps:$4 sm:$0xff]   ;;  %v7269_v39 = vld [vmem:[%s9441_s1 + $0x414] ss:$8 sps:$4 sm:$0xff]  }
 0x9d3   :  { %6524 = vmatprep.subr.bf16.mxu0 %v7201_v58 }
 0x9d6   :  { %6525 = vmatpush3.bf16.msra.mxu0 %v7202_v59 }
 0x9d7   :  { %6526 = vmatprep.subr.bf16.mxu0 %v7203_v60 }
 0x9d9   :  { %v9042_v58 = vld [vmem:[#allocation12 + $0x48] sm:$0xff] }
 0x9da   :  { %6527 = vmatpush3.bf16.msra.mxu0 %v7204_v61  ;;  %v6216_v35 = vcombine.low %v9031_v40, %v9042_v58 }
 0x9db   :  { %6528 = vmatprep.subr.bf16.mxu0 %v7205_v62  ;;  %v7215_v62 = vld [vmem:[%s9440_s0 + $0x400] ss:$8 sps:$4 sm:$0xff]  }
 0x9de   :  { %6529 = vmatpush3.bf16.msra.mxu0 %v7206_v63  ;;  %v6217_v63 = vcombine.high %v9031_v40, %v9042_v58  ;;  %v7272_v40 = vld [vmem:[%s9441_s1 + $0x424] ss:$8 sps:$4 sm:$0xff]   ;;  %v7297_v58 = vld [vmem:[%s9441_s1 + $0x4b0] ss:$8 sps:$4 sm:$0xff]  }
 0x9df   :  { %6530 = vmatprep.subr.bf16.mxu0 %v7207_v0  ;;  %v7223_v0 = vld [vmem:[%s9440_s0 + $0x424] ss:$8 sps:$4 sm:$0xff]  }
 0x9e2   :  { %6531 = vmatpush3.bf16.msra.mxu0 %v7208_v3  ;;  %v7221_v3 = vld [vmem:[%s9440_s0 + $0x420] ss:$8 sps:$4 sm:$0xff]  }
 0x9e3   :  { %6532 = vmatprep.subr.bf16.mxu0 %v7209_v5  ;;  %v7226_v5 = vld [vmem:[%s9440_s0 + $0x434] ss:$8 sps:$4 sm:$0xff]  }
 0x9e6   :  { %6533 = vmatpush3.bf16.msra.mxu0 %v7210_v2  ;;  %v7224_v2 = vld [vmem:[%s9440_s0 + $0x430] ss:$8 sps:$4 sm:$0xff]  }
 0x9e7   :  { %6534 = vmatprep.subr.bf16.mxu0 %v7211_v30  ;;  %v7251_v30 = vld [vmem:[%s9440_s0 + $0x4c0] ss:$8 sps:$4 sm:$0xff]  }
 0x9ea   :  { %6535 = vmatpush3.bf16.msra.mxu0 %v7212_v31  ;;  %v7256_v31 = vld [vmem:[%s9440_s0 + $0x4d4] ss:$8 sps:$4 sm:$0xff]  }
 0x9eb   :  { %6536 = vmatprep.subr.bf16.mxu0 %v7213_v32  ;;  %v7254_v32 = vld [vmem:[%s9440_s0 + $0x4d0] ss:$8 sps:$4 sm:$0xff]  }
 0x9ee   :  { %6537 = vmatpush3.bf16.msra.mxu0 %v7214_v6  ;;  %v7259_v6 = vld [vmem:[%s9440_s0 + $0x4e4] ss:$8 sps:$4 sm:$0xff]  }
 0x9ef   :  { %4510 = vmatprep.subr.bf16.mxu0 %v7217_v4  ;;  %v7257_v4 = vld [vmem:[%s9440_s0 + $0x4e0] ss:$8 sps:$4 sm:$0xff]  }
 0xaa4   :  { %v3827_v10 = vpop.f32.mrb[24].mxu0 }
 0xaa5   :  { %v3829_v56 = vpop.f32.mrb[25].mxu0  ;;  %v3828_v13 = vadd.f32 %v3827_v10, %v3626_v8  ;;  %v7232_v10 = vld [vmem:[%s9440_s0 + $0x454] ss:$8 sps:$4 sm:$0xff]  }
 0xaa6   :  { %v3831_v55 = vpop.f32.mrb[26].mxu0  ;;  %v3830_v19 = vadd.f32 %v3829_v56, %v3630_v11  ;;  %v7235_v56 = vld [vmem:[%s9440_s0 + $0x464] ss:$8 sps:$4 sm:$0xff]  }
 0xaa7   :  { %v3832_v16 = vadd.f32 %v3831_v55, %v3626_v8  ;;  %v3833_v18 = vpop.f32.mrb[27].mxu0  ;;  %v7227_v8 = vld [vmem:[%s9440_s0 + $0x440] ss:$8 sps:$4 sm:$0xff]  }
 0xaa8   :  { %v3834_v20 = vadd.f32 %v3833_v18, %v3630_v11  ;;  %v7230_v11 = vld [vmem:[%s9440_s0 + $0x450] ss:$8 sps:$4 sm:$0xff]   ;;  %v7233_v55 = vld [vmem:[%s9440_s0 + $0x460] ss:$8 sps:$4 sm:$0xff]   ;;  %v7241_v18 = vld [vmem:[%s9440_s0 + $0x484] ss:$8 sps:$4 sm:$0xff]  }
 0xaa9   :  { %v3836_v21 = vpack.c.bf16 %v3832_v16, %v3828_v13  ;;  %v7238_v13 = vld [vmem:[%s9440_s0 + $0x474] ss:$8 sps:$4 sm:$0xff]   ;;  %v7236_v16 = vld [vmem:[%s9440_s0 + $0x470] ss:$8 sps:$4 sm:$0xff]  }
 0xaaa   :  { %v3837_v22 = vpack.c.bf16 %v3834_v20, %v3830_v19  ;;  %v7239_v19 = vld [vmem:[%s9440_s0 + $0x480] ss:$8 sps:$4 sm:$0xff]   ;;  %v7244_v20 = vld [vmem:[%s9440_s0 + $0x494] ss:$8 sps:$4 sm:$0xff]  }
 0xaab   :  { %v3838_v26 = vmul.bf16 1009007652, %v3836_v21 }
 0xaac   :  { %v3839_v27 = vmul.bf16 1009007652, %v3837_v22 }
 0xaad   :  { %v3840_v28 = vmax.bf16 %v3838_v26, %v3836_v21  ;;  %v7242_v21 = vld [vmem:[%s9440_s0 + $0x490] ss:$8 sps:$4 sm:$0xff]   ;;  %v7245_v26 = vld [vmem:[%s9440_s0 + $0x4a0] ss:$8 sps:$4 sm:$0xff]  }
 0xaae   :  { %v3841_v23 = vmax.bf16 %v3839_v27, %v3837_v22  ;;  %v7247_v22 = vld [vmem:[%s9440_s0 + $0x4a4] ss:$8 sps:$4 sm:$0xff]   ;;  %v7250_v27 = vld [vmem:[%s9440_s0 + $0x4b4] ss:$8 sps:$4 sm:$0xff]  }
 0xab0   :  { %4080 = vmatprep.mubr.bf16.mxu1 %v3841_v23  ;;  %v7248_v23 = vld [vmem:[%s9440_s0 + $0x4b0] ss:$8 sps:$4 sm:$0xff]  }
 0xab1   :  { %4081 = vmatmul.mubr.bf16.vlgmr.msra.gmra.mrb[28].mxu1 %v3840_v28  ;;  %v7253_v28 = vld [vmem:[%s9440_s0 + $0x4c4] ss:$8 sps:$4 sm:$0xff]  }
 0xab2   :  { %4766 = vmatpush1.bf16.msra.mxu1 %v7264_v36  ;;  %v7332_v36 = vld [vmem:[%s9443_s3 + $0x464] ss:$8 sps:$4 sm:$0xff]  }
 0xab3   :  { %4767 = vmatprep.subr.bf16.mxu1 %v7269_v39  ;;  %v7333_v39 = vld [vmem:[%s9443_s3 + $0x470] ss:$8 sps:$4 sm:$0xff]  }
 0xab6   :  { %4768 = vmatpush1.bf16.msra.mxu1 %v7267_v38  ;;  %v7335_v38 = vld [vmem:[%s9443_s3 + $0x474] ss:$8 sps:$4 sm:$0xff]  }
 0xab7   :  { %4769 = vmatprep.subr.bf16.mxu1 %v7272_v40 }
 0xaba   :  { %4770 = vmatpush1.bf16.msra.mxu1 %v7270_v41  ;;  %v7338_v41 = vld [vmem:[%s9443_s3 + $0x484] ss:$8 sps:$4 sm:$0xff]  }
 0xb84   :  { %v4082_v1 = vpop.f32.mrb[28].mxu1 }
 0xb85   :  { %v4083_v45 = vadd.f32 %v4082_v1, %v3881_v43  ;;  %v4084_v29 = vpop.f32.mrb[29].mxu1  ;;  %v7278_v1 = vld [vmem:[%s9441_s1 + $0x444] ss:$8 sps:$4 sm:$0xff]  }
 0xb86   :  { %v4085_v48 = vadd.f32 %v4084_v29, %v3885_v15  ;;  %v4086_v25 = vpop.f32.mrb[30].mxu1  ;;  %v7279_v29 = vld [vmem:[%s9441_s1 + $0x450] ss:$8 sps:$4 sm:$0xff]  }
 0xb87   :  { %v4095_v24 = vadd.f32 %v4091_v46, %v4083_v45  ;;  %v4087_v47 = vadd.f32 %v4086_v25, %v3881_v43  ;;  %v4088_v51 = vpop.f32.mrb[31].mxu1  ;;  %v7275_v43 = vld [vmem:[%s9441_s1 + $0x434] ss:$8 sps:$4 sm:$0xff]   ;;  %v7276_v45 = vld [vmem:[%s9441_s1 + $0x440] ss:$8 sps:$4 sm:$0xff]  }
 0xb88   :  { %v4096_v52 = vadd.f32 %v4092_v49, %v4085_v48  ;;  %v4089_v53 = vadd.f32 %v4088_v51, %v3885_v15  ;;  %v7273_v15 = vld [vmem:[%s9441_s1 + $0x430] ss:$8 sps:$4 sm:$0xff]   ;;  %4771 = vmatprep.subr.bf16.mxu1 %v7275_v43  ;;  %v7281_v46 = vld [vmem:[%s9441_s1 + $0x454] ss:$8 sps:$4 sm:$0xff]   ;;  %v7284_v48 = vld [vmem:[%s9441_s1 + $0x464] ss:$8 sps:$4 sm:$0xff]  }
 0xb89   :  { %v4097_v57 = vadd.f32 %v4093_v50, %v4087_v47  ;;  %4772 = vmatpush1.bf16.msra.mxu1 %v7273_v15  ;;  %v7282_v49 = vld [vmem:[%s9441_s1 + $0x460] ss:$8 sps:$4 sm:$0xff]   ;;  %v7287_v25 = vld [vmem:[%s9441_s1 + $0x474] ss:$8 sps:$4 sm:$0xff]   ;;  %v7290_v47 = vld [vmem:[%s9441_s1 + $0x484] ss:$8 sps:$4 sm:$0xff]  }
 0xb8a   :  { %v4098_v59 = vadd.f32 %v4094_v54, %v4089_v53  ;;  %4773 = vmatprep.subr.bf16.mxu1 %v7278_v1  ;;  %v7288_v50 = vld [vmem:[%s9441_s1 + $0x480] ss:$8 sps:$4 sm:$0xff]   ;;  %v7293_v51 = vld [vmem:[%s9441_s1 + $0x494] ss:$8 sps:$4 sm:$0xff]   ;;  %v7296_v53 = vld [vmem:[%s9441_s1 + $0x4a4] ss:$8 sps:$4 sm:$0xff]  }
 0xb8b   :  { %v4099_v60 = vpack.c.bf16 %v4097_v57, %v4095_v24  ;;  %v7285_v24 = vld [vmem:[%s9441_s1 + $0x470] ss:$8 sps:$4 sm:$0xff]   ;;  %v7294_v54 = vld [vmem:[%s9441_s1 + $0x4a0] ss:$8 sps:$4 sm:$0xff]   ;;  %v7299_v57 = vld [vmem:[%s9441_s1 + $0x4b4] ss:$8 sps:$4 sm:$0xff]  }
 0xb8c   :  { %v4100_v61 = vpack.c.bf16 %v4098_v59, %v4096_v52  ;;  %v7291_v52 = vld [vmem:[%s9441_s1 + $0x490] ss:$8 sps:$4 sm:$0xff]   ;;  %v7302_v59 = vld [vmem:[%s9441_s1 + $0x4c4] ss:$8 sps:$4 sm:$0xff]  }
 0xb8d   :  { %4774 = vmatpush1.bf16.msra.mxu1 %v7276_v45 }
 0xb8e   :  { %4267 = vmatprep.mubr.bf16.mxu0 %v4100_v61  ;;  %4775 = vmatprep.subr.bf16.mxu1 %v7281_v46  ;;  %v7305_v61 = vld [vmem:[%s9441_s1 + $0x4d4] ss:$8 sps:$4 sm:$0xff]   ;;  %v7336_v46 = vld [vmem:[%s9443_s3 + $0x480] ss:$8 sps:$4 sm:$0xff]  }
 0xb8f   :  { %4268 = vmatmul.mubr.bf16.vlgmr.msra.gmra.mrb[28].mxu0 %v4099_v60  ;;  %v7300_v60 = vld [vmem:[%s9441_s1 + $0x4c0] ss:$8 sps:$4 sm:$0xff]  }
 0xb90   :  { %4511 = vmatpush1.bf16.msra.mxu0 %v7215_v62  ;;  %4542 = vmatprep.mubr.bf16.mxu0 %v6217_v63  ;;  %v7303_v62 = vld [vmem:[%s9441_s1 + $0x4d0] ss:$8 sps:$4 sm:$0xff]   ;;  %v7308_v63 = vld [vmem:[%s9441_s1 + $0x4e4] ss:$8 sps:$4 sm:$0xff]  }
 0xb91   :  { %4512 = vmatprep.subr.bf16.mxu0 %v7220_v44  ;;  %4776 = vmatpush1.bf16.msra.mxu1 %v7279_v29  ;;  %v7306_v44 = vld [vmem:[%s9441_s1 + $0x4e0] ss:$8 sps:$4 sm:$0xff]  }
 0xb92   :  { %4777 = vmatprep.subr.bf16.mxu1 %v7284_v48  ;;  %v7341_v48 = vld [vmem:[%s9443_s3 + $0x494] ss:$8 sps:$4 sm:$0xff]  }
 0xb94   :  { %4513 = vmatpush1.bf16.msra.mxu0 %v7218_v42  ;;  %v7311_v42 = vld [vmem:[%s9441_s1 + $0x4f4] ss:$8 sps:$4 sm:$0xff]  }
 0xb95   :  { %4514 = vmatprep.subr.bf16.mxu0 %v7223_v0  ;;  %4778 = vmatpush1.bf16.msra.mxu1 %v7282_v49  ;;  %v7309_v0 = vld [vmem:[%s9441_s1 + $0x4f0] ss:$8 sps:$4 sm:$0xff]  }
 0xb96   :  { %4779 = vmatprep.subr.bf16.mxu1 %v7287_v25 }
 0xb98   :  { %4515 = vmatpush1.bf16.msra.mxu0 %v7221_v3 }
 0xb99   :  { %4516 = vmatprep.subr.bf16.mxu0 %v7226_v5  ;;  %4780 = vmatpush1.bf16.msra.mxu1 %v7285_v24  ;;  %v6164_v5 = vld [vmem:[%s9446_s6 + $0x3] ss:$0 sm:$0xff]  ;;  %v7339_v24 = vld [vmem:[%s9443_s3 + $0x490] ss:$8 sps:$4 sm:$0xff]  }
 0xb9a   :  { %4781 = vmatprep.subr.bf16.mxu1 %v7290_v47 }
 0xb9c   :  { %4517 = vmatpush1.bf16.msra.mxu0 %v7224_v2 }
 0xb9d   :  { %4518 = vmatprep.subr.bf16.mxu0 %v7229_v7  ;;  %4782 = vmatpush1.bf16.msra.mxu1 %v7288_v50  ;;  %v7344_v50 = vld [vmem:[%s9443_s3 + $0x4a4] ss:$8 sps:$4 sm:$0xff]  }
 0xb9e   :  { %4783 = vmatprep.subr.bf16.mxu1 %v7293_v51 }
 0xba0   :  { %4519 = vmatpush1.bf16.msra.mxu0 %v7227_v8 }
 0xba1   :  { %4520 = vmatprep.subr.bf16.mxu0 %v7232_v10  ;;  %4784 = vmatpush1.bf16.msra.mxu1 %v7291_v52  ;;  %v7342_v52 = vld [vmem:[%s9443_s3 + $0x4a0] ss:$8 sps:$4 sm:$0xff]  }
 0xba2   :  { %4785 = vmatprep.subr.bf16.mxu1 %v7296_v53  ;;  %v7347_v53 = vld [vmem:[%s9443_s3 + $0x4b4] ss:$8 sps:$4 sm:$0xff]  }
 0xba4   :  { %4521 = vmatpush1.bf16.msra.mxu0 %v7230_v11 }
 0xba5   :  { %4522 = vmatprep.subr.bf16.mxu0 %v7235_v56  ;;  %4786 = vmatpush1.bf16.msra.mxu1 %v7294_v54  ;;  %v7345_v54 = vld [vmem:[%s9443_s3 + $0x4b0] ss:$8 sps:$4 sm:$0xff]  }
 0xba6   :  { %4787 = vmatprep.subr.bf16.mxu1 %v7299_v57  ;;  %v7350_v57 = vld [vmem:[%s9443_s3 + $0x4c4] ss:$8 sps:$4 sm:$0xff]  }
 0xba8   :  { %4523 = vmatpush1.bf16.msra.mxu0 %v7233_v55 }
 0xba9   :  { %4524 = vmatprep.subr.bf16.mxu0 %v7238_v13  ;;  %4788 = vmatpush1.bf16.msra.mxu1 %v7297_v58  ;;  %v7348_v58 = vld [vmem:[%s9443_s3 + $0x4c0] ss:$8 sps:$4 sm:$0xff]  }
 0xbaa   :  { %4789 = vmatprep.subr.bf16.mxu1 %v7302_v59  ;;  %v7353_v59 = vld [vmem:[%s9443_s3 + $0x4d4] ss:$8 sps:$4 sm:$0xff]  }
 0xbac   :  { %4525 = vmatpush1.bf16.msra.mxu0 %v7236_v16  ;;  %v6181_v16 = vld [vmem:[%s9447_s7 + $0x3] ss:$0 sm:$0xff] }
 0xbad   :  { %4526 = vmatprep.subr.bf16.mxu0 %v7241_v18  ;;  %4790 = vmatpush1.bf16.msra.mxu1 %v7300_v60  ;;  %v7351_v60 = vld [vmem:[%s9443_s3 + $0x4d0] ss:$8 sps:$4 sm:$0xff]  }
 0xbae   :  { %4791 = vmatprep.subr.bf16.mxu1 %v7305_v61  ;;  %v7356_v61 = vld [vmem:[%s9443_s3 + $0x4e4] ss:$8 sps:$4 sm:$0xff]  }
 0xbb0   :  { %4527 = vmatpush1.bf16.msra.mxu0 %v7239_v19 }
 0xbb1   :  { %4528 = vmatprep.subr.bf16.mxu0 %v7244_v20  ;;  %4792 = vmatpush1.bf16.msra.mxu1 %v7303_v62  ;;  %v7354_v62 = vld [vmem:[%s9443_s3 + $0x4e0] ss:$8 sps:$4 sm:$0xff]  }
 0xbb2   :  { %4793 = vmatprep.subr.bf16.mxu1 %v7308_v63  ;;  %v7359_v63 = vld [vmem:[%s9443_s3 + $0x4f4] ss:$8 sps:$4 sm:$0xff]  }
 0xbb4   :  { %4529 = vmatpush1.bf16.msra.mxu0 %v7242_v21 }
 0xbb5   :  { %4530 = vmatprep.subr.bf16.mxu0 %v7247_v22  ;;  %4794 = vmatpush1.bf16.msra.mxu1 %v7306_v44  ;;  %v7357_v44 = vld [vmem:[%s9443_s3 + $0x4f0] ss:$8 sps:$4 sm:$0xff]  }
 0xbb6   :  { %4795 = vmatprep.subr.bf16.mxu1 %v7311_v42  ;;  %v7360_v42 = vld [vmem:[%s9445_s5 + $0x240] sm:$0xff]  }
 0xbb8   :  { %4531 = vmatpush1.bf16.msra.mxu0 %v7245_v26  ;;  %v7312_v26 = vld [vmem:[%s9443_s3 + $0x400] ss:$8 sps:$4 sm:$0xff]  }
 0xbb9   :  { %4532 = vmatprep.subr.bf16.mxu0 %v7250_v27  ;;  %4796 = vmatpush1.bf16.msra.mxu1 %v7309_v0  ;;  %v7314_v27 = vld [vmem:[%s9443_s3 + $0x404] ss:$8 sps:$4 sm:$0xff]  }
 0xbba   :  { %v7361_v0 = vld [vmem:[%s9445_s5 + $0x200] sm:$0xff]   ;;  %6544 = vmatprep.subr.bf16.mxu1 %v7360_v42 }
 0xbbc   :  { %4533 = vmatpush1.bf16.msra.mxu0 %v7248_v23  ;;  %v7317_v23 = vld [vmem:[%s9443_s3 + $0x414] ss:$8 sps:$4 sm:$0xff]  }
 0xbbd   :  { %4534 = vmatprep.subr.bf16.mxu0 %v7253_v28  ;;  %v7315_v28 = vld [vmem:[%s9443_s3 + $0x410] ss:$8 sps:$4 sm:$0xff]  }
 0xbc0   :  { %4535 = vmatpush1.bf16.msra.mxu0 %v7251_v30  ;;  %v7320_v30 = vld [vmem:[%s9443_s3 + $0x424] ss:$8 sps:$4 sm:$0xff]  }
 0xbc1   :  { %4536 = vmatprep.subr.bf16.mxu0 %v7256_v31  ;;  %v7318_v31 = vld [vmem:[%s9443_s3 + $0x420] ss:$8 sps:$4 sm:$0xff]  }
 0xbc4   :  { %4537 = vmatpush1.bf16.msra.mxu0 %v7254_v32  ;;  %v7323_v32 = vld [vmem:[%s9443_s3 + $0x434] ss:$8 sps:$4 sm:$0xff]  }
 0xbc5   :  { %4538 = vmatprep.subr.bf16.mxu0 %v7259_v6  ;;  %v7321_v6 = vld [vmem:[%s9443_s3 + $0x430] ss:$8 sps:$4 sm:$0xff]  }
 0xbc8   :  { %4539 = vmatpush1.bf16.msra.mxu0 %v7257_v4  ;;  %v7326_v4 = vld [vmem:[%s9443_s3 + $0x444] ss:$8 sps:$4 sm:$0xff]  }
 0xbc9   :  { %4540 = vmatprep.subr.bf16.mxu0 %v7262_v33  ;;  %v7324_v33 = vld [vmem:[%s9443_s3 + $0x440] ss:$8 sps:$4 sm:$0xff]  }
 0xbcc   :  { %4541 = vmatpush1.bf16.msra.mxu0 %v7260_v34  ;;  %v7329_v34 = vld [vmem:[%s9443_s3 + $0x454] ss:$8 sps:$4 sm:$0xff]  }
 0xbcd   :  { %5020 = vmatprep.subr.bf16.mxu0 %v7314_v27 }
 0xbcf   :  { %4543 = vmatmul.mubr.bf16.vlgmr.msra.gmra.mrb[32].mxu0 %v6216_v35  ;;  %v7327_v35 = vld [vmem:[%s9443_s3 + $0x450] ss:$8 sps:$4 sm:$0xff]  }
 0xbd0   :  { %5021 = vmatpush1.bf16.msra.mxu0 %v7312_v26 }
 0xbd1   :  { %5022 = vmatprep.subr.bf16.mxu0 %v7317_v23 }
 0xbd4   :  { %5023 = vmatpush1.bf16.msra.mxu0 %v7315_v28 }
 0xbd5   :  { %5024 = vmatprep.subr.bf16.mxu0 %v7320_v30 }
 0xbd8   :  { %5025 = vmatpush1.bf16.msra.mxu0 %v7318_v31 }
 0xbd9   :  { %5026 = vmatprep.subr.bf16.mxu0 %v7323_v32 }
 0xbdc   :  { %5027 = vmatpush1.bf16.msra.mxu0 %v7321_v6 }
 0xbdd   :  { %5028 = vmatprep.subr.bf16.mxu0 %v7326_v4 }
 0xbe0   :  { %5029 = vmatpush1.bf16.msra.mxu0 %v7324_v33 }
 0xbe1   :  { %5030 = vmatprep.subr.bf16.mxu0 %v7329_v34  ;;  %v7371_v34 = vld [vmem:[%s9445_s5 + $0x228] sm:$0xff]  }
 0xbe4   :  { %5031 = vmatpush1.bf16.msra.mxu0 %v7327_v35  ;;  %v7372_v35 = vld [vmem:[%s9445_s5 + $0x270] sm:$0xff]  }
 0xbe5   :  { %5032 = vmatprep.subr.bf16.mxu0 %v7332_v36  ;;  %v7373_v36 = vld [vmem:[%s9445_s5 + $0x230] sm:$0xff]  }
 0xbe8   :  { %5033 = vmatpush1.bf16.msra.mxu0 %v7330_v37  ;;  %v7374_v37 = vld [vmem:[%s9445_s5 + $0x278] sm:$0xff]  }
 0xbe9   :  { %5034 = vmatprep.subr.bf16.mxu0 %v7335_v38  ;;  %v7375_v38 = vld [vmem:[%s9445_s5 + $0x238] sm:$0xff]  }
 0xbec   :  { %5035 = vmatpush1.bf16.msra.mxu0 %v7333_v39  ;;  %v6347_v39 = vld [vmem:[%s9444_s4 + $0x4] ss:$8 sm:$0x3] }
 0xbed   :  { %5036 = vmatprep.subr.bf16.mxu0 %v7338_v41  ;;  %v4857_v41 = vrot.slane %v6347_v39, %v7846_v17 }
 0xbf0   :  { %5037 = vmatpush1.bf16.msra.mxu0 %v7336_v46 }
 0xbf1   :  { %5038 = vmatprep.subr.bf16.mxu0 %v7341_v48 }
 0xbf4   :  { %5039 = vmatpush1.bf16.msra.mxu0 %v7339_v24 }
 0xbf5   :  { %5040 = vmatprep.subr.bf16.mxu0 %v7344_v50 }
 0xbf8   :  { %5041 = vmatpush1.bf16.msra.mxu0 %v7342_v52 }
 0xbf9   :  { %5042 = vmatprep.subr.bf16.mxu0 %v7347_v53 }
 0xbfc   :  { %5043 = vmatpush1.bf16.msra.mxu0 %v7345_v54 }
 0xbfd   :  { %5044 = vmatprep.subr.bf16.mxu0 %v7350_v57 }
 0xc00   :  { %5045 = vmatpush1.bf16.msra.mxu0 %v7348_v58 }
 0xc01   :  { %5046 = vmatprep.subr.bf16.mxu0 %v7353_v59 }
 0xc04   :  { %5047 = vmatpush1.bf16.msra.mxu0 %v7351_v60  ;;  %v6412_v60 = vld [vmem:[%s9446_s6 + $0x4] ss:$0 sm:$0xff]  ;;  %s5686_s6 = sld [smem:[#allocation8 + $0x1]] }
 0xc05   :  { %5048 = vmatprep.subr.bf16.mxu0 %v7356_v61 }
 0xc08   :  { %5049 = vmatpush1.bf16.msra.mxu0 %v7354_v62 }
 0xc09   :  { %5050 = vmatprep.subr.bf16.mxu0 %v7359_v63 }
 0xc0c   :  { %5051 = vmatpush1.bf16.msra.mxu0 %v7357_v44 }
 0xc62   :  { %v6538_v3 = vpop.f32.mrb[28].mxu0 }
 0xc63   :  { %v6539_v2 = vpop.f32.mrb[29].mxu0 }
 0xc64   :  { %v6540_v7 = vadd.f32 %v6539_v2, %v6538_v3  ;;  %v6541_v8 = vpop.f32.mrb[30].mxu0  ;;  %v7362_v3 = vld [vmem:[%s9445_s5 + $0x248] sm:$0xff]   ;;  %v7364_v2 = vld [vmem:[%s9445_s5 + $0x250] sm:$0xff]  }
 0xc65   :  { %v6542_v10 = vpop.f32.mrb[31].mxu0 }
 0xc66   :  { %v4270_v11 = vadd.f32 %v6540_v7, %v6164_v5  ;;  %v6543_v56 = vadd.f32 %v6542_v10, %v6541_v8  ;;  %v7365_v7 = vld [vmem:[%s9445_s5 + $0x210] sm:$0xff]   ;;  %v7366_v8 = vld [vmem:[%s9445_s5 + $0x258] sm:$0xff]  }
 0xc67   :  { %v7367_v10 = vld [vmem:[%s9445_s5 + $0x218] sm:$0xff]  }
 0xc68   :  { %v4276_v55 = vmul.f32 0.01, %v4270_v11  ;;  %v4273_v13 = vadd.f32 %v6543_v56, %v6164_v5  ;;  %v7363_v5 = vld [vmem:[%s9445_s5 + $0x208] sm:$0xff]   ;;  %v7369_v56 = vld [vmem:[%s9445_s5 + $0x220] sm:$0xff]  }
 0xc6a   :  { %v4277_v18 = vmul.f32 0.01, %v4273_v13  ;;  %v4278_v19 = vmax.f32 %v4270_v11, %v4276_v55  ;;  %v7368_v11 = vld [vmem:[%s9445_s5 + $0x260] sm:$0xff]   ;;  %v7370_v55 = vld [vmem:[%s9445_s5 + $0x268] sm:$0xff]  }
 0xc6c   :  { %v4285_v20 = vmul.f32 %v6181_v16, %v4278_v19  ;;  %v4279_v21 = vmax.f32 %v4273_v13, %v4277_v18  ;;  %v6282_v13 = vld [vmem:[%s9442_s2 + $0x4] ss:$8 sm:$0x3] }
 0xc6d   :  { %v4602_v19 = vrot.slane %v6282_v13, %v7846_v17 }
 0xc6e   :  { %4287 = vadd.xlane.f32.xlu0 %v4285_v20  ;;  %v4286_v22 = vmul.f32 %v6181_v16, %v4279_v21  ;;  %v4598_v16 = vrot.slane %v6282_v13, %v7840_v14 }
 0xc70   :  { %4289 = vadd.xlane.f32.xlu1 %v4286_v22 }
 0xca2   :  { %v4544_v40 = vpop.f32.mrb[32].mxu0 }
 0xca3   :  { %v4546_v43 = vpop.f32.mrb[33].mxu0 }
 0xca4   :  { %v4548_v15 = vpop.f32.mrb[34].mxu0 }
 0xca5   :  { %v4553_v1 = vpack.c.bf16 %v4548_v15, %v4544_v40  ;;  %v4550_v45 = vpop.f32.mrb[35].mxu0  ;;  %v4853_v40 = vrot.slane %v6347_v39, %v7840_v14 }
 0xca6   :  { %v4554_v29 = vpack.c.bf16 %v4550_v45, %v4546_v43 }
 0xca7   :  { %v4555_v49 = vmul.bf16 1009007652, %v4553_v1 }
 0xca8   :  { %v4556_v25 = vmul.bf16 1009007652, %v4554_v29 }
 0xca9   :  { %v9308_v51 = vmax.bf16 %v4555_v49, %v4553_v1 }
 0xcaa   :  { %v9303_v47 = vmax.bf16 %v4556_v25, %v4554_v29 }
 0xcab   :  { %v5063_v1 = vunpack.c.l.bf16 %v9308_v51  ;;  %v5065_v24 = vunpack.c.h.bf16 %v9308_v51 }
 0xcac   :  { %4797 = vmatprep.mubr.bf16.mxu1 %v9303_v47  ;;  %v5064_v29 = vunpack.c.l.bf16 %v9303_v47  ;;  %v5066_v14 = vunpack.c.h.bf16 %v9303_v47  ;;  %v6429_v47 = vld [vmem:[%s9447_s7 + $0x4] ss:$0 sm:$0xff]  ;;  %s9413_s7 = sld [smem:[#allocation10 + $0x1]] }
 0xcad   :  { %4798 = vmatmul.mubr.bf16.vlgmr.msra.gmra.mrb[32].mxu1 %v9308_v51 }
 0xcae   :  { %6545 = vmatpush3.bf16.msra.mxu1 %v7361_v0 }
 0xcaf   :  { %6546 = vmatprep.subr.bf16.mxu1 %v7362_v3 }
 0xcb2   :  { %6547 = vmatpush3.bf16.msra.mxu1 %v7363_v5 }
 0xcb3   :  { %6548 = vmatprep.subr.bf16.mxu1 %v7364_v2 }
 0xcb6   :  { %6549 = vmatpush3.bf16.msra.mxu1 %v7365_v7 }
 0xcb7   :  { %6550 = vmatprep.subr.bf16.mxu1 %v7366_v8 }
 0xcba   :  { %6551 = vmatpush3.bf16.msra.mxu1 %v7367_v10 }
 0xcbb   :  { %6552 = vmatprep.subr.bf16.mxu1 %v7368_v11  ;;  %v1372_v11 = vpop.xlane.xlu0 %1371 }
 0xcbe   :  { %6553 = vmatpush3.bf16.msra.mxu1 %v7369_v56  ;;  %v2344_v56 = vpop.xlane.xlu1 %2343 }
 0xcbf   :  { %6554 = vmatprep.subr.bf16.mxu1 %v7370_v55  ;;  %v1374_v55 = vpop.xlane.xlu0 %1373 }
 0xcc2   :  { %6555 = vmatpush3.bf16.msra.mxu1 %v7371_v34  ;;  %v2346_v13 = vpop.xlane.xlu1 %2345 }
 0xcc3   :  { %6556 = vmatprep.subr.bf16.mxu1 %v7372_v35 }
 0xcc6   :  { %6557 = vmatpush3.bf16.msra.mxu1 %v7373_v36 }
 0xcc7   :  { %6558 = vmatprep.subr.bf16.mxu1 %v7374_v37 }
 0xcca   :  { %6559 = vmatpush3.bf16.msra.mxu1 %v7375_v38 }
 0xd80   :  { %v4799_v18 = vpop.f32.mrb[32].mxu1 }
 0xd81   :  { %v4801_v20 = vpop.f32.mrb[33].mxu1  ;;  %v4800_v22 = vadd.f32 %v4799_v18, %v4598_v16  ;;  %v3316_v18 = vpop.xlane.xlu0 %3315 }
 0xd82   :  { %v4803_v21 = vpop.f32.mrb[34].mxu1  ;;  %v4802_v23 = vadd.f32 %v4801_v20, %v4602_v19 }
 0xd83   :  { %v4804_v26 = vadd.f32 %v4803_v21, %v4598_v16  ;;  %v4805_v27 = vpop.f32.mrb[35].mxu1  ;;  %v2348_v16 = vstv %s5686_s6  ;;  %v3320_v21 = vstv %s5934_s29 }
 0xd84   :  { %v4806_v28 = vadd.f32 %v4805_v27, %v4602_v19  ;;  %v1376_v19 = vstv %s1375_s28  ;;  %v2349_v20 = vadd.f32 %v2348_v16, %v2344_v56  ;;  %v2350_v27 = vadd.f32 %v2348_v16, %v2346_v13 }
 0xd85   :  { %v4808_v30 = vpack.c.bf16 %v4804_v26, %v4800_v22  ;;  %v3318_v22 = vpop.xlane.xlu1 %3317  ;;  %v1377_v26 = vadd.f32 %v1376_v19, %v1372_v11  ;;  %v5278_v16 = vstv %s9450_s10 }
 0xd86   :  { %v4809_v31 = vpack.c.bf16 %v4806_v28, %v4802_v23  ;;  %v4292_v23 = vstv %s6182_s30  ;;  %v4288_v28 = vpop.xlane.xlu0 %4287  ;;  %v2352_v35 = vmul.f32 0.01, %v2350_v27 }
 0xd87   :  { %v4810_v32 = vmul.bf16 1009007652, %v4808_v30  ;;  %v1379_v34 = vmul.f32 0.01, %v1377_v26 }
 0xd88   :  { %v4811_v6 = vmul.bf16 1009007652, %v4809_v31 }
 0xd89   :  { %v4812_v33 = vmax.bf16 %v4810_v32, %v4808_v30  ;;  %v1378_v30 = vadd.f32 %v1376_v19, %v1374_v55  ;;  %v2351_v32 = vmul.f32 0.01, %v2349_v20 }
 0xd8a   :  { %v4813_v4 = vmax.bf16 %v4811_v6, %v4809_v31  ;;  %v3321_v31 = vadd.f32 %v3320_v21, %v3316_v18  ;;  %v3322_v6 = vadd.f32 %v3320_v21, %v3318_v22 }
 0xd8b   :  { %v1380_v36 = vmul.f32 0.01, %v1378_v30  ;;  %v2353_v39 = vmax.f32 %v2349_v20, %v2351_v32 }
 0xd8c   :  { %5052 = vmatprep.mubr.bf16.mxu0 %v4813_v4  ;;  %v4290_v4 = vpop.xlane.xlu1 %4289  ;;  %v3323_v37 = vmul.f32 0.01, %v3321_v31 }
 0xd8d   :  { %5053 = vmatmul.mubr.bf16.vlgmr.msra.gmra.mrb[36].mxu0 %v4812_v33  ;;  %v4293_v33 = vadd.f32 %v4292_v23, %v4288_v28  ;;  %v4294_v38 = vadd.f32 %v4292_v23, %v4290_v4 }
 0xe60   :  { %v5054_v43 = vpop.f32.mrb[36].mxu0 }
 0xe61   :  { %v5055_v15 = vadd.f32 %v5054_v43, %v4853_v40  ;;  %v5056_v45 = vpop.f32.mrb[37].mxu0  ;;  %v4295_v43 = vmul.f32 0.01, %v4293_v33 }
 0xe62   :  { %v5057_v46 = vadd.f32 %v5056_v45, %v4857_v41  ;;  %v5058_v48 = vpop.f32.mrb[38].mxu0  ;;  %v1384_v45 = vstv %s9415_s14 }
 0xe63   :  { %v5067_v49 = vadd.f32 %v5063_v1, %v5055_v15  ;;  %v5059_v25 = vadd.f32 %v5058_v48, %v4853_v40  ;;  %v5060_v50 = vpop.f32.mrb[39].mxu0  ;;  %v3324_v40 = vmul.f32 0.01, %v3322_v6  ;;  %v1381_v15 = vmax.f32 %v1377_v26, %v1379_v34 }
 0xe64   :  { %v5068_v52 = vadd.f32 %v5064_v29, %v5057_v46  ;;  %v5061_v53 = vadd.f32 %v5060_v50, %v4857_v41  ;;  %v2356_v41 = vstv %s9413_s7  ;;  %v2354_v1 = vmax.f32 %v2350_v27, %v2352_v35 }
 0xe65   :  { %v5069_v54 = vadd.f32 %v5065_v24, %v5059_v25  ;;  %v1382_v46 = vmax.f32 %v1378_v30, %v1380_v36  ;;  %v3325_v29 = vmax.f32 %v3321_v31, %v3323_v37  ;;  %v4296_v48 = vmul.f32 0.01, %v4294_v38 }
 0xe66   :  { %v5070_v17 = vadd.f32 %v5066_v14, %v5061_v53  ;;  %v3328_v25 = vstv %s9417_s15  ;;  %v3326_v24 = vmax.f32 %v3322_v6, %v3324_v40  ;;  %v5264_v50 = vstv %s9419_s16 }
 0xe67   :  { %v5071_v57 = vpack.c.bf16 %v5069_v54, %v5067_v49  ;;  %v2357_v49 = vmul.f32 %v2356_v41, %v2353_v39  ;;  %v1385_v53 = vmul.f32 %v1384_v45, %v1381_v15  ;;  %v2358_v14 = vmul.f32 %v2356_v41, %v2354_v1 }
 0xe68   :  { %v5072_v58 = vpack.c.bf16 %v5070_v17, %v5068_v52  ;;  %v4297_v52 = vmax.f32 %v4293_v33, %v4295_v43  ;;  %v4300_v54 = vstv %s9421_s12 }
 0xe6a   :  { %5239 = vmatprep.mubr.bf16.mxu1 %v5072_v58  ;;  %v4298_v58 = vmax.f32 %v4294_v38, %v4296_v48 }
 0xe6b   :  { %5240 = vmatmul.mubr.bf16.vlgmr.msra.gmra.mrb[36].mxu1 %v5071_v57  ;;  %v3329_v57 = vmul.f32 %v3328_v25, %v3325_v29 }
 0xf3e   :  { %v6560_v59 = vpop.f32.mrb[36].mxu1 }
 0xf3f   :  { %v6561_v61 = vpop.f32.mrb[37].mxu1 }
 0xf40   :  { %v6562_v62 = vadd.f32 %v6561_v61, %v6560_v59  ;;  %v6563_v63 = vpop.f32.mrb[38].mxu1  ;;  %v2359_v61 = vadd.f32 %v2357_v49, %v1385_v53 }
 0xf41   :  { %v6564_v51 = vpop.f32.mrb[39].mxu1 }
 0xf42   :  { %v5242_v44 = vadd.f32 %v6562_v62, %v6412_v60  ;;  %v6565_v42 = vadd.f32 %v6564_v51, %v6563_v63  ;;  %v3330_v62 = vmul.f32 %v3328_v25, %v3326_v24  ;;  %v4301_v51 = vmul.f32 %v4300_v54, %v4297_v52 }
 0xf44   :  { %v5248_v0 = vmul.f32 0.01, %v5242_v44  ;;  %v5245_v3 = vadd.f32 %v6565_v42, %v6412_v60  ;;  %v1386_v60 = vmul.f32 %v1384_v45, %v1382_v46 }
 0xf46   :  { %v5249_v5 = vmul.f32 0.01, %v5245_v3  ;;  %v5250_v2 = vmax.f32 %v5242_v44, %v5248_v0  ;;  %v5284_v44 = vand.u32 127, %v214_v9 }
 0xf48   :  { %v5257_v7 = vmul.f32 %v6429_v47, %v5250_v2  ;;  %v5251_v8 = vmax.f32 %v5245_v3, %v5249_v5  ;;  %v2360_v3 = vadd.f32 %v2358_v14, %v1386_v60  ;;  %v3331_v5 = vadd.f32 %v3329_v57, %v2359_v61 }
 0xf49   :  { %v4302_v2 = vmul.f32 %v4300_v54, %v4298_v58  ;;  %v5289_v55 = vadd.s32 4294967288, %v5284_v44  ;;  %v5287_v20 = vsub.s32 %v5284_v44, %v7516_v12 }
 0xf4a   :  { %5259 = vadd.xlane.f32.xlu0 %v5257_v7  ;;  %v5258_v10 = vmul.f32 %v6429_v47, %v5251_v8  ;;  %v5272_v47 = vstv %s9424_s17  ;;  %v4303_v11 = vadd.f32 %v4301_v51, %v3331_v5 }
 0xf4b   :  { %v5292_v22 = vsub.s32 %v5289_v55, %v7516_v12 }
 0xf4c   :  { %5261 = vadd.xlane.f32.xlu1 %v5258_v10  ;;  %v3332_v10 = vadd.f32 %v3330_v62, %v2360_v3 }
 0xf4e   :  { %v4304_v18 = vadd.f32 %v4302_v2, %v3332_v10 }
 0xfd7   :  { %v5260_v17 = vpop.xlane.xlu0 %5259 }
 0xfd8   :  { %v5265_v59 = vadd.f32 %v5264_v50, %v5260_v17 }
 0xfd9   :  { %v5262_v63 = vpop.xlane.xlu1 %5261 }
 0xfda   :  { %v5267_v42 = vmul.f32 0.01, %v5265_v59  ;;  %v5266_v0 = vadd.f32 %v5264_v50, %v5262_v63 }
 0xfdc   :  { %v5269_v7 = vmax.f32 %v5265_v59, %v5267_v42  ;;  %v5268_v8 = vmul.f32 0.01, %v5266_v0 }
 0xfde   :  { %v5273_v56 = vmul.f32 %v5272_v47, %v5269_v7  ;;  %v5270_v13 = vmax.f32 %v5266_v0, %v5268_v8 }
 0xfe0   :  { %v5275_v19 = vadd.f32 %v5273_v56, %v4303_v11  ;;  %v5274_v9 = vmul.f32 %v5272_v47, %v5270_v13 }
 0xfe2   :  { %v5279_v21 = vadd.f32 %v5278_v16, %v5275_v19  ;;  %v5276_v26 = vadd.f32 %v5274_v9, %v4304_v18 }
 0xfe4   :  { %v5280_v27 = vadd.f32 %v5278_v16, %v5276_v26  ;;  %v5288_v23 = vrot.slane %v5279_v21, %v5287_v20 }
 0xfe6   :  { %v5293_v28 = vrot.slane %v5280_v27, %v5292_v22 }
 0xfe8   :  { %v5295_v30 = vsel %vm5294_vm1, %v5293_v28, %v5288_v23 }
 0xfe9   :  { %5298 = vst.msk [vmem:[%s9453_s13] sm:$0x1] %vm5297_vm2, %v5295_v30 }
 0xfea   :  { %5303 = vsyncpa [#allocation9], 1 }
 0xfeb   :  { %5304 = vsyncpa [#allocation11], 1 }

</bundles_post_ra>
